<compile_context>
chip_gen: v5e
topology: v5e:2x2
jax: 0.10.0
libtpu: 0.0.40
codegen_flags: <defaults>
</compile_context>

<pallas_src>
import functools

import jax
import jax.numpy as jnp
from jax.experimental import pallas as pl
from jax.experimental.pallas import tpu as pltpu


# ---------------------------------------------------------------------------
# Static sizes (lane-padded)
# ---------------------------------------------------------------------------
FEAT = 1000          # logical feature / class count (module's Linear(1000,1000))
FEAT_PAD = 1024      # padded to a multiple of 128
STEM_C = 128         # stand-in stem channels (lane aligned)
K_RAW = 27           # 3x3 conv * 3 input channels
K_PAD = 32           # padded contraction dim per im2col row
PACK = 4             # im2col rows packed per lane-row (4 * 32 = 128 lanes)
K_PACKED = PACK * K_PAD      # 128
C_PACKED = PACK * STEM_C     # 512


def _round_up(x, m):
    return (x + m - 1) // m * m


def _vmem_limit_bytes():
    """Generation-aware VMEM budget: ~48 MiB on v7x, ~96 MiB on v5e/v6e."""
    cap = 128 << 20
    try:
        info = pltpu.get_tpu_info()
        cap = int(getattr(info, "vmem_capacity_bytes", cap))
    except Exception:
        pass
    return int(max(32 << 20, min(cap * 3 // 4, 100 << 20)))


# ---------------------------------------------------------------------------
# Fused kernel: stem conv + swish + global avg pool + classifier FC
#               + module head (relu -> FC -> softmax)
# ---------------------------------------------------------------------------
def fused_stem_head_kernel(p_ref, w2_ref, b2_ref, wbb_ref, bbb_ref,
                           wfc_ref, bfc_ref, o_ref, acc_ref,
                           *, hw, tmp, has_pad):
    """grid = (B, n_m); m is the pool-reduction axis.

      p_ref : (1, tmp, 128)   bf16 packed im2col patches (4 M-rows / lane-row)
      w2    : (128, 512)      bf16 block-diagonal stem weight
      b2    : (1, 512)        f32  stem bias tiled x4 along lanes
      wbb   : (128, 1024)     bf16   bbb : (1, 1024) f32
      wfc   : (1024, 1024)    bf16   bfc : (1, 1024) f32
      o_ref : (1, 1, 1024)    f32  softmax probabilities (lanes >= FEAT == 0)
      acc   : (8, 512)        f32  per-sublane partial spatial sums
    """
    m = pl.program_id(1)
    last = pl.num_programs(1) - 1

    @pl.when(m == 0)
    def _():
        acc_ref[...] = jnp.zeros_like(acc_ref)

    # Stem conv as a lane-dense packed matmul; lane group g holds the 128
    # output channels of M row 4*r + g.
    z = jnp.dot(p_ref[0], w2_ref[...], preferred_element_type=jnp.float32)
    z = z + b2_ref[...]
    act = z * jax.nn.sigmoid(z)                         # swish (EfficientNet stem)

    def accumulate(a):
        # (tmp, 512) -> (tmp//8, 8, 512) is a pure vreg-tile regroup; summing
        # axis 0 is plain VPU adds.  The 8->1 cross-sublane reduce happens
        # once per batch in the finalize branch below.
        acc_ref[...] += jnp.sum(a.reshape(tmp // 8, 8, C_PACKED), axis=0)

    if has_pad:
        @pl.when(m != last)
        def _():
            accumulate(act)
    else:
        accumulate(act)

    @pl.when(m == last)
    def _():
        if has_pad:
            # Only the last tile contains M-padding rows (patches are zero but
            # bias + swish is not) -- mask them out of the pool here only.
            r = jax.lax.broadcasted_iota(jnp.int32, act.shape, 0)
            grp = jax.lax.broadcasted_iota(jnp.int32, act.shape, 1) // STEM_C
            midx = PACK * (m * tmp + r) + grp
            accumulate(jnp.where(midx < hw, act, 0.0))

        # ---- global average pool (single XLU reduce + 4 lane-group adds) ---
        srow = jnp.sum(acc_ref[...], axis=0, keepdims=True)          # (1, 512)
        pooled = (srow[:, 0 * STEM_C:1 * STEM_C]
                  + srow[:, 1 * STEM_C:2 * STEM_C]
                  + srow[:, 2 * STEM_C:3 * STEM_C]
                  + srow[:, 3 * STEM_C:4 * STEM_C]) * (1.0 / hw)     # (1, 128)

        # ---- stand-in backbone classifier FC -------------------------------
        feat = jnp.dot(pooled.astype(jnp.bfloat16), wbb_ref[...],
                       preferred_element_type=jnp.float32) + bbb_ref[...]

        # ---- module head: relu -> FC(1000,1000) -> softmax ------------------
        feat = jnp.maximum(feat, 0.0)                                 # relu
        logits = jnp.dot(feat.astype(jnp.bfloat16), wfc_ref[...],
                         preferred_element_type=jnp.float32) + bfc_ref[...]

        # keep padded classes out of the softmax (padded cols give logits == 0)
        lane = jax.lax.broadcasted_iota(jnp.int32, logits.shape, 1)
        logits = jnp.where(lane < FEAT, logits, -1e30)

        mx = jnp.max(logits, axis=-1, keepdims=True)
        e = jnp.exp(logits - mx)
        s = jnp.sum(e, axis=-1, keepdims=True)
        o_ref[0] = e * pl.reciprocal(s, approx=True)


# ---------------------------------------------------------------------------
# Wrapper
# ---------------------------------------------------------------------------
def _im2col_3x3_s2(x_nhwc):
    """3x3 / stride-2 / pad-1 patch extraction (XLA glue).

    TODO(synk): form patches fully in-kernel from overlapping NHWC row windows
    (manual strided DMA); here the pad/cast/pack below fuses into a single
    lane-dense bf16 materialization instead of the old 9x f32 tensor.
    """
    x = jnp.pad(x_nhwc, ((0, 0), (1, 1), (1, 1), (0, 0)))
    B, Hp, Wp, C = x.shape
    Ho = (Hp - 3) // 2 + 1
    Wo = (Wp - 3) // 2 + 1
    taps = [x[:, i:i + 2 * Ho:2, j:j + 2 * Wo:2, :]
            for i in range(3) for j in range(3)]
    p = jnp.concatenate(taps, axis=-1)                   # (B, Ho, Wo, 9*C)
    return p.reshape(B, Ho * Wo, 9 * C), Ho, Wo


def init_params(key, scale=0.1):
    ks = jax.random.split(key, 6)

    def normal(k, shape):
        return scale * jax.random.normal(k, shape, jnp.float32)

    # Stand-in stem conv weight; K rows 27..31 are inert padding.
    w_stem = normal(ks[0], (K_PAD, STEM_C)).at[K_RAW:, :].set(0.0)
    b_stem = normal(ks[1], (1, STEM_C))

    # Block-diagonal packed stem weight for the lane-dense patch layout:
    # packed row = [p_{4r} | p_{4r+1} | p_{4r+2} | p_{4r+3}] (32 lanes each),
    # output lanes [128g, 128(g+1)) hold the conv output of M row 4r+g.
    w2 = jnp.zeros((K_PACKED, C_PACKED), jnp.float32)
    for g in range(PACK):
        w2 = w2.at[g * K_PAD:(g + 1) * K_PAD,
                   g * STEM_C:(g + 1) * STEM_C].set(w_stem)
    b2 = jnp.tile(b_stem, (1, PACK))

    def zero_cols(w):
        return w.at[..., FEAT:].set(0.0)

    w_bb = zero_cols(normal(ks[2], (STEM_C, FEAT_PAD)))
    b_bb = zero_cols(normal(ks[3], (1, FEAT_PAD)))
    w_fc = normal(ks[4], (FEAT_PAD, FEAT_PAD))
    w_fc = zero_cols(w_fc.at[FEAT:, :].set(0.0))
    b_fc = zero_cols(normal(ks[5], (1, FEAT_PAD)))

    return {
        "w2_stem": w2.astype(jnp.bfloat16),
        "b2_stem": b2,
        "w_bb": w_bb.astype(jnp.bfloat16),
        "b_bb": b_bb,
        "w_fc": w_fc.astype(jnp.bfloat16),
        "b_fc": b_fc,
    }


def network_efficientnet_forward(params, x_nchw, *, tm_max=4096):
    """Forward pass. x_nchw: (B, 3, H, W) float32 -> (B, 1000) softmax probs."""
    vmem = _vmem_limit_bytes()
    x = jnp.transpose(x_nchw, (0, 2, 3, 1))             # NCHW -> NHWC

    patches, Ho, Wo = _im2col_3x3_s2(x)                  # (B, M, 27) f32
    B, M, K = patches.shape

    # Tile sizing: as few ~tm_max-row tiles as possible; tm is a multiple of
    # 32 so the packed tile has a multiple-of-8 sublane count (PACK=4).
    n_m = max(1, pl.cdiv(M, tm_max))
    tm = _round_up(pl.cdiv(M, n_m), PACK * 8)
    m_pad = n_m * tm
    assert m_pad - M < tm                                # padding only on last tile
    tmp = tm // PACK

    # Single fused XLA materialization: pad K 27->32 & M, cast bf16, pack
    # 4 M-rows per 128-lane row -> lane-dense loads in the kernel.
    p = jnp.pad(patches, ((0, 0), (0, m_pad - M), (0, K_PAD - K)))
    p = p.astype(jnp.bfloat16).reshape(B, m_pad // PACK, K_PACKED)

    probs = pl.pallas_call(
        functools.partial(fused_stem_head_kernel, hw=M, tmp=tmp,
                          has_pad=(m_pad != M)),
        out_shape=jax.ShapeDtypeStruct((B, 1, FEAT_PAD), jnp.float32),
        grid_spec=pltpu.PrefetchScalarGridSpec(
            num_scalar_prefetch=0,
            grid=(B, n_m),
            in_specs=[
                pl.BlockSpec((1, tmp, K_PACKED), lambda b, m: (b, m, 0)),
                pl.BlockSpec((K_PACKED, C_PACKED), lambda b, m: (0, 0)),
                pl.BlockSpec((1, C_PACKED), lambda b, m: (0, 0)),
                pl.BlockSpec((STEM_C, FEAT_PAD), lambda b, m: (0, 0)),
                pl.BlockSpec((1, FEAT_PAD), lambda b, m: (0, 0)),
                pl.BlockSpec((FEAT_PAD, FEAT_PAD), lambda b, m: (0, 0)),
                pl.BlockSpec((1, FEAT_PAD), lambda b, m: (0, 0)),
            ],
            out_specs=pl.BlockSpec((1, 1, FEAT_PAD), lambda b, m: (b, 0, 0)),
            scratch_shapes=[pltpu.VMEM((8, C_PACKED), jnp.float32)],
        ),
        compiler_params=pltpu.CompilerParams(
            dimension_semantics=("parallel", "arbitrary"),
            vmem_limit_bytes=vmem,
        ),
    )(p, params["w2_stem"], params["b2_stem"],
      params["w_bb"], params["b_bb"], params["w_fc"], params["b_fc"])

    return probs.reshape(B, FEAT_PAD)[:, :FEAT]          # (B, 1000)


def reference_forward(params, x_nchw):
    """Pure-JAX reference with the same bf16 operand rounding as the kernel."""
    patches, _, _ = _im2col_3x3_s2(jnp.transpose(x_nchw, (0, 2, 3, 1)))
    B, M, K = patches.shape
    p = jnp.pad(patches, ((0, 0), (0, 0), (0, K_PAD - K)))
    p = p.astype(jnp.bfloat16).astype(jnp.float32)
    w_stem = params["w2_stem"][:K_PAD, :STEM_C].astype(jnp.float32)
    b_stem = params["b2_stem"][:, :STEM_C]
    z = jnp.einsum("bmk,kc->bmc", p, w_stem) + b_stem
    act = z * jax.nn.sigmoid(z)
    pooled = jnp.mean(act, axis=1)
    pooled = pooled.astype(jnp.bfloat16).astype(jnp.float32)
    feat = pooled @ params["w_bb"].astype(jnp.float32) + params["b_bb"]
    feat = jnp.maximum(feat, 0.0).astype(jnp.bfloat16).astype(jnp.float32)
    logits = feat @ params["w_fc"].astype(jnp.float32) + params["b_fc"]
    return jax.nn.softmax(logits[:, :FEAT], axis=-1)


if __name__ == "__main__":
    key = jax.random.PRNGKey(0)
    k_param, k_x1, k_x2 = jax.random.split(key, 3)

    params = init_params(k_param)

    # Case 1: single-tile path (16x16 -> Ho*Wo = 64, no M padding).
    x1 = jax.random.normal(k_x1, (2, 3, 16, 16), jnp.float32)
    out1 = jax.block_until_ready(network_efficientnet_forward(params, x1))
    ref1 = jax.block_until_ready(reference_forward(params, x1))
    assert out1.shape == (2, FEAT)
    assert bool(jnp.all(jnp.abs(jnp.sum(out1, axis=-1) - 1.0) < 5e-3))
    assert bool(jnp.all(out1 >= 0.0))
    assert float(jnp.max(jnp.abs(out1 - ref1))) < 2e-3

    # Case 2: multi-tile path with masked last tile (18x18 -> M = 81, tm = 32).
    x2 = jax.random.normal(k_x2, (1, 3, 18, 18), jnp.float32)
    out2 = jax.block_until_ready(
        network_efficientnet_forward(params, x2, tm_max=32))
    ref2 = jax.block_until_ready(reference_forward(params, x2))
    assert out2.shape == (1, FEAT)
    assert bool(jnp.all(jnp.abs(jnp.sum(out2, axis=-1) - 1.0) < 5e-3))
    assert float(jnp.max(jnp.abs(out2 - ref2))) < 2e-3

    print("KERNEL_OK")
</pallas_src>

<mosaic_0001>
module attributes {stable_mosaic.version = 11 : i64} {
  func.func @fused_stem_head_kernel(%arg0: i32, %arg1: i32, %arg2: memref<1x16x128xbf16, #tpu.memory_space<vmem>>, %arg3: memref<128x512xbf16, #tpu.memory_space<vmem>>, %arg4: memref<1x512xf32, #tpu.memory_space<vmem>>, %arg5: memref<128x1024xbf16, #tpu.memory_space<vmem>>, %arg6: memref<1x1024xf32, #tpu.memory_space<vmem>>, %arg7: memref<1024x1024xbf16, #tpu.memory_space<vmem>>, %arg8: memref<1x1024xf32, #tpu.memory_space<vmem>>, %arg9: memref<1x1x1024xf32, #tpu.memory_space<vmem>>, %arg10: memref<8x512xf32, #tpu.memory_space<vmem>>) attributes {dimension_semantics = [#tpu.dimension_semantics<parallel>, #tpu.dimension_semantics<arbitrary>], iteration_bounds = array<i64: 2, 1>, scalar_prefetch = 0 : i64, scratch_operands = 1 : i64, tpu.core_type = #tpu.core_type<tc>, window_params = [{transform_indices = @transform_0, window_bounds = array<i64: 1, 16, 128>}, {pipeline_mode = #tpu.pipeline_mode<synchronous>, transform_indices = @transform_1, window_bounds = array<i64: 128, 512>}, {pipeline_mode = #tpu.pipeline_mode<synchronous>, transform_indices = @transform_2, window_bounds = array<i64: 1, 512>}, {pipeline_mode = #tpu.pipeline_mode<synchronous>, transform_indices = @transform_3, window_bounds = array<i64: 128, 1024>}, {pipeline_mode = #tpu.pipeline_mode<synchronous>, transform_indices = @transform_4, window_bounds = array<i64: 1, 1024>}, {pipeline_mode = #tpu.pipeline_mode<synchronous>, transform_indices = @transform_5, window_bounds = array<i64: 1024, 1024>}, {pipeline_mode = #tpu.pipeline_mode<synchronous>, transform_indices = @transform_6, window_bounds = array<i64: 1, 1024>}, {transform_indices = @transform_7, window_bounds = array<i64: 1, 1, 1024>}]} {
    %c0_i32 = arith.constant 0 : i32
    %0 = arith.cmpi eq, %arg1, %c0_i32 : i32
    %1 = arith.extui %0 : i1 to i32
    %c0_i32_0 = arith.constant 0 : i32
    %2 = arith.cmpi ne, %1, %c0_i32_0 : i32
    scf.if %2 {
      %cst_15 = arith.constant 0.000000e+00 : f32
      %24 = vector.broadcast %cst_15 : f32 to vector<8x512xf32>
      %c0_16 = arith.constant 0 : index
      %c0_17 = arith.constant 0 : index
      %25 = vector.load %arg10[%c0_16, %c0_17] : memref<8x512xf32, #tpu.memory_space<vmem>>, vector<8x512xf32>
      tpu.vector_store %arg10[%c0_16, %c0_17], %24 {strides = array<i32>} : memref<8x512xf32, #tpu.memory_space<vmem>>, vector<8x512xf32>,
    } else {
    }
    %c0 = arith.constant 0 : index
    %c0_1 = arith.constant 0 : index
    %c0_2 = arith.constant 0 : index
    %3 = vector.load %arg2[%c0, %c0_1, %c0_2] : memref<1x16x128xbf16, #tpu.memory_space<vmem>>, vector<1x16x128xbf16>
    %4 = vector.shape_cast %3 : vector<1x16x128xbf16> to vector<16x128xbf16>
    %c0_3 = arith.constant 0 : index
    %c0_4 = arith.constant 0 : index
    %5 = vector.load %arg3[%c0_3, %c0_4] : memref<128x512xbf16, #tpu.memory_space<vmem>>, vector<128x512xbf16>
    %cst = arith.constant dense<0.000000e+00> : vector<16x512xf32>
    %6 = tpu.matmul %4, %5, %cst {dimension_numbers = #tpu.dot_dimension_numbers<[1], [0], [0], [1], [0, 0, 1, 1], [], []>} : vector<16x128xbf16>, vector<128x512xbf16>, vector<16x512xf32> -> vector<16x512xf32>
    %c0_5 = arith.constant 0 : index
    %c0_6 = arith.constant 0 : index
    %7 = vector.load %arg4[%c0_5, %c0_6] : memref<1x512xf32, #tpu.memory_space<vmem>>, vector<1x512xf32>
    %8 = vector.broadcast %7 : vector<1x512xf32> to vector<16x512xf32>
    %9 = arith.addf %6, %8 : vector<16x512xf32>
    %10 = arith.negf %9 : vector<16x512xf32>
    %11 = math.exp %10 : vector<16x512xf32>
    %cst_7 = arith.constant 1.000000e+00 : f32
    %12 = vector.broadcast %cst_7 : f32 to vector<16x512xf32>
    %13 = arith.addf %12, %11 : vector<16x512xf32>
    %14 = arith.divf %12, %13 : vector<16x512xf32>
    %15 = arith.mulf %9, %14 : vector<16x512xf32>
    %c0_8 = arith.constant 0 : index
    %c0_9 = arith.constant 0 : index
    %16 = vector.load %arg10[%c0_8, %c0_9] : memref<8x512xf32, #tpu.memory_space<vmem>>, vector<8x512xf32>
    %17 = vector.shape_cast %15 : vector<16x512xf32> to vector<2x8x512xf32>
    %cst_10 = arith.constant dense<0.000000e+00> : vector<8x512xf32>
    %18 = vector.multi_reduction <add>, %17, %cst_10 [0] : vector<2x8x512xf32> to vector<8x512xf32>
    %19 = arith.addf %16, %18 : vector<8x512xf32>
    %c0_11 = arith.constant 0 : index
    %c0_12 = arith.constant 0 : index
    %20 = vector.load %arg10[%c0_11, %c0_12] : memref<8x512xf32, #tpu.memory_space<vmem>>, vector<8x512xf32>
    tpu.vector_store %arg10[%c0_11, %c0_12], %19 {strides = array<i32>} : memref<8x512xf32, #tpu.memory_space<vmem>>, vector<8x512xf32>,
    %c0_i32_13 = arith.constant 0 : i32
    %21 = arith.cmpi eq, %arg1, %c0_i32_13 : i32
    %22 = arith.extui %21 : i1 to i32
    %c0_i32_14 = arith.constant 0 : i32
    %23 = arith.cmpi ne, %22, %c0_i32_14 : i32
    scf.if %23 {
      %c0_15 = arith.constant 0 : index
      %c0_16 = arith.constant 0 : index
      %24 = vector.load %arg10[%c0_15, %c0_16] : memref<8x512xf32, #tpu.memory_space<vmem>>, vector<8x512xf32>
      %cst_17 = arith.constant dense<0.000000e+00> : vector<512xf32>
      %25 = vector.multi_reduction <add>, %24, %cst_17 [0] : vector<8x512xf32> to vector<512xf32>
      %26 = vector.shape_cast %25 : vector<512xf32> to vector<1x512xf32>
      %27 = vector.extract_strided_slice %26 {offsets = [0, 0], sizes = [1, 128], strides = [1, 1]} : vector<1x512xf32> to vector<1x128xf32>
      %28 = vector.extract_strided_slice %26 {offsets = [0, 128], sizes = [1, 128], strides = [1, 1]} : vector<1x512xf32> to vector<1x128xf32>
      %29 = arith.addf %27, %28 : vector<1x128xf32>
      %30 = vector.extract_strided_slice %26 {offsets = [0, 256], sizes = [1, 128], strides = [1, 1]} : vector<1x512xf32> to vector<1x128xf32>
      %31 = arith.addf %29, %30 : vector<1x128xf32>
      %32 = vector.extract_strided_slice %26 {offsets = [0, 384], sizes = [1, 128], strides = [1, 1]} : vector<1x512xf32> to vector<1x128xf32>
      %33 = arith.addf %31, %32 : vector<1x128xf32>
      %cst_18 = arith.constant 1.562500e-02 : f32
      %34 = vector.broadcast %cst_18 : f32 to vector<1x128xf32>
      %35 = arith.mulf %33, %34 : vector<1x128xf32>
      %36 = arith.truncf %35 : vector<1x128xf32> to vector<1x128xbf16>
      %c0_19 = arith.constant 0 : index
      %c0_20 = arith.constant 0 : index
      %37 = vector.load %arg5[%c0_19, %c0_20] : memref<128x1024xbf16, #tpu.memory_space<vmem>>, vector<128x1024xbf16>
      %cst_21 = arith.constant dense<0.000000e+00> : vector<1x1024xf32>
      %38 = tpu.matmul %36, %37, %cst_21 {dimension_numbers = #tpu.dot_dimension_numbers<[1], [0], [0], [1], [0, 0, 1, 1], [], []>} : vector<1x128xbf16>, vector<128x1024xbf16>, vector<1x1024xf32> -> vector<1x1024xf32>
      %c0_22 = arith.constant 0 : index
      %c0_23 = arith.constant 0 : index
      %39 = vector.load %arg6[%c0_22, %c0_23] : memref<1x1024xf32, #tpu.memory_space<vmem>>, vector<1x1024xf32>
      %40 = arith.addf %38, %39 : vector<1x1024xf32>
      %cst_24 = arith.constant 0.000000e+00 : f32
      %41 = vector.broadcast %cst_24 : f32 to vector<1x1024xf32>
      %42 = arith.maximumf %40, %41 : vector<1x1024xf32>
      %43 = arith.truncf %42 : vector<1x1024xf32> to vector<1x1024xbf16>
      %c0_25 = arith.constant 0 : index
      %c0_26 = arith.constant 0 : index
      %44 = vector.load %arg7[%c0_25, %c0_26] : memref<1024x1024xbf16, #tpu.memory_space<vmem>>, vector<1024x1024xbf16>
      %cst_27 = arith.constant dense<0.000000e+00> : vector<1x1024xf32>
      %45 = tpu.matmul %43, %44, %cst_27 {dimension_numbers = #tpu.dot_dimension_numbers<[1], [0], [0], [1], [0, 0, 1, 1], [], []>} : vector<1x1024xbf16>, vector<1024x1024xbf16>, vector<1x1024xf32> -> vector<1x1024xf32>
      %c0_28 = arith.constant 0 : index
      %c0_29 = arith.constant 0 : index
      %46 = vector.load %arg8[%c0_28, %c0_29] : memref<1x1024xf32, #tpu.memory_space<vmem>>, vector<1x1024xf32>
      %47 = arith.addf %45, %46 : vector<1x1024xf32>
      %48 = tpu.iota {dimensions = array<i32: 1>} : vector<1x1024xi32>
      %c1000_i32 = arith.constant 1000 : i32
      %49 = vector.broadcast %c1000_i32 : i32 to vector<1x1024xi32>
      %50 = arith.cmpi slt, %48, %49 : vector<1x1024xi32>
      %cst_30 = arith.constant -1.000000e+30 : f32
      %51 = vector.broadcast %cst_30 : f32 to vector<1x1024xf32>
      %52 = arith.select %50, %47, %51 : vector<1x1024xi1>, vector<1x1024xf32>
      %cst_31 = arith.constant dense<0xFF800000> : vector<1xf32>
      %53 = vector.multi_reduction <maximumf>, %52, %cst_31 [1] : vector<1x1024xf32> to vector<1xf32>
      %54 = vector.shape_cast %53 : vector<1xf32> to vector<1x1xf32>
      %55 = vector.broadcast %54 : vector<1x1xf32> to vector<1x1024xf32>
      %56 = arith.subf %52, %55 : vector<1x1024xf32>
      %57 = math.exp %56 : vector<1x1024xf32>
      %cst_32 = arith.constant dense<0.000000e+00> : vector<1xf32>
      %58 = vector.multi_reduction <add>, %57, %cst_32 [1] : vector<1x1024xf32> to vector<1xf32>
      %59 = vector.shape_cast %58 : vector<1xf32> to vector<1x1xf32>
      %60 = tpu.reciprocal %59 {approx = true} : vector<1x1xf32> -> vector<1x1xf32>
      %61 = vector.broadcast %60 : vector<1x1xf32> to vector<1x1024xf32>
      %62 = arith.mulf %57, %61 : vector<1x1024xf32>
      %c0_33 = arith.constant 0 : index
      %c0_34 = arith.constant 0 : index
      %c0_35 = arith.constant 0 : index
      %63 = vector.load %arg9[%c0_33, %c0_34, %c0_35] : memref<1x1x1024xf32, #tpu.memory_space<vmem>>, vector<1x1x1024xf32>
      %64 = vector.shape_cast %63 : vector<1x1x1024xf32> to vector<1x1024xf32>
      %65 = vector.shape_cast %62 : vector<1x1024xf32> to vector<1x1x1024xf32>
      tpu.vector_store %arg9[%c0_33, %c0_34, %c0_35], %65 {strides = array<i32>} : memref<1x1x1024xf32, #tpu.memory_space<vmem>>, vector<1x1x1024xf32>,
    } else {
    }
    return
  }
  func.func @transform_0(%arg0: i32, %arg1: i32) -> (i32, i32, i32) {
    %c0_i32 = arith.constant 0 : i32
    %c0_i32_0 = arith.constant 0 : i32
    return %arg0, %arg1, %c0_i32 : i32, i32, i32
  }
  func.func @transform_1(%arg0: i32, %arg1: i32) -> (i32, i32) {
    %c0_i32 = arith.constant 0 : i32
    %c0_i32_0 = arith.constant 0 : i32
    %c0_i32_1 = arith.constant 0 : i32
    return %c0_i32, %c0_i32_0 : i32, i32
  }
  func.func @transform_2(%arg0: i32, %arg1: i32) -> (i32, i32) {
    %c0_i32 = arith.constant 0 : i32
    %c0_i32_0 = arith.constant 0 : i32
    %c0_i32_1 = arith.constant 0 : i32
    return %c0_i32, %c0_i32_0 : i32, i32
  }
  func.func @transform_3(%arg0: i32, %arg1: i32) -> (i32, i32) {
    %c0_i32 = arith.constant 0 : i32
    %c0_i32_0 = arith.constant 0 : i32
    %c0_i32_1 = arith.constant 0 : i32
    return %c0_i32, %c0_i32_0 : i32, i32
  }
  func.func @transform_4(%arg0: i32, %arg1: i32) -> (i32, i32) {
    %c0_i32 = arith.constant 0 : i32
    %c0_i32_0 = arith.constant 0 : i32
    %c0_i32_1 = arith.constant 0 : i32
    return %c0_i32, %c0_i32_0 : i32, i32
  }
  func.func @transform_5(%arg0: i32, %arg1: i32) -> (i32, i32) {
    %c0_i32 = arith.constant 0 : i32
    %c0_i32_0 = arith.constant 0 : i32
    %c0_i32_1 = arith.constant 0 : i32
    return %c0_i32, %c0_i32_0 : i32, i32
  }
  func.func @transform_6(%arg0: i32, %arg1: i32) -> (i32, i32) {
    %c0_i32 = arith.constant 0 : i32
    %c0_i32_0 = arith.constant 0 : i32
    %c0_i32_1 = arith.constant 0 : i32
    return %c0_i32, %c0_i32_0 : i32, i32
  }
  func.func @transform_7(%arg0: i32, %arg1: i32) -> (i32, i32, i32) {
    %c0_i32 = arith.constant 0 : i32
    %c0_i32_0 = arith.constant 0 : i32
    %c0_i32_1 = arith.constant 0 : i32
    return %arg0, %c0_i32, %c0_i32_0 : i32, i32, i32
  }
}

</mosaic_0001>

<bundles_post_ra>
// kernel: tpu_custom_call.1
= control target key start
LH: loop header
LB: loop body
LE: loop exit
PB: predicated region body
PF: predicated region fallthrough
CT: control target
= control target key end

     0   :  { %s9900_s0 = inlined_call_operand.hbm [shape: bf16[2,16,128], index: 0, kind: input, shape index: {}]   ;;  %s9901_s1 = inlined_call_operand.hbm [shape: bf16[128,512], index: 1, kind: input, shape index: {}]   ;;  %s9902_s2 = inlined_call_operand.hbm [shape: f32[1,512], index: 2, kind: input, shape index: {}]   ;;  %s9903_s3 = inlined_call_operand.hbm [shape: bf16[128,1024], index: 3, kind: input, shape index: {}]   ;;  %s9904_s4 = inlined_call_operand.hbm [shape: f32[1,1024], index: 4, kind: input, shape index: {}]   ;;  %s9905_s5 = inlined_call_operand.hbm [shape: bf16[1024,1024], index: 5, kind: input, shape index: {}]   ;;  %s9906_s6 = inlined_call_operand.hbm [shape: f32[1,1024], index: 6, kind: input, shape index: {}]   ;;  %s9907_s7 = inlined_call_operand.hbm [shape: f32[2,1,1024], index: 7, kind: output, shape index: {}]  }
   0x1   :  { %9909 = sst [smem:[#allocation21_spill]] %s9901_s1 }
   0x2   :  { %9910 = sst [smem:[#allocation22_spill]] %s9902_s2 }
   0x3   :  { %9911 = sst [smem:[#allocation23_spill]] %s9903_s3 }
   0x4   :  { %9912 = sst [smem:[#allocation24_spill]] %s9904_s4 }
   0x5   :  { %12 = vsyncpa [#allocation4], 0 }
   0x6   :  { %14 = vsyncpa [#allocation4 + $0x1], 0 }
   0x7   :  { %15 = vsyncpa [#allocation7], 0 }
   0x8   :  { %16 = vsyncpa [#allocation10], 0 }
   0x9   :  { %17 = vsyncpa [#allocation13], 0 }
   0xa   :  { %18 = vsyncpa [#allocation5], 0 }
   0xb   :  { %20 = vsyncpa [#allocation5 + $0x1], 0  ;;  %s9235_s24 = smov 0   ;;  %s9237_s25 = smov 0  }
   0xc   :  { %s9239_s26 = smov 0   ;;  %s9241_s27 = smov 0  }
   0xd   :  { %s9243_s28 = smov 0   ;;  %s9245_s29 = smov 0  }
   0xe LB: > { %s9908_s30 = sadd.s32 4294967295, %s9181_s29   ;;  %p5618_p0 = scmp.ge.s32.totalorder %s9181_s29, 1  ;;  %s9181_s29 = sphi %s9245_s29, %s26_s29   ;;  %s9177_s28 = sphi %s9243_s28, %s9953_s28   ;;  %s9173_s27 = sphi %s9241_s27, %s9952_s27   ;;  %s9169_s26 = sphi %s9239_s26, %s9951_s26   ;;  %s9165_s25 = sphi %s9237_s25, %s9950_s25   ;;  %s9161_s24 = sphi %s9235_s24, %s9949_s24  }
   0xf   : > { %p9269_p1 = scmp.eq.s32.totalorder %s9908_s30, 0  ;;  %p223_p2 = scmp.lt.s32.totalorder %s9181_s29, 3 }
  0x10   : > { %s9914_s1 = sld [smem:[#allocation21_spill]]  ;;  %s9183_s13 = smov [#allocation6]  }
  0x11   : > { %p9277_p3 = pnand %p5618_p0, %p223_p2  ;;  %s236_s14 = sshll.u32 %s9183_s13, 4  ;;  %s237_s14 = int_to_ptr.vmem [resolvable:$true] %s236_s14 }
  0x12   : > { %p5625_p6 = scmp.ge.s32.totalorder %s9181_s29, 2  ;;  %s9917_s3 = sld [smem:[#allocation23_spill]] }
  0x13   : > { %p8724_p4 = pneg %p9277_p3  ;;  %s9184_s19 = smov 256  }
  0x14   : > { %s9185_s20 = smov 16   ;;  %s9186_s21 = smov [#allocation9]  }
  0x15   : > { %p9285_p5 = pnand %p8724_p4, %p9269_p1  ;;  %s262_s22 = sshll.u32 %s9186_s21, 4  ;;  %s263_s22 = int_to_ptr.vmem [resolvable:$true] %s262_s22 }
  0x16   : > { %s234_s11 = sshll.u32 %s9914_s1, 4  ;;  %s9187_s23 = smov 512   ;;  %s235_s11 = int_to_ptr.hbm [resolvable:$true] %s234_s11 }
  0x17   : > { %8727 = dma.hbm_to_vmem [thread:$0]  (!%p9285_p5), %s235_s11, 4096, %s237_s14, [#allocation7], %s9184_s19, %s9184_s19, %s9185_s20  }
  0x18   : > { %s260_s18 = sshll.u32 %s9917_s3, 4  ;;  %s9188_s9 = smov 32   ;;  %s261_s18 = int_to_ptr.hbm [resolvable:$true] %s260_s18 }
  0x19   : > { %8733 = dma.hbm_to_vmem [thread:$0]  (!%p9285_p5), %s261_s18, 8192, %s263_s22, [#allocation10], %s9187_s23, %s9187_s23, %s9188_s9  }
  0x1a   : > { %s286_s30 = sshll.u32 %s9905_s5, 4  ;;  %s9189_s16 = smov [#allocation12]   ;;  %s287_s30 = int_to_ptr.hbm [resolvable:$true] %s286_s30 }
  0x1b   : > { %s288_s17 = sshll.u32 %s9189_s16, 4  ;;  %s9918_s2 = sld [smem:[#allocation22_spill]]  ;;  %s289_s17 = int_to_ptr.vmem [resolvable:$true] %s288_s17 }
  0x1c   : > { %8739 = dma.hbm_to_vmem [thread:$0]  (!%p9285_p5), %s287_s30, 65536, %s289_s17, [#allocation13], %s9187_s23, %s9187_s23, %s9188_s9  }
  0x1d   : > { %s9190_s14 = smov [#allocation8]   ;;  %s9919_s4 = sld [smem:[#allocation24_spill]] }
  0x1e   : > { %s251_s18 = sshll.u32 %s9190_s14, 4  ;;  %s301_s30 = sshll.u32 %s9906_s6, 4  ;;  %s252_s18 = int_to_ptr.vmem [resolvable:$true] %s251_s18  ;;  %s302_s30 = int_to_ptr.hbm [resolvable:$true] %s301_s30 }
  0x1f   : > { %s9191_s22 = smov [#allocation11]   ;;  %s9192_s9 = smov [#allocation14]  }
  0x20   : > { %s277_s23 = sshll.u32 %s9191_s22, 4  ;;  %s303_s10 = sshll.u32 %s9192_s9, 4  ;;  %s278_s23 = int_to_ptr.vmem [resolvable:$true] %s277_s23  ;;  %s304_s10 = int_to_ptr.vmem [resolvable:$true] %s303_s10 }
  0x21   : > { %s249_s11 = sshll.u32 %s9918_s2, 4  ;;  %s5617_s13 = sadd.s32 4294967294, %s9181_s29   ;;  %s250_s11 = int_to_ptr.hbm [resolvable:$true] %s249_s11 }
  0x22   : > { %8730 = dma.hbm_to_vmem [thread:$0]  (!%p9285_p5), %s250_s11, 64, %s252_s18, [#allocation7]  }
  0x23   : > { %s275_s21 = sshll.u32 %s9919_s4, 4  ;;  %s38_s16 = sadd.s32 1, %s9177_s28  ;;  %s276_s21 = int_to_ptr.hbm [resolvable:$true] %s275_s21 }
  0x24   : > { %8736 = dma.hbm_to_vmem [thread:$0]  (!%p9285_p5), %s276_s21, 128, %s278_s23, [#allocation10]  }
  0x25   : > { %8742 = dma.hbm_to_vmem [thread:$0]  (!%p9285_p5), %s302_s30, 128, %s304_s10, [#allocation13]  }
  0x26   : > { %p40_p7 = scmp.ge.s32.totalorder %s38_s16, 2  ;;  %s47_s17 = sadd.s32 1, %s9169_s26 }
  0x27   : > { %p54_p8 = scmp.ne.s32.totalorder %s9169_s26, %s9165_s25  ;;  %p55_p9 = scmp.eq.s32.totalorder %s9181_s29, 0 }
  0x28   : > { %s9955_s16 = smov (%p40_p7, %s38_s16), 0  ;;  %p60_p11 = scmp.ne.s32.totalorder %s9165_s25, %s9161_s24 }
  0x29   : > { %p9325_p10 = por %p55_p9, %p54_p8  ;;  %s42_s15 = ssub.s32 %s9177_s28, %s9955_s16 }
  0x2a   : > { %s9921_s14 = sadd.s32 4294967295, %s9181_s29   ;;  %p45_p13 = scmp.eq.s32.totalorder %s42_s15, 0 }
  0x2b   : > { %p210_p12 = scmp.eq.s32.totalorder %s9921_s14, 1  ;;  %p9337_p0 = por %p9269_p1, %p60_p11 }
  0x2c   : > { %p216_p4 = scmp.eq.s32.totalorder %s5617_s13, 1  ;;  %p8757_p7 = scmp.lt.s32.totalorder %s9181_s29, 2 }
  0x2d   : > { %p9341_p2 = por %p210_p12, %p54_p8  ;;  %s314_s1 = sand.u32 1, %s9169_s26  }
  0x2e   : > { %s9346_s20 = scalar_select %p45_p13, %s9169_s26, %s47_s17  }
  0x2f   : > { %p9348_p5 = por %p216_p4, %p60_p11  ;;  %s8086_s3 = sshll.u32 %s9177_s28, 3 }
  0x30   : > { %s5626_s30 = sshll.u32 %s314_s1, 3  ;;  %s325_s9 = scalar_lea.hbm %s9900_s0, %s8086_s3 }
  0x31   : > { %s326_s10 = sshll.u32 %s325_s9, 4  ;;  %s318_s15 = scalar_lea.vmem [#allocation3], %s5626_s30  ;;  %s327_s10 = int_to_ptr.hbm [resolvable:$true] %s326_s10 }
  0x32   : > { %s328_s14 = sshll.u32 %s318_s15, 4  ;;  %p8744_p8 = pnand %p8757_p7, %p9325_p10  ;;  %s329_s14 = int_to_ptr.vmem [resolvable:$true] %s328_s14 }
  0x33   : > { %s315_s13 = scalar_lea.sflag [#allocation4], %s314_s1  ;;  %s9193_s17 = smov 64  }
  0x34   : > { %s9194_s2 = smov 4   ;;  %340 = sbr.rel (%p9277_p3) target bundleno = 1479 (0x5c7), region = 48 }
  0x35   : > { %8746 = dma.hbm_to_vmem [thread:$0]  (!%p8744_p8), %s327_s10, 128, %s329_s14, %s315_s13, %s9193_s17, %s9193_s17, %s9194_s2  }
  0x36   : > { %s9363_s4 = sand.u32 (!%p9277_p3), 1, %s9165_s25  }
  0x37   : > { %s5630_s3 = sshll.u32 (!%p9277_p3), %s9363_s4, 3  ;;  %s343_s30 = scalar_lea.sflag (!%p9277_p3), [#allocation4], %s9363_s4 }
  0x38   : > { %s9369_s22 = scalar_lea.vmem (!%p9277_p3), [#allocation3], %s5630_s3 }
  0x39   : > { %9140 = dma.done.wait (%p9337_p0), %s343_s30, 128  }
  0x3a   : > { %9142 = vsyncadd (%p9337_p0), %s343_s30, 4294967168 }
  0x3b   : > { %9144 = dma.done.wait (%p9269_p1), [#allocation7], 4160  }
  0x3c   : > { %9146 = vsyncadd (%p9269_p1), [#allocation7], 4294963136 }
  0x3d   : > { %9148 = dma.done.wait (%p9269_p1), [#allocation10], 8320  }
  0x3e   : > { %9150 = vsyncadd (%p9269_p1), [#allocation10], 4294958976 }
  0x3f   : > { %9152 = dma.done.wait (%p9269_p1), [#allocation13], 65664  }
  0x40   : > { %9154 = vsyncadd (%p9269_p1), [#allocation13], 4294901632  ;;  %v5756_v0 = vld [vmem:[#allocation6 + $0xe0] sm:$0xf]  ;;  %v8118_v1 = vld [vmem:[#allocation6 + $0xec] sm:$0xf0] }
  0x41   : > { %v8116_v2 = vld [vmem:[#allocation6 + $0xe4] sm:$0xf]  ;;  %v5757_v3 = vor.u32 %v8118_v1, %v5756_v0  ;;  %v5758_v4 = vld [vmem:[#allocation6 + $0xf0] sm:$0xf0]  ;;  %v5764_v5 = vld [vmem:[#allocation6 + $0xe8] sm:$0xf] }
  0x42   : > { %v8119_v6 = vld [vmem:[#allocation6 + $0xf4] sm:$0xf0]  ;;  %v5761_v7 = vor.u32 %v8116_v2, %v5758_v4  ;;  %v8117_v9 = vld [vmem:[#allocation6 + $0xec] sm:$0xf]  ;;  %v5766_v10 = vld [vmem:[#allocation6 + $0xf8] sm:$0xf0] }
  0x43   : > { %v5765_v8 = vor.u32 %v8119_v6, %v5764_v5  ;;  %v5740_v11 = vld [vmem:[#allocation6 + $0xc0] sm:$0xf]  ;;  %627 = vmatpush.bf16.msra.mxu0 %v5757_v3  ;;  %v5769_v12 = vor.u32 %v8117_v9, %v5766_v10  ;;  %v8114_v13 = vld [vmem:[#allocation6 + $0xcc] sm:$0xf0]  ;;  %v8112_v14 = vld [vmem:[#allocation6 + $0xc4] sm:$0xf] }
  0x44   : > { %v5742_v15 = vld [vmem:[#allocation6 + $0xd0] sm:$0xf0]  ;;  %641 = vmatpush.bf16.msra.mxu1 %v5761_v7  ;;  %v5741_v16 = vor.u32 %v8114_v13, %v5740_v11  ;;  %v5748_v18 = vld [vmem:[#allocation6 + $0xc8] sm:$0xf]  ;;  %v8115_v19 = vld [vmem:[#allocation6 + $0xd4] sm:$0xf0] }
  0x45   : > { %655 = vmatpush.bf16.msra.mxu2 %v5765_v8  ;;  %v5745_v17 = vor.u32 %v8112_v14, %v5742_v15  ;;  %v8113_v20 = vld [vmem:[#allocation6 + $0xcc] sm:$0xf]  ;;  %669 = vmatpush.bf16.msra.mxu3 %v5769_v12  ;;  %v5749_v21 = vor.u32 %v8115_v19, %v5748_v18  ;;  %v5750_v22 = vld [vmem:[#allocation6 + $0xd8] sm:$0xf0]  ;;  %v5724_v23 = vld [vmem:[#allocation6 + $0xa0] sm:$0xf] }
  0x46   : > { %v8110_v24 = vld [vmem:[#allocation6 + $0xac] sm:$0xf0]  ;;  %v5753_v25 = vor.u32 %v8113_v20, %v5750_v22  ;;  %v8108_v26 = vld [vmem:[#allocation6 + $0xa4] sm:$0xf]  ;;  %v5726_v27 = vld [vmem:[#allocation6 + $0xb0] sm:$0xf0] }
  0x47   : > { %v5732_v28 = vld [vmem:[#allocation6 + $0xa8] sm:$0xf]  ;;  %628 = vmatpush.bf16.msra.mxu0 %v5741_v16  ;;  %v5725_v29 = vor.u32 %v8110_v24, %v5724_v23  ;;  %v8111_v30 = vld [vmem:[#allocation6 + $0xb4] sm:$0xf0]  ;;  %v8109_v31 = vld [vmem:[#allocation6 + $0xac] sm:$0xf]  ;;  %v5729_v33 = vor.u32 %v8108_v26, %v5726_v27 }
  0x48   : > { %v5734_v32 = vld [vmem:[#allocation6 + $0xb8] sm:$0xf0]  ;;  %642 = vmatpush.bf16.msra.mxu1 %v5745_v17  ;;  %v5733_v34 = vor.u32 %v8111_v30, %v5732_v28  ;;  %v5708_v35 = vld [vmem:[#allocation6 + $0x80] sm:$0xf]  ;;  %v8106_v36 = vld [vmem:[#allocation6 + $0x8c] sm:$0xf0] }
  0x49   : > { %656 = vmatpush.bf16.msra.mxu2 %v5749_v21  ;;  %v8104_v37 = vld [vmem:[#allocation6 + $0x84] sm:$0xf]  ;;  %670 = vmatpush.bf16.msra.mxu3 %v5753_v25  ;;  %v5737_v38 = vor.u32 %v8109_v31, %v5734_v32  ;;  %v5710_v39 = vld [vmem:[#allocation6 + $0x90] sm:$0xf0]  ;;  %v5716_v40 = vld [vmem:[#allocation6 + $0x88] sm:$0xf]  ;;  %v5709_v44 = vor.u32 %v8106_v36, %v5708_v35 }
  0x4a   : > { %v8107_v41 = vld [vmem:[#allocation6 + $0x94] sm:$0xf0]  ;;  %v8105_v42 = vld [vmem:[#allocation6 + $0x8c] sm:$0xf]  ;;  %v5718_v43 = vld [vmem:[#allocation6 + $0x98] sm:$0xf0]  ;;  %v5713_v45 = vor.u32 %v8104_v37, %v5710_v39 }
  0x4b   : > { %629 = vmatpush.bf16.msra.mxu0 %v5725_v29  ;;  %v5717_v46 = vor.u32 %v8107_v41, %v5716_v40  ;;  %v5692_v47 = vld [vmem:[#allocation6 + $0x60] sm:$0xf]  ;;  %v8102_v48 = vld [vmem:[#allocation6 + $0x6c] sm:$0xf0]  ;;  %v8100_v49 = vld [vmem:[#allocation6 + $0x64] sm:$0xf]  ;;  %v5721_v50 = vor.u32 %v8105_v42, %v5718_v43 }
  0x4c   : > { %643 = vmatpush.bf16.msra.mxu1 %v5729_v33  ;;  %v5694_v51 = vld [vmem:[#allocation6 + $0x70] sm:$0xf0]  ;;  %v5700_v52 = vld [vmem:[#allocation6 + $0x68] sm:$0xf]  ;;  %v8103_v53 = vld [vmem:[#allocation6 + $0x74] sm:$0xf0]  ;;  %v5693_v56 = vor.u32 %v8102_v48, %v5692_v47 }
  0x4d   : > { %657 = vmatpush.bf16.msra.mxu2 %v5733_v34  ;;  %671 = vmatpush.bf16.msra.mxu3 %v5737_v38  ;;  %v8101_v54 = vld [vmem:[#allocation6 + $0x6c] sm:$0xf]  ;;  %v5702_v55 = vld [vmem:[#allocation6 + $0x78] sm:$0xf0]  ;;  %v5697_v57 = vor.u32 %v8100_v49, %v5694_v51  ;;  %v5701_v58 = vor.u32 %v8103_v53, %v5700_v52  ;;  %v5676_v59 = vld [vmem:[#allocation6 + $0x40] sm:$0xf] }
  0x4e   : > { %v8098_v60 = vld [vmem:[#allocation6 + $0x4c] sm:$0xf0]  ;;  %v8096_v61 = vld [vmem:[#allocation6 + $0x44] sm:$0xf]  ;;  %v5705_v62 = vor.u32 %v8101_v54, %v5702_v55  ;;  %v5678_v63 = vld [vmem:[#allocation6 + $0x50] sm:$0xf0] }
  0x4f   : > { %630 = vmatpush.bf16.msra.mxu0 %v5709_v44  ;;  %v5684_v0 = vld [vmem:[#allocation6 + $0x48] sm:$0xf]  ;;  %v8099_v1 = vld [vmem:[#allocation6 + $0x54] sm:$0xf0]  ;;  %v8097_v2 = vld [vmem:[#allocation6 + $0x4c] sm:$0xf]  ;;  %v5677_v4 = vor.u32 %v8098_v60, %v5676_v59  ;;  %v5681_v5 = vor.u32 %v8096_v61, %v5678_v63 }
  0x50   : > { %644 = vmatpush.bf16.msra.mxu1 %v5713_v45  ;;  %v5686_v3 = vld [vmem:[#allocation6 + $0x58] sm:$0xf0]  ;;  %v5685_v6 = vor.u32 %v8099_v1, %v5684_v0  ;;  %v5660_v7 = vld [vmem:[#allocation6 + $0x20] sm:$0xf]  ;;  %v8094_v8 = vld [vmem:[#allocation6 + $0x2c] sm:$0xf0] }
  0x51   : > { %658 = vmatpush.bf16.msra.mxu2 %v5717_v46  ;;  %672 = vmatpush.bf16.msra.mxu3 %v5721_v50  ;;  %v8092_v9 = vld [vmem:[#allocation6 + $0x24] sm:$0xf]  ;;  %v5689_v10 = vor.u32 %v8097_v2, %v5686_v3  ;;  %v5662_v11 = vld [vmem:[#allocation6 + $0x30] sm:$0xf0]  ;;  %v5668_v12 = vld [vmem:[#allocation6 + $0x28] sm:$0xf]  ;;  %v5661_v16 = vor.u32 %v8094_v8, %v5660_v7 }
  0x52   : > { %v8095_v13 = vld [vmem:[#allocation6 + $0x34] sm:$0xf0]  ;;  %v8093_v14 = vld [vmem:[#allocation6 + $0x2c] sm:$0xf]  ;;  %v5670_v15 = vld [vmem:[#allocation6 + $0x38] sm:$0xf0]  ;;  %v5665_v17 = vor.u32 %v8092_v9, %v5662_v11 }
  0x53   : > { %631 = vmatpush.bf16.msra.mxu0 %v5693_v56  ;;  %v5669_v18 = vor.u32 %v8095_v13, %v5668_v12  ;;  %v5644_v19 = vld [vmem:[#allocation6] sm:$0xf]  ;;  %v8090_v20 = vld [vmem:[#allocation6 + $0xc] sm:$0xf0]  ;;  %v8088_v21 = vld [vmem:[#allocation6 + $0x4] sm:$0xf]  ;;  %v5673_v22 = vor.u32 %v8093_v14, %v5670_v15 }
  0x54   : > { %645 = vmatpush.bf16.msra.mxu1 %v5697_v57  ;;  %v5646_v23 = vld [vmem:[#allocation6 + $0x10] sm:$0xf0]  ;;  %v5652_v24 = vld [vmem:[#allocation6 + $0x8] sm:$0xf]  ;;  %v8091_v25 = vld [vmem:[#allocation6 + $0x14] sm:$0xf0]  ;;  %v5645_v28 = vor.u32 %v8090_v20, %v5644_v19 }
  0x55   : > { %659 = vmatpush.bf16.msra.mxu2 %v5701_v58  ;;  %673 = vmatpush.bf16.msra.mxu3 %v5705_v62  ;;  %v8089_v26 = vld [vmem:[#allocation6 + $0xc] sm:$0xf]  ;;  %v5654_v27 = vld [vmem:[#allocation6 + $0x18] sm:$0xf0]  ;;  %v5649_v29 = vor.u32 %v8088_v21, %v5646_v23  ;;  %v5653_v30 = vor.u32 %v8091_v25, %v5652_v24  ;;  %v9388_v33 = vld [vmem:[#allocation8] sm:$0xf] }
  0x56   : > { %v5657_v31 = vor.u32 %v8089_v26, %v5654_v27  ;;  %v8087_v32 = vld [vmem:[%s9369_s22] sm:$0xff]  ;;  %v453_v34 = vperm.slane %v9388_v33, 0  ;;  %v454_v35 = vperm.slane %v9388_v33, 1  ;;  %v455_v40 = vperm.slane %v9388_v33, 2  ;;  %v6004_v43 = vld [vmem:[#allocation9 + $0x1c0] sm:$0xf] }
  0x57   : > { %632 = vmatpush.bf16.msra.mxu0 %v5677_v4  ;;  %v456_v41 = vperm.slane %v9388_v33, 3  ;;  %v8180_v44 = vld [vmem:[#allocation9 + $0x1dc] sm:$0xf0]  ;;  %v8176_v47 = vld [vmem:[#allocation9 + $0x1c4] sm:$0xf]  ;;  %s8083_s2 = sshll.u32 %s9173_s27, 3 }
  0x58   : > { %646 = vmatpush.bf16.msra.mxu1 %v5681_v5  ;;  %v6005_v46 = vor.u32 %v8180_v44, %v6004_v43  ;;  %v6006_v48 = vld [vmem:[#allocation9 + $0x1e0] sm:$0xf0]  ;;  %v6012_v50 = vld [vmem:[#allocation9 + $0x1c8] sm:$0xf]  ;;  %v8177_v52 = vld [vmem:[#allocation9 + $0x1cc] sm:$0xf]  ;;  %s5473_s11 = scalar_lea.hbm %s9907_s7, %s8083_s2 }
  0x59   : > { %660 = vmatpush.bf16.msra.mxu2 %v5685_v6  ;;  %674 = vmatpush.bf16.msra.mxu3 %v5689_v10  ;;  %v6009_v49 = vor.u32 %v8176_v47, %v6006_v48  ;;  %v8181_v51 = vld [vmem:[#allocation9 + $0x1e4] sm:$0xf0]  ;;  %v6014_v54 = vld [vmem:[#allocation9 + $0x1e8] sm:$0xf0]  ;;  %v5972_v57 = vld [vmem:[#allocation9 + $0x180] sm:$0xf] }
  0x5a   : > { %v6013_v53 = vor.u32 %v8181_v51, %v6012_v50  ;;  %v6017_v56 = vor.u32 %v8177_v52, %v6014_v54  ;;  %v8172_v58 = vld [vmem:[#allocation9 + $0x19c] sm:$0xf0]  ;;  %v8168_v59 = vld [vmem:[#allocation9 + $0x184] sm:$0xf]  ;;  %v5980_v1 = vld [vmem:[#allocation9 + $0x188] sm:$0xf] }
  0x5b   : > { %633 = vmatpush.bf16.msra.mxu0 %v5661_v16  ;;  %v5973_v63 = vor.u32 %v8172_v58, %v5972_v57  ;;  %v5974_v0 = vld [vmem:[#allocation9 + $0x1a0] sm:$0xf0]  ;;  %v8173_v2 = vld [vmem:[#allocation9 + $0x1a4] sm:$0xf0]  ;;  %v8169_v8 = vld [vmem:[#allocation9 + $0x18c] sm:$0xf] }
  0x5c   : > { %647 = vmatpush.bf16.msra.mxu1 %v5665_v17  ;;  %v5977_v6 = vor.u32 %v8168_v59, %v5974_v0  ;;  %v5981_v7 = vor.u32 %v8173_v2, %v5980_v1  ;;  %v5982_v9 = vld [vmem:[#allocation9 + $0x1a8] sm:$0xf0]  ;;  %v5940_v15 = vld [vmem:[#allocation9 + $0x140] sm:$0xf]  ;;  %v8160_v23 = vld [vmem:[#allocation9 + $0x144] sm:$0xf] }
  0x5d   : > { %661 = vmatpush.bf16.msra.mxu2 %v5669_v18  ;;  %675 = vmatpush.bf16.msra.mxu3 %v5673_v22  ;;  %v5985_v12 = vor.u32 %v8169_v8, %v5982_v9  ;;  %v8164_v19 = vld [vmem:[#allocation9 + $0x15c] sm:$0xf0]  ;;  %v5942_v25 = vld [vmem:[#allocation9 + $0x160] sm:$0xf0]  ;;  %v5948_v26 = vld [vmem:[#allocation9 + $0x148] sm:$0xf] }
  0x5e   : > { %v5941_v22 = vor.u32 %v8164_v19, %v5940_v15  ;;  %v8165_v27 = vld [vmem:[#allocation9 + $0x164] sm:$0xf0]  ;;  %v5945_v43 = vor.u32 %v8160_v23, %v5942_v25  ;;  %v5910_v47 = vld [vmem:[#allocation9 + $0x120] sm:$0xf0]  ;;  %v5844_v25 = vld [vmem:[#allocation9 + $0x80] sm:$0xf] }
  0x5f   : > { %634 = vmatpush.bf16.msra.mxu0 %v5645_v28  ;;  %v5949_v44 = vor.u32 %v8165_v27, %v5948_v26  ;;  %v5916_v1 = vld [vmem:[#allocation9 + $0x108] sm:$0xf]  ;;  %s407_s27 = scalar_lea.vmem [#allocation15], %s5630_s3  ;;  %s5477_s1 = sshll.u32 %s5473_s11, 4  ;;  %s5478_s1 = int_to_ptr.hbm [resolvable:$true] %s5477_s1 }
  0x60   : > { %648 = vmatpush.bf16.msra.mxu1 %v5649_v29  ;;  %v8157_v2 = vld [vmem:[#allocation9 + $0x124] sm:$0xf0]  ;;  %s5475_s18 = sshll.u32 %s407_s27, 4  ;;  %s5463_s23 = scalar_lea.sflag [#allocation5], %s9363_s4  ;;  %s5476_s18 = int_to_ptr.vmem [resolvable:$true] %s5475_s18 }
  0x61   : > { %662 = vmatpush.bf16.msra.mxu2 %v5653_v30  ;;  %676 = vmatpush.bf16.msra.mxu3 %v5657_v31  ;;  %v8161_v31 = vld [vmem:[#allocation9 + $0x14c] sm:$0xf]  ;;  %s9101_s9 = sshra.s32 %s5478_s1, 4  ;;  %s9107_s13 = scalar_lea.hbm %s9907_s7, 16  ;;  %s9102_s9 = int_to_ptr.hbm [resolvable:$true] %s9101_s9 }
  0x62   : > { %635 = vmatmul.bf16.vlgmr.msra.gmra.mxu0 %v8087_v32  ;;  %s9103_s10 = scalar_lea.hbm %s9102_s9, 8  ;;  %p9108_p10 = scmp.lt.s32.totalorder %s9102_s9, %s9907_s7 }
  0x63   : > { %649 = vmatmul.bf16.vlgmr.msra.gmra.mxu1 %v8087_v32  ;;  %1297 = vmatpush.bf16.msrb.mxu0 %v6005_v46  ;;  %v8152_v46 = vld [vmem:[#allocation9 + $0x104] sm:$0xf]  ;;  %p9104_p1 = scmp.ne.s32.totalorder %s9102_s9, %s9103_s10  ;;  %p9109_p11 = scmp.lt.s32.totalorder %s9107_s13, %s9103_s10 }
  0x64   : > { %663 = vmatmul.bf16.vlgmr.msra.gmra.mxu2 %v8087_v32  ;;  %677 = vmatmul.bf16.vlgmr.msra.gmra.mxu3 %v8087_v32  ;;  %v5950_v32 = vld [vmem:[#allocation9 + $0x168] sm:$0xf0] }
  0x65   : > { %1310 = vmatpush.bf16.msrb.mxu1 %v6009_v49  ;;  %1323 = vmatpush.bf16.msrb.mxu2 %v6013_v53  ;;  %p9105_p3 = pnand %p9104_p1, %p9341_p2  ;;  %p9110_p12 = por %p9109_p11, %p9108_p10 }
  0x66   : > { %1336 = vmatpush.bf16.msrb.mxu3 %v6017_v56 }
  0x67   : > { %1298 = vmatpush.bf16.msrb.mxu0 %v5973_v63  ;;  %p9106_p9 = pneg %p9105_p3 }
  0x69   : > { %1311 = vmatpush.bf16.msrb.mxu1 %v5977_v6  ;;  %1324 = vmatpush.bf16.msrb.mxu2 %v5981_v7  ;;  %v8144_v6 = vld [vmem:[#allocation9 + $0xc4] sm:$0xf]  ;;  %p9111_p13 = pnand %p9110_p12, %p9106_p9 }
  0x6a   : > { %1337 = vmatpush.bf16.msrb.mxu3 %v5985_v12 }
  0x6b   : > { %1299 = vmatpush.bf16.msrb.mxu0 %v5941_v22 }
  0x6d   : > { %1312 = vmatpush.bf16.msrb.mxu1 %v5945_v43  ;;  %1325 = vmatpush.bf16.msrb.mxu2 %v5949_v44 }
  0xdf   : > { %v636_v36 = vpop.f32.mrf.mxu0 }
  0xe0   : > { %v9392_v37 = vadd.f32 %v636_v36, %v453_v34  ;;  %v650_v38 = vpop.f32.mrf.mxu1  ;;  %v8156_v36 = vld [vmem:[#allocation9 + $0x11c] sm:$0xf0] }
  0xe1   : > { %v9394_v39 = vadd.f32 %v650_v38, %v454_v35 }
  0xe2   : > { %v5770_v42 = vmul.f32 -1.442695, %v9392_v37 }
  0xe3   : > { %v5771_v45 = vmul.f32 -1.442695, %v9394_v39 }
  0xe4   : > { %8825 = vpow2.f32 %v5770_v42 }
  0xe5   : > { %8827 = vpow2.f32 %v5771_v45  ;;  %v5953_v45 = vor.u32 %v8161_v31, %v5950_v32  ;;  %v8153_v32 = vld [vmem:[#allocation9 + $0x10c] sm:$0xf] }
  0xe7   : > { %v664_v55 = vpop.f32.mrf.mxu2  ;;  %v678_v61 = vpop.f32.mrf.mxu3  ;;  %1338 = vmatpush.bf16.msrb.mxu3 %v5953_v45 }
  0xe8   : > { %v9402_v60 = vadd.f32 %v664_v55, %v455_v40  ;;  %v638_v62 = vpop.f32.mrf.mxu0  ;;  %v9406_v3 = vadd.f32 %v678_v61, %v456_v41  ;;  %v652_v5 = vpop.f32.mrf.mxu1 }
  0xe9   : > { %v9408_v4 = vadd.f32 %v638_v62, %v453_v34  ;;  %v9411_v11 = vadd.f32 %v652_v5, %v454_v35  ;;  %v5908_v35 = vld [vmem:[#allocation9 + $0x100] sm:$0xf] }
  0xea   : > { %v5772_v10 = vmul.f32 -1.442695, %v9402_v60  ;;  %v8826_v13 = vpop.eup %8825  ;;  %v5773_v14 = vmul.f32 -1.442695, %v9406_v3  ;;  %v5909_v50 = vor.u32 %v8156_v36, %v5908_v35  ;;  %v8141_v35 = vld [vmem:[#allocation9 + $0xa4] sm:$0xf0] }
  0xeb   : > { %v8828_v16 = vpop.eup %8827  ;;  %v9414_v17 = vadd.f32 1.0, %v8826_v13  ;;  %v5774_v18 = vmul.f32 -1.442695, %v9408_v4  ;;  %v5775_v21 = vmul.f32 -1.442695, %v9411_v11 }
  0xec   : > { %8829 = vpow2.f32 %v5772_v10  ;;  %v9417_v20 = vadd.f32 1.0, %v8828_v16  ;;  %1300 = vmatpush.bf16.msrb.mxu0 %v5909_v50 }
  0xed   : > { %8831 = vpow2.f32 %v5773_v14  ;;  %v724_v28 = vand.u32 2147483647, %v9414_v17  ;;  %v726_v34 = vand.u32 2147483648, %v9414_v17  ;;  %vm720_vm0 = vweird.f32 %v9414_v17 }
  0xee   : > { %8833 = vrcp.f32 %v9414_v17  ;;  %v741_v48 = vand.u32 2147483648, %v9417_v20  ;;  %v739_v52 = vand.u32 2147483647, %v9417_v20  ;;  %vm735_vm2 = vweird.f32 %v9417_v20 }
  0xef   : > { %8835 = vrcp.f32 %v9417_v20  ;;  %v666_v24 = vpop.f32.mrf.mxu2  ;;  %v680_v30 = vpop.f32.mrf.mxu3  ;;  %vm9444_vm1 = vcmp.eq.f32.partialorder %v724_v28, 8.507059e+37  ;;  %v727_v58 = vor.u32 1.1754944e-38, %v726_v34  ;;  %v5917_v14 = vor.u32 %v8157_v2, %v5916_v1  ;;  %v5918_v34 = vld [vmem:[#allocation9 + $0x128] sm:$0xf0]  ;;  %v8148_v1 = vld [vmem:[#allocation9 + $0xdc] sm:$0xf0] }
  0xf0   : > { %8837 = vpow2.f32 %v5774_v18  ;;  %v9425_v29 = vadd.f32 %v666_v24, %v455_v40  ;;  %v9430_v42 = vadd.f32 %v680_v30, %v456_v41  ;;  %v5913_v41 = vor.u32 %v8152_v46, %v5910_v47 }
  0xf1   : > { %8839 = vpow2.f32 %v5775_v21  ;;  %v742_v0 = vor.u32 1.1754944e-38, %v741_v48  ;;  %vm9454_vm5 = vcmp.eq.f32.partialorder %v739_v52, 8.507059e+37  ;;  %1326 = vmatpush.bf16.msrb.mxu2 %v5917_v14  ;;  %v5884_v14 = vld [vmem:[#allocation9 + $0xc8] sm:$0xf] }
  0xf2   : > { %v8830_v38 = vpop.eup %8829  ;;  %v5776_v33 = vmul.f32 -1.442695, %v9425_v29  ;;  %v5777_v61 = vmul.f32 -1.442695, %v9430_v42  ;;  %1313 = vmatpush.bf16.msrb.mxu1 %v5913_v41 }
  0xf3   : > { %v8832_v40 = vpop.eup %8831  ;;  %v9433_v49 = vadd.f32 1.0, %v8830_v38 }
  0xf4   : > { %v8834_v51 = vpop.eup %8833  ;;  %v9436_v53 = vadd.f32 1.0, %v8832_v40 }
  0xf5   : > { %v9439_v54 = vpop.eup %8835  ;;  %v716_v55 = vmul.f32 %v8834_v51, %v9414_v17  ;;  %8841 = vrcp.f32 %v9433_v49  ;;  %vm721_vm3 = vweird.f32 %v8834_v51  ;;  %v754_v8 = vand.u32 2147483647, %v9433_v49 }
  0xf6   : > { %v8838_v56 = vpop.eup %8837  ;;  %v731_v59 = vmul.f32 %v9439_v54, %v9417_v20  ;;  %8843 = vrcp.f32 %v9436_v53  ;;  %vm736_vm4 = vweird.f32 %v9439_v54  ;;  %v756_v13 = vand.u32 2147483648, %v9433_v49  ;;  %vm722_vm6 = vmor %vm720_vm0, %vm721_vm3 }
  0xf7   : > { %v8840_v62 = vpop.eup %8839  ;;  %v717_v63 = vsub.f32 1.0, %v716_v55  ;;  %8845 = vpow2.f32 %v5776_v33  ;;  %v9459_v9 = vadd.f32 1.0, %v8838_v56  ;;  %v769_v18 = vand.u32 2147483647, %v9436_v53  ;;  %vm9479_vm9 = vmor %vm735_vm2, %vm736_vm4 }
  0xf8   : > { %v732_v5 = vsub.f32 1.0, %v731_v59  ;;  %v9461_v10 = vadd.f32 1.0, %v8840_v62  ;;  %8847 = vpow2.f32 %v5777_v61  ;;  %v771_v19 = vand.u32 2147483648, %v9436_v53 }
  0xf9   : > { %v718_v7 = vmul.f32 %v8834_v51, %v717_v63  ;;  %8849 = vrcp.f32 %v9459_v9  ;;  %vm750_vm7 = vweird.f32 %v9433_v49  ;;  %vm765_vm8 = vweird.f32 %v9436_v53 }
  0xfa   : > { %v733_v12 = vmul.f32 %v9439_v54, %v732_v5  ;;  %v784_v17 = vand.u32 2147483647, %v9459_v9  ;;  %v786_v26 = vand.u32 2147483648, %v9459_v9  ;;  %8851 = vrcp.f32 %v9461_v10 }
  0xfb   : > { %v8842_v15 = vpop.eup %8841  ;;  %v719_v16 = vadd.f32 %v8834_v51, %v718_v7  ;;  %vm9492_vm10 = vcmp.eq.f32.partialorder %v754_v8, 8.507059e+37  ;;  %v757_v36 = vor.u32 1.1754944e-38, %v756_v13  ;;  %vm9496_vm11 = vcmp.eq.f32.partialorder %v769_v18, 8.507059e+37  ;;  %v5878_v7 = vld [vmem:[#allocation9 + $0xe0] sm:$0xf0] }
  0xfc   : > { %v734_v21 = vadd.f32 %v9439_v54, %v733_v12  ;;  %v746_v22 = vmul.f32 %v8842_v15, %v9433_v49  ;;  %v8844_v23 = vpop.eup %8843  ;;  %v772_v43 = vor.u32 1.1754944e-38, %v771_v19  ;;  %vm751_vm12 = vweird.f32 %v8842_v15  ;;  %v8145_v19 = vld [vmem:[#allocation9 + $0xcc] sm:$0xf] }
  0xfd   : > { %v723_v24 = vsel %vm722_vm6, %v8834_v51, %v719_v16  ;;  %v8846_v27 = vpop.eup %8845  ;;  %v761_v20 = vmul.f32 %v8844_v23, %v9436_v53  ;;  %vm780_vm13 = vweird.f32 %v9459_v9  ;;  %vm766_vm14 = vweird.f32 %v8844_v23  ;;  %v9637_v53 = vld [vmem:[#allocation9 + $0x8] sm:$0xf] }
  0xfe   : > { %v728_v28 = vsel %vm9444_vm1, %v727_v58, %v723_v24  ;;  %v738_v30 = vsel %vm9479_vm9, %v9439_v54, %v734_v21  ;;  %v747_v31 = vsub.f32 1.0, %v746_v22  ;;  %v8848_v44 = vpop.eup %8847  ;;  %v9508_v50 = vadd.f32 1.0, %v8846_v27  ;;  %vm752_vm1 = vmor %vm750_vm7, %vm751_vm12  ;;  %v5886_v21 = vld [vmem:[#allocation9 + $0xe8] sm:$0xf0]  ;;  %v5846_v27 = vld [vmem:[#allocation9 + $0xa0] sm:$0xf0] }
  0xff   : > { %v9501_v45 = vmul.f32 %v728_v28, %v9392_v37  ;;  %v762_v47 = vsub.f32 1.0, %v761_v20  ;;  %v9504_v40 = vpop.eup %8849  ;;  %v743_v48 = vsel %vm9454_vm5, %v742_v0, %v738_v30  ;;  %v5921_v51 = vor.u32 %v8153_v32, %v5918_v34  ;;  %v5876_v0 = vld [vmem:[#allocation9 + $0xc0] sm:$0xf]  ;;  %vm767_vm2 = vmor %vm765_vm8, %vm766_vm14  ;;  %v5852_v34 = vld [vmem:[#allocation9 + $0x88] sm:$0xf] }
 0x100   : > { %v748_v46 = vmul.f32 %v8842_v15, %v747_v31  ;;  %v776_v37 = vmul.f32 %v9504_v40, %v9459_v9  ;;  %vm9512_vm15 = vcmp.eq.f32.partialorder %v784_v17, 8.507059e+37  ;;  %v787_v54 = vor.u32 1.1754944e-38, %v786_v26  ;;  %v9517_v55 = vpop.eup %8851  ;;  %v8140_v17 = vld [vmem:[#allocation9 + $0x9c] sm:$0xf0]  ;;  %v8136_v26 = vld [vmem:[#allocation9 + $0x84] sm:$0xf] }
 0x101   : > { %v763_v33 = vmul.f32 %v8844_v23, %v762_v47  ;;  %vm795_vm0 = vweird.f32 %v9461_v10  ;;  %v799_v56 = vand.u32 2147483647, %v9461_v10  ;;  %v801_v57 = vand.u32 2147483648, %v9461_v10  ;;  %1339 = vmatpush.bf16.msrb.mxu3 %v5921_v51  ;;  %v9585_v47 = vld [vmem:[#allocation9 + $0x40] sm:$0xf] }
 0x102   : > { %v749_v52 = vadd.f32 %v8842_v15, %v748_v46  ;;  %8853 = vrcp.f32 %v9508_v50  ;;  %v9525_v58 = vadd.f32 1.0, %v8848_v44  ;;  %v777_v62 = vsub.f32 1.0, %v776_v37  ;;  %v9581_v44 = vld [vmem:[#allocation9 + $0x8c] sm:$0xf]  ;;  %v8128_v37 = vld [vmem:[#allocation9 + $0x44] sm:$0xf] }
 0x103   : > { %v764_v61 = vadd.f32 %v8844_v23, %v763_v33  ;;  %v791_v63 = vmul.f32 %v9517_v55, %v9461_v10  ;;  %v9530_v49 = vmul.f32 %v743_v48, %v9394_v39  ;;  %vm781_vm3 = vweird.f32 %v9504_v40  ;;  %v9583_v46 = vld [vmem:[#allocation9 + $0xa8] sm:$0xf0]  ;;  %v9587_v48 = vld [vmem:[#allocation9 + $0x5c] sm:$0xf0]  ;;  %v6030_v51 = vld [vmem:[#allocation9 + $0x1f8] sm:$0xf0] }
 0x104   : > { %v753_v59 = vsel %vm752_vm1, %v8842_v15, %v749_v52  ;;  %v816_v5 = vand.u32 2147483648, %v9508_v50  ;;  %v778_v12 = vmul.f32 %v9504_v40, %v777_v62  ;;  %v814_v39 = vand.u32 2147483647, %v9508_v50  ;;  %v8149_v15 = vld [vmem:[#allocation9 + $0xe4] sm:$0xf0]  ;;  %vm9564_vm7 = vmor %vm780_vm13, %vm781_vm3 }
 0x105   : > { %v758_v2 = vsel %vm9492_vm10, %v757_v36, %v753_v59  ;;  %v768_v8 = vsel %vm767_vm2, %v8844_v23, %v764_v61  ;;  %v792_v13 = vsub.f32 1.0, %v791_v63  ;;  %vm9543_vm4 = vcmp.eq.f32.partialorder %v799_v56, 8.507059e+37  ;;  %v5814_v56 = vld [vmem:[#allocation9 + $0x60] sm:$0xf0]  ;;  %v9606_v59 = vld [vmem:[#allocation9 + $0x48] sm:$0xf] }
 0x106   : > { %v773_v16 = vsel %vm9496_vm11, %v772_v43, %v768_v8  ;;  %v802_v18 = vor.u32 1.1754944e-38, %v801_v57  ;;  %8855 = vrcp.f32 %v9525_v58  ;;  %v9549_v22 = vmul.f32 %v758_v2, %v9402_v60  ;;  %v9608_v61 = vld [vmem:[#allocation9 + $0x64] sm:$0xf0]  ;;  %v9614_v2 = vld [vmem:[#allocation9 + $0x4c] sm:$0xf] }
 0x107   : > { %v779_v23 = vadd.f32 %v9504_v40, %v778_v12  ;;  %v793_v24 = vmul.f32 %v9517_v55, %v792_v13  ;;  %vm796_vm5 = vweird.f32 %v9517_v55  ;;  %vm810_vm6 = vweird.f32 %v9508_v50  ;;  %v9625_v13 = vld [vmem:[#allocation9 + $0x1c] sm:$0xf0]  ;;  %v5988_v9 = vld [vmem:[#allocation9 + $0x190] sm:$0xf] }
 0x108   : > { %v9555_v28 = vpop.eup %8853  ;;  %v9558_v30 = vmul.f32 %v773_v16, %v9406_v3  ;;  %v9568_v31 = vor.u32 1.1754944e-38, %v816_v5  ;;  %v5877_v20 = vor.u32 %v8148_v1, %v5876_v0  ;;  %v5881_v32 = vor.u32 %v8144_v6, %v5878_v7  ;;  %vm9595_vm9 = vmor %vm795_vm0, %vm796_vm5  ;;  %v9618_v5 = vld [vmem:[#allocation9] sm:$0xf]  ;;  %v5924_v60 = vld [vmem:[#allocation9 + $0x110] sm:$0xf] }
 0x109   : > { %v783_v36 = vsel %vm9564_vm7, %v9504_v40, %v779_v23  ;;  %v794_v3 = vadd.f32 %v9517_v55, %v793_v24  ;;  %v806_v38 = vmul.f32 %v9555_v28, %v9508_v50  ;;  %vm9576_vm8 = vcmp.eq.f32.partialorder %v814_v39, 8.507059e+37  ;;  %v9627_v39 = vld [vmem:[#allocation9 + $0x4] sm:$0xf] }
 0x10a   : > { %v829_v43 = vand.u32 2147483647, %v9525_v58  ;;  %v788_v40 = vsel %vm9512_vm15, %v787_v54, %v783_v36  ;;  %vm811_vm10 = vweird.f32 %v9555_v28  ;;  %v831_v52 = vand.u32 2147483648, %v9525_v58  ;;  %1301 = vmatpush.bf16.msrb.mxu0 %v5877_v20  ;;  %1314 = vmatpush.bf16.msrb.mxu1 %v5881_v32 }
 0x10b   : > { %v5885_v33 = vor.u32 %v8149_v15, %v5884_v14  ;;  %v839_v41 = vmul.f32 %v788_v40, %v9408_v4  ;;  %v798_v54 = vsel %vm9595_vm9, %v9517_v55, %v794_v3  ;;  %v807_v10 = vsub.f32 1.0, %v806_v38  ;;  %v9616_v55 = vld [vmem:[#allocation9 + $0x68] sm:$0xf0]  ;;  %v5782_v14 = vld [vmem:[#allocation9 + $0x20] sm:$0xf0]  ;;  %vm9651_vm13 = vmor %vm810_vm6, %vm811_vm10 }
 0x10c   : > { %vm825_vm11 = vweird.f32 %v9525_v58  ;;  %v5889_v57 = vor.u32 %v8145_v19, %v5886_v21  ;;  %v9610_v62 = vpop.eup %8855  ;;  %v803_v63 = vsel %vm9543_vm4, %v802_v18, %v798_v54  ;;  %v5845_v0 = vor.u32 %v8140_v17, %v5844_v25  ;;  %v9639_v18 = vld [vmem:[#allocation9 + $0x24] sm:$0xf0]  ;;  %v9643_v25 = vld [vmem:[#allocation9 + $0xc] sm:$0xf]  ;;  %v8162_v15 = vld [vmem:[#allocation9 + $0x154] sm:$0xf] }
 0x10d   : > { %1327 = vmatpush.bf16.msrb.mxu2 %v5885_v33  ;;  %v5849_v4 = vor.u32 %v8136_v26, %v5846_v27  ;;  %v5853_v1 = vor.u32 %v8141_v35, %v5852_v34  ;;  %v847_v6 = vadd.f32 %v839_v41, %v9501_v45  ;;  %v840_v7 = vmul.f32 %v803_v63, %v9411_v11  ;;  %v9645_v17 = vld [vmem:[#allocation9 + $0x28] sm:$0xf0]  ;;  %v6020_v26 = vld [vmem:[#allocation9 + $0x1d0] sm:$0xf]  ;;  %v8178_v34 = vld [vmem:[#allocation9 + $0x1d4] sm:$0xf] }
 0x10e   : > { %v808_v8 = vmul.f32 %v9555_v28, %v807_v10  ;;  %v821_v12 = vmul.f32 %v9610_v62, %v9525_v58  ;;  %1340 = vmatpush.bf16.msrb.mxu3 %v5889_v57  ;;  %vm9629_vm12 = vcmp.eq.f32.partialorder %v829_v43, 8.507059e+37  ;;  %1302 = vmatpush.bf16.msrb.mxu0 %v5845_v0  ;;  %v5857_v11 = vor.u32 %v9581_v44, %v9583_v46  ;;  %v8182_v27 = vld [vmem:[#allocation9 + $0x1ec] sm:$0xf0]  ;;  %v6022_v35 = vld [vmem:[#allocation9 + $0x1f0] sm:$0xf0] }
 0x10f   : > { %1315 = vmatpush.bf16.msrb.mxu1 %v5849_v4  ;;  %v5813_v45 = vor.u32 %v9587_v48, %v9585_v47  ;;  %v5817_v16 = vor.u32 %v8128_v37, %v5814_v56  ;;  %v866_v19 = vrot.slane %v847_v6, 4  ;;  %v848_v21 = vadd.f32 %v840_v7, %v9530_v49  ;;  %v6028_v43 = vld [vmem:[#allocation9 + $0x1d8] sm:$0xf]  ;;  %v5998_v7 = vld [vmem:[#allocation9 + $0x1b8] sm:$0xf0] }
 0x110   : > { %v809_v23 = vadd.f32 %v9555_v28, %v808_v8  ;;  %v822_v24 = vsub.f32 1.0, %v821_v12  ;;  %vm826_vm14 = vweird.f32 %v9610_v62  ;;  %v5821_v49 = vor.u32 %v9608_v61, %v9606_v59  ;;  %v8183_v44 = vld [vmem:[#allocation9 + $0x1f4] sm:$0xf0]  ;;  %v8170_v59 = vld [vmem:[#allocation9 + $0x194] sm:$0xf] }
 0x111   : > { %1328 = vmatpush.bf16.msrb.mxu2 %v5853_v1  ;;  %v5825_v20 = vor.u32 %v9614_v2, %v9616_v55  ;;  %v5781_v32 = vor.u32 %v9625_v13, %v9618_v5  ;;  %v867_v36 = vadd.f32 %v866_v19, %v847_v6  ;;  %v872_v50 = vrot.slane %v848_v21, 4  ;;  %vm827_vm15 = vmor %vm825_vm11, %vm826_vm14  ;;  %v5990_v61 = vld [vmem:[#allocation9 + $0x1b0] sm:$0xf0]  ;;  %v5996_v1 = vld [vmem:[#allocation9 + $0x198] sm:$0xf] }
 0x112   : > { %v813_v3 = vsel %vm9651_vm13, %v9555_v28, %v809_v23  ;;  %v823_v38 = vmul.f32 %v9610_v62, %v822_v24  ;;  %1341 = vmatpush.bf16.msrb.mxu3 %v5857_v11  ;;  %v832_v47 = vor.u32 1.1754944e-38, %v831_v52  ;;  %1303 = vmatpush.bf16.msrb.mxu0 %v5813_v45  ;;  %v5785_v48 = vor.u32 %v9627_v39, %v5782_v14  ;;  %v8179_v28 = vld [vmem:[#allocation9 + $0x1dc] sm:$0xf]  ;;  %v8175_v5 = vld [vmem:[#allocation9 + $0x1b4] sm:$0xf0] }
 0x113   : > { %v818_v46 = vsel %vm9576_vm8, %v9568_v31, %v813_v3  ;;  %1316 = vmatpush.bf16.msrb.mxu1 %v5817_v16  ;;  %v5789_v40 = vor.u32 %v9639_v18, %v9637_v53  ;;  %v868_v33 = vrot.slane %v867_v36, 2  ;;  %v873_v37 = vadd.f32 %v872_v50, %v848_v21  ;;  %v8174_v31 = vld [vmem:[#allocation9 + $0x1ac] sm:$0xf0]  ;;  %v8171_v6 = vld [vmem:[#allocation9 + $0x19c] sm:$0xf] }
 0x114   : > { %v841_v56 = vmul.f32 %v818_v46, %v9425_v29  ;;  %v824_v41 = vadd.f32 %v9610_v62, %v823_v38  ;;  %v5793_v52 = vor.u32 %v9643_v25, %v9645_v17  ;;  %v6021_v54 = vor.u32 %v8182_v27, %v6020_v26  ;;  %v8166_v39 = vld [vmem:[#allocation9 + $0x16c] sm:$0xf0]  ;;  %v5958_v11 = vld [vmem:[#allocation9 + $0x170] sm:$0xf0]  ;;  %v5964_v21 = vld [vmem:[#allocation9 + $0x158] sm:$0xf] }
 0x115   : > { %1329 = vmatpush.bf16.msrb.mxu2 %v5821_v49  ;;  %v6025_v10 = vor.u32 %v8178_v34, %v6022_v35  ;;  %v6029_v57 = vor.u32 %v8183_v44, %v6028_v43  ;;  %v869_v63 = vadd.f32 %v868_v33, %v867_v36  ;;  %v874_v29 = vrot.slane %v873_v37, 2  ;;  %v8163_v23 = vld [vmem:[#allocation9 + $0x15c] sm:$0xf]  ;;  %v5932_v38 = vld [vmem:[#allocation9 + $0x118] sm:$0xf] }
 0x116   : > { %v849_v0 = vadd.f32 %v841_v56, %v9549_v22  ;;  %v828_v4 = vsel %vm827_vm15, %v9610_v62, %v824_v41  ;;  %1342 = vmatpush.bf16.msrb.mxu3 %v5825_v20  ;;  %1304 = vmatpush.bf16.msrb.mxu0 %v5781_v32  ;;  %v6033_v2 = vor.u32 %v8179_v28, %v6030_v51  ;;  %v5956_v62 = vld [vmem:[#allocation9 + $0x150] sm:$0xf]  ;;  %v5966_v27 = vld [vmem:[#allocation9 + $0x178] sm:$0xf0]  ;;  %v8154_v32 = vld [vmem:[#allocation9 + $0x114] sm:$0xf] }
 0x117   : > { %v833_v58 = vsel %vm9629_vm12, %v832_v47, %v828_v4  ;;  %1317 = vmatpush.bf16.msrb.mxu1 %v5785_v48  ;;  %v5989_v55 = vor.u32 %v8174_v31, %v5988_v9  ;;  %v875_v8 = vadd.f32 %v874_v29, %v873_v37  ;;  %v5993_v22 = vor.u32 %v8170_v59, %v5990_v61  ;;  %v8158_v20 = vld [vmem:[#allocation9 + $0x12c] sm:$0xf0]  ;;  %v8159_v43 = vld [vmem:[#allocation9 + $0x134] sm:$0xf0]  ;;  %v8155_v44 = vld [vmem:[#allocation9 + $0x11c] sm:$0xf] }
 0x118   : > { %v878_v12 = vrot.slane %v849_v0, 4  ;;  %v842_v13 = vmul.f32 %v833_v58, %v9430_v42  ;;  %v870_v14 = vrot.slane %v869_v63, 1  ;;  %v5997_v18 = vor.u32 %v8175_v5, %v5996_v1  ;;  %v8167_v42 = vld [vmem:[#allocation9 + $0x174] sm:$0xf0]  ;;  %v5934_v28 = vld [vmem:[#allocation9 + $0x138] sm:$0xf0] }
 0x119   : > { %1330 = vmatpush.bf16.msrb.mxu2 %v5789_v40  ;;  %v876_v45 = vrot.slane %v875_v8, 1  ;;  %v6001_v19 = vor.u32 %v8171_v6, %v5998_v7  ;;  %v5957_v17 = vor.u32 %v8166_v39, %v5956_v62  ;;  %v5961_v26 = vor.u32 %v8162_v15, %v5958_v11  ;;  %v5892_v51 = vld [vmem:[#allocation9 + $0xd0] sm:$0xf]  ;;  %v8146_v37 = vld [vmem:[#allocation9 + $0xd4] sm:$0xf] }
 0x11a   : > { %1349 = vmatpush.bf16.msra.mxu0 %v6021_v54  ;;  %v879_v16 = vadd.f32 %v878_v12, %v849_v0  ;;  %v850_v53 = vadd.f32 %v842_v13, %v9558_v30  ;;  %1343 = vmatpush.bf16.msrb.mxu3 %v5793_v52  ;;  %v871_v49 = vadd.f32 %v870_v14, %v869_v63  ;;  %v5926_v30 = vld [vmem:[#allocation9 + $0x130] sm:$0xf0]  ;;  %v8150_v33 = vld [vmem:[#allocation9 + $0xec] sm:$0xf0]  ;;  %v8147_v59 = vld [vmem:[#allocation9 + $0xdc] sm:$0xf] }
 0x11b   : > { %1362 = vmatpush.bf16.msra.mxu1 %v6025_v10  ;;  %v877_v34 = vadd.f32 %v876_v45, %v875_v8  ;;  %v5965_v50 = vor.u32 %v8167_v42, %v5964_v21  ;;  %v5969_v3 = vor.u32 %v8163_v23, %v5966_v27  ;;  %v5925_v48 = vor.u32 %v8158_v20, %v5924_v60  ;;  %v5894_v56 = vld [vmem:[#allocation9 + $0xf0] sm:$0xf0]  ;;  %v5900_v10 = vld [vmem:[#allocation9 + $0xd8] sm:$0xf]  ;;  %v5902_v4 = vld [vmem:[#allocation9 + $0xf8] sm:$0xf0] }
 0x11c   : > { %v880_v24 = vrot.slane %v879_v16, 2  ;;  %v884_v25 = vrot.slane %v850_v53, 4  ;;  %v5929_v40 = vor.u32 %v8154_v32, %v5926_v30  ;;  %v5933_v52 = vor.u32 %v8159_v43, %v5932_v38  ;;  %v5860_v1 = vld [vmem:[#allocation9 + $0x90] sm:$0xf]  ;;  %v8143_v62 = vld [vmem:[#allocation9 + $0xb4] sm:$0xf0] }
 0x11d   : > { %1375 = vmatpush.bf16.msra.mxu2 %v6029_v57  ;;  %v890_v41 = vadd.f32 %v877_v34, %v871_v49  ;;  %v5937_v54 = vor.u32 %v8155_v44, %v5934_v28  ;;  %v8151_v57 = vld [vmem:[#allocation9 + $0xf4] sm:$0xf0]  ;;  %v5893_v29 = vor.u32 %v8150_v33, %v5892_v51  ;;  %v5897_v0 = vor.u32 %v8146_v37, %v5894_v56  ;;  %v8142_v58 = vld [vmem:[#allocation9 + $0xac] sm:$0xf0]  ;;  %v8139_v39 = vld [vmem:[#allocation9 + $0x9c] sm:$0xf] }
 0x11e   : > { %1388 = vmatpush.bf16.msra.mxu3 %v6033_v2  ;;  %1350 = vmatpush.bf16.msra.mxu0 %v5989_v55  ;;  %v881_v35 = vadd.f32 %v880_v24, %v879_v16  ;;  %v885_v36 = vadd.f32 %v884_v25, %v850_v53  ;;  %v8138_v2 = vld [vmem:[#allocation9 + $0x94] sm:$0xf]  ;;  %v5901_v6 = vor.u32 %v8151_v57, %v5900_v10  ;;  %v5870_v14 = vld [vmem:[#allocation9 + $0xb8] sm:$0xf0]  ;;  %v5828_v15 = vld [vmem:[#allocation9 + $0x50] sm:$0xf] }
 0x11f   : > { %1363 = vmatpush.bf16.msra.mxu1 %v5993_v22  ;;  %v5862_v55 = vld [vmem:[#allocation9 + $0xb0] sm:$0xf0]  ;;  %v5905_v7 = vor.u32 %v8147_v59, %v5902_v4  ;;  %v5861_v12 = vor.u32 %v8142_v58, %v5860_v1  ;;  %v5868_v22 = vld [vmem:[#allocation9 + $0x98] sm:$0xf]  ;;  %v8134_v11 = vld [vmem:[#allocation9 + $0x6c] sm:$0xf0]  ;;  %v5873_v21 = vor.u32 %v8139_v39, %v5870_v14 }
 0x120   : > { %v882_v46 = vrot.slane %v881_v35, 1  ;;  %v886_v47 = vrot.slane %v885_v36, 2  ;;  %v5865_v13 = vor.u32 %v8138_v2, %v5862_v55  ;;  %v8130_v16 = vld [vmem:[#allocation9 + $0x54] sm:$0xf]  ;;  %v5836_v42 = vld [vmem:[#allocation9 + $0x58] sm:$0xf]  ;;  %v5829_v25 = vor.u32 %v8134_v11, %v5828_v15 }
 0x121   : > { %1376 = vmatpush.bf16.msra.mxu2 %v5997_v18  ;;  %v5830_v53 = vld [vmem:[#allocation9 + $0x70] sm:$0xf0]  ;;  %v8135_v23 = vld [vmem:[#allocation9 + $0x74] sm:$0xf0]  ;;  %v8131_v24 = vld [vmem:[#allocation9 + $0x5c] sm:$0xf] }
 0x122   : > { %1389 = vmatpush.bf16.msra.mxu3 %v6001_v19  ;;  %1351 = vmatpush.bf16.msra.mxu0 %v5957_v17  ;;  %v883_v9 = vadd.f32 %v882_v46, %v881_v35  ;;  %v887_v31 = vadd.f32 %v886_v47, %v885_v36  ;;  %v5869_v19 = vor.u32 %v8143_v62, %v5868_v22  ;;  %v5796_v27 = vld [vmem:[#allocation9 + $0x10] sm:$0xf]  ;;  %v8122_v49 = vld [vmem:[#allocation9 + $0x14] sm:$0xf]  ;;  %v6260_v32 = vld [vmem:[#allocation12 + $0x1c0] sm:$0xf] }
 0x123   : > { %1364 = vmatpush.bf16.msra.mxu1 %v5961_v26  ;;  %v5833_v17 = vor.u32 %v8130_v16, %v5830_v53  ;;  %v5838_v26 = vld [vmem:[#allocation9 + $0x78] sm:$0xf0]  ;;  %v8126_v60 = vld [vmem:[#allocation9 + $0x2c] sm:$0xf0]  ;;  %v5798_v20 = vld [vmem:[#allocation9 + $0x30] sm:$0xf0]  ;;  %v5837_v36 = vor.u32 %v8135_v23, %v5836_v42 }
 0x124   : > { %v891_v61 = vadd.f32 %v890_v41, %v883_v9  ;;  %v888_v63 = vrot.slane %v887_v31, 1  ;;  %v8244_v30 = vld [vmem:[#allocation12 + $0x1dc] sm:$0xf0]  ;;  %v8127_v38 = vld [vmem:[#allocation9 + $0x34] sm:$0xf0]  ;;  %v5797_v44 = vor.u32 %v8126_v60, %v5796_v27  ;;  %v5801_v46 = vor.u32 %v8122_v49, %v5798_v20 }
 0x125   : > { %1377 = vmatpush.bf16.msra.mxu2 %v5965_v50  ;;  %v6516_v34 = vld [vmem:[#allocation12 + $0x3c0] sm:$0xf]  ;;  %v5841_v50 = vor.u32 %v8131_v24, %v5838_v26  ;;  %v8123_v43 = vld [vmem:[#allocation9 + $0x1c] sm:$0xf]  ;;  %v6261_v28 = vor.u32 %v8244_v30, %v6260_v32  ;;  %vm5364_vm0 = vcmask 1040384   ;;  %vm5448_vm2 = vcmask 1042434  }
 0x126   : > { %1390 = vmatpush.bf16.msra.mxu3 %v5969_v3  ;;  %1352 = vmatpush.bf16.msra.mxu0 %v5925_v48  ;;  %v889_v5 = vadd.f32 %v888_v63, %v887_v31  ;;  %v8308_v35 = vld [vmem:[#allocation12 + $0x3dc] sm:$0xf0]  ;;  %v5804_v3 = vld [vmem:[#allocation9 + $0x18] sm:$0xf]  ;;  %v5806_v47 = vld [vmem:[#allocation9 + $0x38] sm:$0xf0] }
 0x127   : > { %1365 = vmatpush.bf16.msra.mxu1 %v5929_v40  ;;  %v6228_v48 = vld [vmem:[#allocation12 + $0x180] sm:$0xf]  ;;  %v6517_v51 = vor.u32 %v8308_v35, %v6516_v34  ;;  %vm5450_vm3 = vcmask 1041408   ;;  %vm5452_vm4 = vcmask 1044484   ;;  %vm5454_vm5 = vcmask 1046534  }
 0x128   : > { %v892_v8 = vadd.f32 %v891_v61, %v889_v5  ;;  %v6772_v40 = vld [vmem:[#allocation12 + $0x5c0] sm:$0xf]  ;;  %vm5456_vm6 = vcmask 1045508   ;;  %vm5458_vm7 = vcmask 1043456  }
 0x129   : > { %1378 = vmatpush.bf16.msra.mxu2 %v5933_v52  ;;  %v8372_v33 = vld [vmem:[#allocation12 + $0x5dc] sm:$0xf0]  ;;  %v5805_v52 = vor.u32 %v8127_v38, %v5804_v3 }
 0x12a   : > { %1391 = vmatpush.bf16.msra.mxu3 %v5937_v54  ;;  %1353 = vmatpush.bf16.msra.mxu0 %v5893_v29  ;;  %v893_v45 = vmul.f32 0.015625, %v892_v8  ;;  %v7028_v37 = vld [vmem:[#allocation12 + $0x7c0] sm:$0xf]  ;;  %v5809_v54 = vor.u32 %v8123_v43, %v5806_v47  ;;  %v6773_v10 = vor.u32 %v8372_v33, %v6772_v40 }
 0x12b   : > { %1366 = vmatpush.bf16.msra.mxu1 %v5897_v0  ;;  %v8436_v56 = vld [vmem:[#allocation12 + $0x7dc] sm:$0xf0] }
 0x12c   : > { %v9688_v18 = vpack.c.bf16 %v893_v45, %v893_v45  ;;  %v8236_v41 = vld [vmem:[#allocation12 + $0x19c] sm:$0xf0]  ;;  %v7029_v57 = vor.u32 %v8436_v56, %v7028_v37 }
 0x12d   : > { %1379 = vmatpush.bf16.msra.mxu2 %v5901_v6  ;;  %v6484_v9 = vld [vmem:[#allocation12 + $0x380] sm:$0xf]  ;;  %v6229_v61 = vor.u32 %v8236_v41, %v6228_v48 }
 0x12e   : > { %1392 = vmatpush.bf16.msra.mxu3 %v5905_v7  ;;  %1354 = vmatpush.bf16.msra.mxu0 %v5861_v12  ;;  %v8300_v31 = vld [vmem:[#allocation12 + $0x39c] sm:$0xf0] }
 0x12f   : > { %1367 = vmatpush.bf16.msra.mxu1 %v5865_v13  ;;  %1305 = vmatmul.bf16.vlgmr.msrb.gmra.mxu0 %v9688_v18  ;;  %v6740_v59 = vld [vmem:[#allocation12 + $0x580] sm:$0xf]  ;;  %v6485_v63 = vor.u32 %v8300_v31, %v6484_v9 }
 0x130   : > { %1318 = vmatmul.bf16.vlgmr.msrb.gmra.mxu1 %v9688_v18  ;;  %1331 = vmatmul.bf16.vlgmr.msrb.gmra.mxu2 %v9688_v18  ;;  %v8364_v29 = vld [vmem:[#allocation12 + $0x59c] sm:$0xf0] }
 0x131   : > { %1344 = vmatmul.bf16.vlgmr.msrb.gmra.mxu3 %v9688_v18  ;;  %1380 = vmatpush.bf16.msra.mxu2 %v5869_v19  ;;  %v6996_v0 = vld [vmem:[#allocation12 + $0x780] sm:$0xf]  ;;  %v6741_v5 = vor.u32 %v8364_v29, %v6740_v59 }
 0x132   : > { %1393 = vmatpush.bf16.msra.mxu3 %v5873_v21  ;;  %1355 = vmatpush.bf16.msra.mxu0 %v5829_v25  ;;  %v8428_v4 = vld [vmem:[#allocation12 + $0x79c] sm:$0xf0] }
 0x133   : > { %1368 = vmatpush.bf16.msra.mxu1 %v5833_v17  ;;  %v6196_v1 = vld [vmem:[#allocation12 + $0x140] sm:$0xf]  ;;  %v6997_v6 = vor.u32 %v8428_v4, %v6996_v0 }
 0x134   : > { %v8228_v58 = vld [vmem:[#allocation12 + $0x15c] sm:$0xf0] }
 0x135   : > { %1381 = vmatpush.bf16.msra.mxu2 %v5837_v36  ;;  %v6452_v2 = vld [vmem:[#allocation12 + $0x340] sm:$0xf]  ;;  %v6197_v22 = vor.u32 %v8228_v58, %v6196_v1 }
 0x136   : > { %1394 = vmatpush.bf16.msra.mxu3 %v5841_v50  ;;  %1356 = vmatpush.bf16.msra.mxu0 %v5797_v44  ;;  %v8292_v55 = vld [vmem:[#allocation12 + $0x35c] sm:$0xf0] }
 0x137   : > { %1369 = vmatpush.bf16.msra.mxu1 %v5801_v46  ;;  %v6708_v7 = vld [vmem:[#allocation12 + $0x540] sm:$0xf]  ;;  %v6453_v62 = vor.u32 %v8292_v55, %v6452_v2 }
 0x138   : > { %v8356_v8 = vld [vmem:[#allocation12 + $0x55c] sm:$0xf0] }
 0x139   : > { %1382 = vmatpush.bf16.msra.mxu2 %v5805_v52  ;;  %v6964_v12 = vld [vmem:[#allocation12 + $0x740] sm:$0xf]  ;;  %v6709_v45 = vor.u32 %v8356_v8, %v6708_v7 }
 0x13a   : > { %4507 = vmatpush.bf16.msrb.mxu0 %v6261_v28  ;;  %1395 = vmatpush.bf16.msra.mxu3 %v5809_v54  ;;  %v8420_v13 = vld [vmem:[#allocation12 + $0x75c] sm:$0xf0] }
 0x13b   : > { %4520 = vmatpush.bf16.msrb.mxu1 %v6517_v51  ;;  %v6164_v39 = vld [vmem:[#allocation12 + $0x100] sm:$0xf]  ;;  %v6965_v16 = vor.u32 %v8420_v13, %v6964_v12 }
 0x13c   : > { %v8220_v14 = vld [vmem:[#allocation12 + $0x11c] sm:$0xf0] }
 0x13d   : > { %4533 = vmatpush.bf16.msrb.mxu2 %v6773_v10  ;;  %v6420_v15 = vld [vmem:[#allocation12 + $0x300] sm:$0xf]  ;;  %v6165_v23 = vor.u32 %v8220_v14, %v6164_v39 }
 0x13e   : > { %4546 = vmatpush.bf16.msrb.mxu3 %v7029_v57  ;;  %4508 = vmatpush.bf16.msrb.mxu0 %v6229_v61  ;;  %v8284_v11 = vld [vmem:[#allocation12 + $0x31c] sm:$0xf0] }
 0x13f   : > { %4521 = vmatpush.bf16.msrb.mxu1 %v6485_v63  ;;  %v6676_v53 = vld [vmem:[#allocation12 + $0x500] sm:$0xf]  ;;  %1357 = vmatmul.bf16.vlgmr.msra.gmra.mxu0 %v9688_v18  ;;  %v6421_v24 = vor.u32 %v8284_v11, %v6420_v15 }
 0x140   : > { %1370 = vmatmul.bf16.vlgmr.msra.gmra.mxu1 %v9688_v18  ;;  %v8348_v19 = vld [vmem:[#allocation12 + $0x51c] sm:$0xf0]  ;;  %1383 = vmatmul.bf16.vlgmr.msra.gmra.mxu2 %v9688_v18 }
 0x141   : > { %4534 = vmatpush.bf16.msrb.mxu2 %v6741_v5  ;;  %v6932_v21 = vld [vmem:[#allocation12 + $0x700] sm:$0xf]  ;;  %1396 = vmatmul.bf16.vlgmr.msra.gmra.mxu3 %v9688_v18  ;;  %v6677_v60 = vor.u32 %v8348_v19, %v6676_v53 }
 0x142   : > { %4547 = vmatpush.bf16.msrb.mxu3 %v6997_v6  ;;  %v8412_v42 = vld [vmem:[#allocation12 + $0x71c] sm:$0xf0]  ;;  %4509 = vmatpush.bf16.msrb.mxu0 %v6197_v22 }
 0x143   : > { %4522 = vmatpush.bf16.msrb.mxu1 %v6453_v62  ;;  %v6132_v25 = vld [vmem:[#allocation12 + $0xc0] sm:$0xf]  ;;  %v6933_v49 = vor.u32 %v8412_v42, %v6932_v21 }
 0x144   : > { %v8212_v17 = vld [vmem:[#allocation12 + $0xdc] sm:$0xf0] }
 0x145   : > { %4535 = vmatpush.bf16.msrb.mxu2 %v6709_v45  ;;  %v6388_v26 = vld [vmem:[#allocation12 + $0x2c0] sm:$0xf]  ;;  %v6133_v35 = vor.u32 %v8212_v17, %v6132_v25 }
 0x146   : > { %4548 = vmatpush.bf16.msrb.mxu3 %v6965_v16  ;;  %v8276_v27 = vld [vmem:[#allocation12 + $0x2dc] sm:$0xf0]  ;;  %4510 = vmatpush.bf16.msrb.mxu0 %v6165_v23 }
 0x147   : > { %v6644_v20 = vld [vmem:[#allocation12 + $0x4c0] sm:$0xf]  ;;  %4523 = vmatpush.bf16.msrb.mxu1 %v6421_v24  ;;  %v6389_v18 = vor.u32 %v8276_v27, %v6388_v26 }
 0x148   : > { %v8340_v32 = vld [vmem:[#allocation12 + $0x4dc] sm:$0xf0] }
 0x149   : > { %v6900_v30 = vld [vmem:[#allocation12 + $0x6c0] sm:$0xf]  ;;  %4536 = vmatpush.bf16.msrb.mxu2 %v6677_v60  ;;  %v6645_v43 = vor.u32 %v8340_v32, %v6644_v20 }
 0x14a   : > { %v8404_v34 = vld [vmem:[#allocation12 + $0x6dc] sm:$0xf0]  ;;  %4549 = vmatpush.bf16.msrb.mxu3 %v6933_v49  ;;  %4511 = vmatpush.bf16.msrb.mxu0 %v6133_v35 }
 0x14b   : > { %v6100_v36 = vld [vmem:[#allocation12 + $0x80] sm:$0xf]  ;;  %v6901_v44 = vor.u32 %v8404_v34, %v6900_v30  ;;  %4524 = vmatpush.bf16.msrb.mxu1 %v6389_v18 }
 0x14c   : > { %v8204_v50 = vld [vmem:[#allocation12 + $0x9c] sm:$0xf0] }
 0x14d   : > { %v6356_v3 = vld [vmem:[#allocation12 + $0x280] sm:$0xf]  ;;  %v6101_v28 = vor.u32 %v8204_v50, %v6100_v36  ;;  %4537 = vmatpush.bf16.msrb.mxu2 %v6645_v43 }
 0x14e   : > { %v8268_v38 = vld [vmem:[#allocation12 + $0x29c] sm:$0xf0]  ;;  %4550 = vmatpush.bf16.msrb.mxu3 %v6901_v44 }
 0x14f   : > { %v6612_v46 = vld [vmem:[#allocation12 + $0x480] sm:$0xf]  ;;  %v6357_v51 = vor.u32 %v8268_v38, %v6356_v3  ;;  %4512 = vmatpush.bf16.msrb.mxu0 %v6101_v28 }
 0x150   : > { %v8332_v47 = vld [vmem:[#allocation12 + $0x49c] sm:$0xf0] }
 0x151   : > { %v6868_v48 = vld [vmem:[#allocation12 + $0x680] sm:$0xf]  ;;  %v6613_v9 = vor.u32 %v8332_v47, %v6612_v46  ;;  %4525 = vmatpush.bf16.msrb.mxu1 %v6357_v51 }
 0x152   : > { %v8396_v40 = vld [vmem:[#allocation12 + $0x69c] sm:$0xf0] }
 0x153   : > { %v6068_v33 = vld [vmem:[#allocation12 + $0x40] sm:$0xf]  ;;  %v6869_v31 = vor.u32 %v8396_v40, %v6868_v48  ;;  %4538 = vmatpush.bf16.msrb.mxu2 %v6613_v9 }
 0x154   : > { %v8196_v37 = vld [vmem:[#allocation12 + $0x5c] sm:$0xf0] }
 0x155   : > { %v6324_v56 = vld [vmem:[#allocation12 + $0x240] sm:$0xf]  ;;  %v6069_v61 = vor.u32 %v8196_v37, %v6068_v33  ;;  %4551 = vmatpush.bf16.msrb.mxu3 %v6869_v31 }
 0x156   : > { %v8260_v41 = vld [vmem:[#allocation12 + $0x25c] sm:$0xf0] }
 0x157   : > { %v6580_v52 = vld [vmem:[#allocation12 + $0x440] sm:$0xf]  ;;  %v6325_v63 = vor.u32 %v8260_v41, %v6324_v56  ;;  %4513 = vmatpush.bf16.msrb.mxu0 %v6069_v61 }
 0x158   : > { %v8324_v54 = vld [vmem:[#allocation12 + $0x45c] sm:$0xf0] }
 0x159   : > { %v6836_v10 = vld [vmem:[#allocation12 + $0x640] sm:$0xf]  ;;  %v6581_v55 = vor.u32 %v8324_v54, %v6580_v52  ;;  %4526 = vmatpush.bf16.msrb.mxu1 %v6325_v63 }
 0x15a   : > { %v8388_v57 = vld [vmem:[#allocation12 + $0x65c] sm:$0xf0] }
 0x15b   : > { %v6036_v59 = vld [vmem:[#allocation12] sm:$0xf]  ;;  %v6837_v5 = vor.u32 %v8388_v57, %v6836_v10  ;;  %4539 = vmatpush.bf16.msrb.mxu2 %v6581_v55 }
 0x15c   : > { %v8188_v29 = vld [vmem:[#allocation12 + $0x1c] sm:$0xf0] }
 0x15d   : > { %v6292_v0 = vld [vmem:[#allocation12 + $0x200] sm:$0xf]  ;;  %v6037_v62 = vor.u32 %v8188_v29, %v6036_v59  ;;  %4552 = vmatpush.bf16.msrb.mxu3 %v6837_v5 }
 0x15e   : > { %v8252_v4 = vld [vmem:[#allocation12 + $0x21c] sm:$0xf0] }
 0x15f   : > { %v7284_v1 = vld [vmem:[#allocation12 + $0x9c0] sm:$0xf]  ;;  %v6293_v39 = vor.u32 %v8252_v4, %v6292_v0  ;;  %4514 = vmatpush.bf16.msrb.mxu0 %v6037_v62 }
 0x160   : > { %v8500_v58 = vld [vmem:[#allocation12 + $0x9dc] sm:$0xf0] }
 0x161   : > { %v7540_v2 = vld [vmem:[#allocation12 + $0xbc0] sm:$0xf]  ;;  %v7285_v45 = vor.u32 %v8500_v58, %v7284_v1  ;;  %4527 = vmatpush.bf16.msrb.mxu1 %v6293_v39 }
 0x162   : > { %v8564_v6 = vld [vmem:[#allocation12 + $0xbdc] sm:$0xf0] }
 0x163   : > { %v6548_v7 = vld [vmem:[#allocation12 + $0x400] sm:$0xf]  ;;  %v7541_v16 = vor.u32 %v8564_v6, %v7540_v2  ;;  %4559 = vmatpush.bf16.msra.mxu0 %v7285_v45 }
 0x164   : > { %v8316_v8 = vld [vmem:[#allocation12 + $0x41c] sm:$0xf0] }
 0x165   : > { %v6804_v12 = vld [vmem:[#allocation12 + $0x600] sm:$0xf]  ;;  %v6549_v23 = vor.u32 %v8316_v8, %v6548_v7  ;;  %4572 = vmatpush.bf16.msra.mxu1 %v7541_v16 }
 0x166   : > { %v8380_v13 = vld [vmem:[#allocation12 + $0x61c] sm:$0xf0] }
 0x167   : > { %v7796_v22 = vld [vmem:[#allocation12 + $0xdc0] sm:$0xf]  ;;  %v6805_v24 = vor.u32 %v8380_v13, %v6804_v12  ;;  %4540 = vmatpush.bf16.msrb.mxu2 %v6549_v23 }
 0x168   : > { %v8628_v14 = vld [vmem:[#allocation12 + $0xddc] sm:$0xf0] }
 0x169   : > { %v8052_v15 = vld [vmem:[#allocation12 + $0xfc0] sm:$0xf]  ;;  %v7797_v25 = vor.u32 %v8628_v14, %v7796_v22  ;;  %4553 = vmatpush.bf16.msrb.mxu3 %v6805_v24 }
 0x16a   : > { %v8692_v11 = vld [vmem:[#allocation12 + $0xfdc] sm:$0xf0] }
 0x16b   : > { %v7252_v53 = vld [vmem:[#allocation12 + $0x980] sm:$0xf]  ;;  %v8053_v17 = vor.u32 %v8692_v11, %v8052_v15  ;;  %4585 = vmatpush.bf16.msra.mxu2 %v7797_v25 }
 0x16c   : > { %v8492_v19 = vld [vmem:[#allocation12 + $0x99c] sm:$0xf0] }
 0x16d   : > { %v7508_v21 = vld [vmem:[#allocation12 + $0xb80] sm:$0xf]  ;;  %v7253_v20 = vor.u32 %v8492_v19, %v7252_v53  ;;  %4598 = vmatpush.bf16.msra.mxu3 %v8053_v17 }
 0x16e   : > { %v8556_v42 = vld [vmem:[#allocation12 + $0xb9c] sm:$0xf0] }
 0x16f   : > { %v7764_v26 = vld [vmem:[#allocation12 + $0xd80] sm:$0xf]  ;;  %v7509_v32 = vor.u32 %v8556_v42, %v7508_v21  ;;  %4560 = vmatpush.bf16.msra.mxu0 %v7253_v20 }
 0x170   : > { %v8620_v27 = vld [vmem:[#allocation12 + $0xd9c] sm:$0xf0] }
 0x171   : > { %v8020_v60 = vld [vmem:[#allocation12 + $0xf80] sm:$0xf]  ;;  %v7765_v36 = vor.u32 %v8620_v27, %v7764_v26  ;;  %4573 = vmatpush.bf16.msra.mxu1 %v7509_v32 }
 0x172   : > { %v8684_v49 = vld [vmem:[#allocation12 + $0xf9c] sm:$0xf0] }
 0x173   : > { %v7220_v30 = vld [vmem:[#allocation12 + $0x940] sm:$0xf]  ;;  %v8021_v50 = vor.u32 %v8684_v49, %v8020_v60  ;;  %4586 = vmatpush.bf16.msra.mxu2 %v7765_v36 }
 0x174   : > { %v8484_v34 = vld [vmem:[#allocation12 + $0x95c] sm:$0xf0] }
 0x175   : > { %v7476_v35 = vld [vmem:[#allocation12 + $0xb40] sm:$0xf]  ;;  %v7221_v46 = vor.u32 %v8484_v34, %v7220_v30  ;;  %4599 = vmatpush.bf16.msra.mxu3 %v8021_v50 }
 0x176   : > { %v8548_v18 = vld [vmem:[#allocation12 + $0xb5c] sm:$0xf0] }
 0x177   : > { %v7732_v3 = vld [vmem:[#allocation12 + $0xd40] sm:$0xf]  ;;  %v7477_v47 = vor.u32 %v8548_v18, %v7476_v35  ;;  %4561 = vmatpush.bf16.msra.mxu0 %v7221_v46  ;;  %v9698_v46 = vld [vmem:[#allocation11] sm:$0xff] }
 0x178   : > { %v8612_v38 = vld [vmem:[#allocation12 + $0xd5c] sm:$0xf0] }
 0x179   : > { %v7988_v43 = vld [vmem:[#allocation12 + $0xf40] sm:$0xf]  ;;  %v7733_v33 = vor.u32 %v8612_v38, %v7732_v3  ;;  %4574 = vmatpush.bf16.msra.mxu1 %v7477_v47  ;;  %v1281_v47 = vperm.slane %v9698_v46, 0 }
 0x17a   : > { %v8676_v44 = vld [vmem:[#allocation12 + $0xf5c] sm:$0xf0] }
 0x17b   : > { %v7188_v48 = vld [vmem:[#allocation12 + $0x900] sm:$0xf]  ;;  %v7989_v37 = vor.u32 %v8676_v44, %v7988_v43  ;;  %4587 = vmatpush.bf16.msra.mxu2 %v7733_v33 }
 0x17c   : > { %v8476_v40 = vld [vmem:[#allocation12 + $0x91c] sm:$0xf0] }
 0x17d   : > { %v7444_v28 = vld [vmem:[#allocation12 + $0xb00] sm:$0xf]  ;;  %v7189_v52 = vor.u32 %v8476_v40, %v7188_v48  ;;  %4600 = vmatpush.bf16.msra.mxu3 %v7989_v37  ;;  %v1282_v48 = vperm.slane %v9698_v46, 1 }
 0x17e   : > { %v8540_v51 = vld [vmem:[#allocation12 + $0xb1c] sm:$0xf0] }
 0x17f   : > { %v7700_v56 = vld [vmem:[#allocation12 + $0xd00] sm:$0xf]  ;;  %v7445_v54 = vor.u32 %v8540_v51, %v7444_v28  ;;  %4562 = vmatpush.bf16.msra.mxu0 %v7189_v52  ;;  %v8240_v51 = vld [vmem:[#allocation12 + $0x1c4] sm:$0xf] }
 0x180   : > { %v8604_v41 = vld [vmem:[#allocation12 + $0xd1c] sm:$0xf0] }
 0x181   : > { %v7956_v9 = vld [vmem:[#allocation12 + $0xf00] sm:$0xf]  ;;  %v7701_v63 = vor.u32 %v8604_v41, %v7700_v56  ;;  %4575 = vmatpush.bf16.msra.mxu1 %v7445_v54  ;;  %v6262_v56 = vld [vmem:[#allocation12 + $0x1e0] sm:$0xf0]  ;;  %v1283_v54 = vperm.slane %v9698_v46, 2 }
 0x182   : > { %v8668_v31 = vld [vmem:[#allocation12 + $0xf1c] sm:$0xf0]  ;;  %v8304_v41 = vld [vmem:[#allocation12 + $0x3c4] sm:$0xf] }
 0x183   : > { %v7156_v10 = vld [vmem:[#allocation12 + $0x8c0] sm:$0xf]  ;;  %v7957_v29 = vor.u32 %v8668_v31, %v7956_v9  ;;  %4588 = vmatpush.bf16.msra.mxu2 %v7701_v63  ;;  %v6518_v9 = vld [vmem:[#allocation12 + $0x3e0] sm:$0xf0] }
 0x184   : > { %v8468_v57 = vld [vmem:[#allocation12 + $0x8dc] sm:$0xf0]  ;;  %v6230_v63 = vld [vmem:[#allocation12 + $0x1a0] sm:$0xf0] }
 0x185   : > { %v7412_v59 = vld [vmem:[#allocation12 + $0xac0] sm:$0xf]  ;;  %v7157_v0 = vor.u32 %v8468_v57, %v7156_v10  ;;  %4601 = vmatpush.bf16.msra.mxu3 %v7957_v29  ;;  %v1284_v10 = vperm.slane %v9698_v46, 3  ;;  %v6265_v57 = vor.u32 %v8240_v51, %v6262_v56  ;;  %v8208_v56 = vld [vmem:[#allocation12 + $0xc4] sm:$0xf] }
 0x186   : > { %v8532_v61 = vld [vmem:[#allocation12 + $0xadc] sm:$0xf0] }
 0x187   : > { %v7413_v4 = vor.u32 %v8532_v61, %v7412_v59  ;;  %v7124_v1 = vld [vmem:[#allocation12 + $0x880] sm:$0xf]  ;;  %4563 = vmatpush.bf16.msra.mxu0 %v7157_v0  ;;  %v6521_v59 = vor.u32 %v8304_v41, %v6518_v9  ;;  %v8232_v61 = vld [vmem:[#allocation12 + $0x184] sm:$0xf] }
 0x188   : > { %v8460_v58 = vld [vmem:[#allocation12 + $0x89c] sm:$0xf0] }
 0x189   : > { %v7380_v2 = vld [vmem:[#allocation12 + $0xa80] sm:$0xf]  ;;  %4576 = vmatpush.bf16.msra.mxu1 %v7413_v4  ;;  %v7125_v5 = vor.u32 %v8460_v58, %v7124_v1  ;;  %v8296_v4 = vld [vmem:[#allocation12 + $0x384] sm:$0xf] }
 0x18a   : > { %v8524_v55 = vld [vmem:[#allocation12 + $0xa9c] sm:$0xf0]  ;;  %v6486_v1 = vld [vmem:[#allocation12 + $0x3a0] sm:$0xf0] }
 0x18b   : > { %v7381_v6 = vor.u32 %v8524_v55, %v7380_v2  ;;  %4564 = vmatpush.bf16.msra.mxu0 %v7125_v5  ;;  %v7668_v7 = vld [vmem:[#allocation12 + $0xcc0] sm:$0xf]  ;;  %v6233_v55 = vor.u32 %v8232_v61, %v6230_v63  ;;  %v8368_v5 = vld [vmem:[#allocation12 + $0x5c4] sm:$0xf]  ;;  %v1288_v61 = vperm.slane %v9698_v46, 7 }
 0x18c   : > { %v8596_v8 = vld [vmem:[#allocation12 + $0xcdc] sm:$0xf0]  ;;  %v8344_v63 = vld [vmem:[#allocation12 + $0x504] sm:$0xf] }
 0x18d   : > { %4577 = vmatpush.bf16.msra.mxu1 %v7381_v6  ;;  %v7924_v12 = vld [vmem:[#allocation12 + $0xec0] sm:$0xf]  ;;  %v7669_v13 = vor.u32 %v8596_v8, %v7668_v7  ;;  %v6774_v6 = vld [vmem:[#allocation12 + $0x5e0] sm:$0xf0] }
 0x18e   : > { %v8660_v22 = vld [vmem:[#allocation12 + $0xedc] sm:$0xf0]  ;;  %v8432_v7 = vld [vmem:[#allocation12 + $0x7c4] sm:$0xf] }
 0x18f   : > { %v7925_v62 = vor.u32 %v8660_v22, %v7924_v12  ;;  %v7092_v39 = vld [vmem:[#allocation12 + $0x840] sm:$0xf]  ;;  %4589 = vmatpush.bf16.msra.mxu2 %v7669_v13 }
 0x190   : > { %v8452_v14 = vld [vmem:[#allocation12 + $0x85c] sm:$0xf0] }
 0x191   : > { %v7093_v15 = vor.u32 %v8452_v14, %v7092_v39  ;;  %v7348_v11 = vld [vmem:[#allocation12 + $0xa40] sm:$0xf]  ;;  %4602 = vmatpush.bf16.msra.mxu3 %v7925_v62  ;;  %v6489_v62 = vor.u32 %v8296_v4, %v6486_v1  ;;  %v7030_v39 = vld [vmem:[#allocation12 + $0x7e0] sm:$0xf0] }
 0x192   : > { %v8516_v45 = vld [vmem:[#allocation12 + $0xa5c] sm:$0xf0]  ;;  %v8224_v14 = vld [vmem:[#allocation12 + $0x144] sm:$0xf] }
 0x193   : > { %v7349_v16 = vor.u32 %v8516_v45, %v7348_v11  ;;  %v7636_v53 = vld [vmem:[#allocation12 + $0xc80] sm:$0xf]  ;;  %4565 = vmatpush.bf16.msra.mxu0 %v7093_v15  ;;  %v6198_v15 = vld [vmem:[#allocation12 + $0x160] sm:$0xf0] }
 0x194   : > { %v8588_v19 = vld [vmem:[#allocation12 + $0xc9c] sm:$0xf0]  ;;  %v8288_v11 = vld [vmem:[#allocation12 + $0x344] sm:$0xf] }
 0x195   : > { %v7892_v21 = vld [vmem:[#allocation12 + $0xe80] sm:$0xf]  ;;  %v7637_v42 = vor.u32 %v8588_v19, %v7636_v53  ;;  %4578 = vmatpush.bf16.msra.mxu1 %v7349_v16  ;;  %v6454_v45 = vld [vmem:[#allocation12 + $0x360] sm:$0xf0]  ;;  %v1285_v19 = vperm.slane %v9698_v46, 4 }
 0x196   : > { %v8652_v23 = vld [vmem:[#allocation12 + $0xe9c] sm:$0xf0]  ;;  %v6678_v4 = vld [vmem:[#allocation12 + $0x520] sm:$0xf0] }
 0x197   : > { %v7893_v24 = vor.u32 %v8652_v23, %v7892_v21  ;;  %v7060_v25 = vld [vmem:[#allocation12 + $0x800] sm:$0xf]  ;;  %4590 = vmatpush.bf16.msra.mxu2 %v7637_v42  ;;  %v6777_v21 = vor.u32 %v8368_v5, %v6774_v6  ;;  %v7033_v42 = vor.u32 %v8432_v7, %v7030_v39  ;;  %v6201_v23 = vor.u32 %v8224_v14, %v6198_v15  ;;  %v8408_v1 = vld [vmem:[#allocation12 + $0x704] sm:$0xf] }
 0x198   : > { %v8444_v17 = vld [vmem:[#allocation12 + $0x81c] sm:$0xf0]  ;;  %v8200_v7 = vld [vmem:[#allocation12 + $0x84] sm:$0xf] }
 0x199   : > { %v7316_v26 = vld [vmem:[#allocation12 + $0xa00] sm:$0xf]  ;;  %v7061_v27 = vor.u32 %v8444_v17, %v7060_v25  ;;  %4603 = vmatpush.bf16.msra.mxu3 %v7893_v24  ;;  %v8360_v24 = vld [vmem:[#allocation12 + $0x584] sm:$0xf] }
 0x19a   : > { %v8508_v60 = vld [vmem:[#allocation12 + $0xa1c] sm:$0xf0]  ;;  %v6742_v25 = vld [vmem:[#allocation12 + $0x5a0] sm:$0xf0] }
 0x19b   : > { %v7317_v49 = vor.u32 %v8508_v60, %v7316_v26  ;;  %4566 = vmatpush.bf16.msra.mxu0 %v7061_v27  ;;  %v7604_v20 = vld [vmem:[#allocation12 + $0xc40] sm:$0xf]  ;;  %v8424_v17 = vld [vmem:[#allocation12 + $0x784] sm:$0xf]  ;;  %v6457_v60 = vor.u32 %v8288_v11, %v6454_v45 }
 0x19c   : > { %v8580_v32 = vld [vmem:[#allocation12 + $0xc5c] sm:$0xf0]  ;;  %v8336_v14 = vld [vmem:[#allocation12 + $0x4c4] sm:$0xf] }
 0x19d   : > { %v7860_v30 = vld [vmem:[#allocation12 + $0xe40] sm:$0xf]  ;;  %4579 = vmatpush.bf16.msra.mxu1 %v7317_v49  ;;  %v7605_v34 = vor.u32 %v8580_v32, %v7604_v20  ;;  %v1286_v49 = vperm.slane %v9698_v46, 5  ;;  %v6998_v20 = vld [vmem:[#allocation12 + $0x7a0] sm:$0xf0] }
 0x19e   : > { %v8644_v35 = vld [vmem:[#allocation12 + $0xe5c] sm:$0xf0]  ;;  %v8216_v32 = vld [vmem:[#allocation12 + $0x104] sm:$0xf] }
 0x19f   : > { %v7861_v18 = vor.u32 %v8644_v35, %v7860_v30  ;;  %4591 = vmatpush.bf16.msra.mxu2 %v7605_v34  ;;  %v7572_v36 = vld [vmem:[#allocation12 + $0xc00] sm:$0xf]  ;;  %v6166_v30 = vld [vmem:[#allocation12 + $0x120] sm:$0xf0] }
 0x1a0   : > { %v8572_v50 = vld [vmem:[#allocation12 + $0xc1c] sm:$0xf0]  ;;  %v8280_v34 = vld [vmem:[#allocation12 + $0x304] sm:$0xf] }
 0x1a1   : > { %4604 = vmatpush.bf16.msra.mxu3 %v7861_v18  ;;  %v7573_v3 = vor.u32 %v8572_v50, %v7572_v36  ;;  %v7828_v38 = vld [vmem:[#allocation12 + $0xe00] sm:$0xf]  ;;  %v6422_v35 = vld [vmem:[#allocation12 + $0x320] sm:$0xf0] }
 0x1a2   : > { %v8636_v43 = vld [vmem:[#allocation12 + $0xe1c] sm:$0xf0]  ;;  %v8352_v18 = vld [vmem:[#allocation12 + $0x544] sm:$0xf]  ;;  %v6425_v51 = vor.u32 %v8280_v34, %v6422_v35 }
 0x1a3   : > { %v7829_v44 = vor.u32 %v8636_v43, %v7828_v38  ;;  %4592 = vmatpush.bf16.msra.mxu2 %v7573_v3  ;;  %v6745_v3 = vor.u32 %v8360_v24, %v6742_v25  ;;  %v7001_v38 = vor.u32 %v8424_v17, %v6998_v20  ;;  %v6710_v43 = vld [vmem:[#allocation12 + $0x560] sm:$0xf0] }
 0x1a4   : > { %v6713_v41 = vor.u32 %v8352_v18, %v6710_v43  ;;  %v8192_v24 = vld [vmem:[#allocation12 + $0x44] sm:$0xf] }
 0x1a5   : > { %4605 = vmatpush.bf16.msra.mxu3 %v7829_v44  ;;  %v8416_v44 = vld [vmem:[#allocation12 + $0x744] sm:$0xf] }
 0x1a6   : > { %v6070_v25 = vld [vmem:[#allocation12 + $0x60] sm:$0xf0] }
 0x1a7   : > { %v6326_v20 = vld [vmem:[#allocation12 + $0x260] sm:$0xf0] }
 0x1a8   : > { %v8328_v34 = vld [vmem:[#allocation12 + $0x484] sm:$0xf] }
 0x1ac   : > { %v1306_v40 = vpop.f32.mrf.mxu0 }
 0x1ad   : > { %v1319_v28 = vpop.f32.mrf.mxu1  ;;  %v1307_v33 = vadd.f32 %v1306_v40, %v1281_v47  ;;  %v6966_v47 = vld [vmem:[#allocation12 + $0x760] sm:$0xf0] }
 0x1ae   : > { %v1320_v37 = vadd.f32 %v1319_v28, %v1282_v48  ;;  %v6169_v28 = vor.u32 %v8216_v32, %v6166_v30  ;;  %v6969_v9 = vor.u32 %v8416_v44, %v6966_v47  ;;  %v8184_v44 = vld [vmem:[#allocation12 + $0x4] sm:$0xf] }
 0x1af   : > { %v1401_v31 = vmax.f32 %v1307_v33, 0.0  ;;  %v6038_v47 = vld [vmem:[#allocation12 + $0x20] sm:$0xf0] }
 0x1b0   : > { %v1402_v52 = vmax.f32 %v1320_v37, 0.0 }
 0x1b1   : > { %v9704_v29 = vpack.c.bf16 %v1401_v31, %v1401_v31  ;;  %v6134_v31 = vld [vmem:[#allocation12 + $0xe0] sm:$0xf0] }
 0x1b2   : > { %v9706_v0 = vpack.c.bf16 %v1402_v52, %v1402_v52  ;;  %v8272_v52 = vld [vmem:[#allocation12 + $0x2c4] sm:$0xf]  ;;  %v6137_v5 = vor.u32 %v8208_v56, %v6134_v31 }
 0x1b3   : > { %v1332_v58 = vpop.f32.mrf.mxu2  ;;  %4515 = vmatmul.bf16.vlgmr.msrb.gmra.mxu0 %v9704_v29  ;;  %v7542_v31 = vld [vmem:[#allocation12 + $0xbe0] sm:$0xf0] }
 0x1b4   : > { %v1345_v2 = vpop.f32.mrf.mxu3  ;;  %4528 = vmatmul.bf16.vlgmr.msrb.gmra.mxu1 %v9706_v0  ;;  %v1333_v8 = vadd.f32 %v1332_v58, %v1283_v54  ;;  %4611 = vmatpush.bf16.msrb.mxu0 %v6265_v57  ;;  %v1308_v13 = vpop.f32.mrf.mxu0  ;;  %v6390_v54 = vld [vmem:[#allocation12 + $0x2e0] sm:$0xf0] }
 0x1b5   : > { %v1346_v12 = vadd.f32 %v1345_v2, %v1284_v10  ;;  %4624 = vmatpush.bf16.msrb.mxu1 %v6521_v59  ;;  %v1321_v22 = vpop.f32.mrf.mxu1  ;;  %v1287_v59 = vperm.slane %v9698_v46, 6  ;;  %v6934_v58 = vld [vmem:[#allocation12 + $0x720] sm:$0xf0]  ;;  %v6393_v6 = vor.u32 %v8272_v52, %v6390_v54 }
 0x1b6   : > { %v1403_v16 = vmax.f32 %v1333_v8, 0.0  ;;  %v6102_v8 = vld [vmem:[#allocation12 + $0xa0] sm:$0xf0]  ;;  %v6937_v39 = vor.u32 %v8408_v1, %v6934_v58 }
 0x1b7   : > { %v1404_v53 = vmax.f32 %v1346_v12, 0.0  ;;  %v8264_v12 = vld [vmem:[#allocation12 + $0x284] sm:$0xf] }
 0x1b8   : > { %v9711_v26 = vpack.c.bf16 %v1403_v16, %v1403_v16  ;;  %4612 = vmatpush.bf16.msrb.mxu0 %v6233_v55  ;;  %v6358_v13 = vld [vmem:[#allocation12 + $0x2a0] sm:$0xf0] }
 0x1b9   : > { %v9713_v27 = vpack.c.bf16 %v1404_v53, %v1404_v53  ;;  %4625 = vmatpush.bf16.msrb.mxu1 %v6489_v62  ;;  %v6681_v62 = vor.u32 %v8344_v63, %v6678_v4  ;;  %v6646_v53 = vld [vmem:[#allocation12 + $0x4e0] sm:$0xf0] }
 0x1ba   : > { %4541 = vmatmul.bf16.vlgmr.msrb.gmra.mxu2 %v9711_v26  ;;  %v6649_v32 = vor.u32 %v8336_v14, %v6646_v53  ;;  %v8320_v52 = vld [vmem:[#allocation12 + $0x444] sm:$0xf] }
 0x1bb   : > { %4554 = vmatmul.bf16.vlgmr.msrb.gmra.mxu3 %v9713_v27  ;;  %4637 = vmatpush.bf16.msrb.mxu2 %v6777_v21  ;;  %v1334_v36 = vpop.f32.mrf.mxu2  ;;  %v6902_v21 = vld [vmem:[#allocation12 + $0x6e0] sm:$0xf0] }
 0x1bc   : > { %4650 = vmatpush.bf16.msrb.mxu3 %v7033_v42  ;;  %v1347_v50 = vpop.f32.mrf.mxu3  ;;  %4613 = vmatpush.bf16.msrb.mxu0 %v6201_v23  ;;  %v1358_v48 = vpop.f32.mrf.mxu0  ;;  %v6105_v42 = vor.u32 %v8200_v7, %v6102_v8  ;;  %v6361_v23 = vor.u32 %v8264_v12, %v6358_v13  ;;  %v6614_v36 = vld [vmem:[#allocation12 + $0x4a0] sm:$0xf0] }
 0x1bd   : > { %4626 = vmatpush.bf16.msrb.mxu1 %v6457_v60  ;;  %v1371_v40 = vpop.f32.mrf.mxu1  ;;  %v1359_v33 = vadd.f32 %v1358_v48, %v1285_v19  ;;  %v8400_v19 = vld [vmem:[#allocation12 + $0x6c4] sm:$0xf]  ;;  %v6617_v56 = vor.u32 %v8328_v34, %v6614_v36 }
 0x1be   : > { %v1372_v37 = vadd.f32 %v1371_v40, %v1286_v49  ;;  %v8256_v49 = vld [vmem:[#allocation12 + $0x244] sm:$0xf]  ;;  %v6905_v30 = vor.u32 %v8400_v19, %v6902_v21 }
 0x1bf   : > { %v1405_v10 = vmax.f32 %v1359_v33, 0.0  ;;  %4638 = vmatpush.bf16.msrb.mxu2 %v6745_v3  ;;  %v8392_v50 = vld [vmem:[#allocation12 + $0x684] sm:$0xf]  ;;  %v6329_v43 = vor.u32 %v8256_v49, %v6326_v20 }
 0x1c0   : > { %v1406_v57 = vmax.f32 %v1372_v37, 0.0  ;;  %4651 = vmatpush.bf16.msrb.mxu3 %v7001_v38  ;;  %4614 = vmatpush.bf16.msrb.mxu0 %v6169_v28  ;;  %v6870_v3 = vld [vmem:[#allocation12 + $0x6a0] sm:$0xf0]  ;;  %v6073_v38 = vor.u32 %v8192_v24, %v6070_v25 }
 0x1c1   : > { %4627 = vmatpush.bf16.msrb.mxu1 %v6425_v51  ;;  %v9720_v2 = vpack.c.bf16 %v1405_v10, %v1405_v10  ;;  %v8248_v48 = vld [vmem:[#allocation12 + $0x204] sm:$0xf] }
 0x1c2   : > { %v9722_v55 = vpack.c.bf16 %v1406_v57, %v1406_v57  ;;  %v6294_v40 = vld [vmem:[#allocation12 + $0x220] sm:$0xf0] }
 0x1c3   : > { %4639 = vmatpush.bf16.msrb.mxu2 %v6713_v41  ;;  %v1384_v22 = vpop.f32.mrf.mxu2  ;;  %4567 = vmatmul.bf16.vlgmr.msra.gmra.mxu0 %v9720_v2  ;;  %v8496_v28 = vld [vmem:[#allocation12 + $0x9c4] sm:$0xf]  ;;  %v6873_v41 = vor.u32 %v8392_v50, %v6870_v3 }
 0x1c4   : > { %4652 = vmatpush.bf16.msrb.mxu3 %v6969_v9  ;;  %v1397_v46 = vpop.f32.mrf.mxu3  ;;  %v1385_v15 = vadd.f32 %v1384_v22, %v1287_v59  ;;  %4580 = vmatmul.bf16.vlgmr.msra.gmra.mxu1 %v9722_v55  ;;  %v1360_v45 = vpop.f32.mrf.mxu0  ;;  %v7286_v51 = vld [vmem:[#allocation12 + $0x9e0] sm:$0xf0]  ;;  %v6041_v59 = vor.u32 %v8184_v44, %v6038_v47 }
 0x1c5   : > { %v1398_v11 = vadd.f32 %v1397_v46, %v1288_v61  ;;  %v1373_v16 = vpop.f32.mrf.mxu1  ;;  %4615 = vmatpush.bf16.msrb.mxu0 %v6137_v5  ;;  %4628 = vmatpush.bf16.msrb.mxu1 %v6393_v6  ;;  %v8560_v9 = vld [vmem:[#allocation12 + $0xbc4] sm:$0xf]  ;;  %v6297_v61 = vor.u32 %v8248_v48, %v6294_v40  ;;  %v7289_v63 = vor.u32 %v8496_v28, %v7286_v51 }
 0x1c6   : > { %v1407_v17 = vmax.f32 %v1385_v15, 0.0  ;;  %v6582_v54 = vld [vmem:[#allocation12 + $0x460] sm:$0xf0]  ;;  %v7545_v4 = vor.u32 %v8560_v9, %v7542_v31 }
 0x1c7   : > { %v1408_v60 = vmax.f32 %v1398_v11, 0.0  ;;  %4640 = vmatpush.bf16.msrb.mxu2 %v6681_v62  ;;  %v8384_v10 = vld [vmem:[#allocation12 + $0x644] sm:$0xf]  ;;  %v6585_v6 = vor.u32 %v8320_v52, %v6582_v54 }
 0x1c8   : > { %4653 = vmatpush.bf16.msrb.mxu3 %v6937_v39  ;;  %v9726_v35 = vpack.c.bf16 %v1407_v17, %v1407_v17  ;;  %v6838_v57 = vld [vmem:[#allocation12 + $0x660] sm:$0xf0] }
 0x1c9   : > { %v9728_v18 = vpack.c.bf16 %v1408_v60, %v1408_v60  ;;  %4616 = vmatpush.bf16.msrb.mxu0 %v6105_v42  ;;  %4629 = vmatpush.bf16.msrb.mxu1 %v6361_v23  ;;  %v8488_v1 = vld [vmem:[#allocation12 + $0x984] sm:$0xf]  ;;  %v6841_v7 = vor.u32 %v8384_v10, %v6838_v57 }
 0x1ca   : > { %4593 = vmatmul.bf16.vlgmr.msra.gmra.mxu2 %v9726_v35  ;;  %v7254_v58 = vld [vmem:[#allocation12 + $0x9a0] sm:$0xf0] }
 0x1cb   : > { %4606 = vmatmul.bf16.vlgmr.msra.gmra.mxu3 %v9728_v18  ;;  %4641 = vmatpush.bf16.msrb.mxu2 %v6649_v32  ;;  %v1386_v33 = vpop.f32.mrf.mxu2  ;;  %v8552_v5 = vld [vmem:[#allocation12 + $0xb84] sm:$0xf]  ;;  %v7257_v11 = vor.u32 %v8488_v1, %v7254_v58 }
 0x1cc   : > { %4654 = vmatpush.bf16.msrb.mxu3 %v6905_v30  ;;  %v1399_v37 = vpop.f32.mrf.mxu3  ;;  %v7510_v8 = vld [vmem:[#allocation12 + $0xba0] sm:$0xf0] }
 0x1cd   : > { %4617 = vmatpush.bf16.msrb.mxu0 %v6073_v38  ;;  %4630 = vmatpush.bf16.msrb.mxu1 %v6329_v43  ;;  %v8312_v12 = vld [vmem:[#allocation12 + $0x404] sm:$0xf]  ;;  %v7513_v45 = vor.u32 %v8552_v5, %v7510_v8 }
 0x1ce   : > { %v6550_v13 = vld [vmem:[#allocation12 + $0x420] sm:$0xf0] }
 0x1cf   : > { %4642 = vmatpush.bf16.msrb.mxu2 %v6617_v56  ;;  %v8376_v22 = vld [vmem:[#allocation12 + $0x604] sm:$0xf]  ;;  %v6553_v53 = vor.u32 %v8312_v12, %v6550_v13 }
 0x1d0   : > { %4655 = vmatpush.bf16.msrb.mxu3 %v6873_v41  ;;  %v6806_v46 = vld [vmem:[#allocation12 + $0x620] sm:$0xf0] }
 0x1d1   : > { %v8624_v62 = vld [vmem:[#allocation12 + $0xdc4] sm:$0xf]  ;;  %4618 = vmatpush.bf16.msrb.mxu0 %v6041_v59  ;;  %4631 = vmatpush.bf16.msrb.mxu1 %v6297_v61  ;;  %v6809_v19 = vor.u32 %v8376_v22, %v6806_v46 }
 0x1d2   : > { %v7798_v39 = vld [vmem:[#allocation12 + $0xde0] sm:$0xf0] }
 0x1d3   : > { %v8688_v14 = vld [vmem:[#allocation12 + $0xfc4] sm:$0xf]  ;;  %4643 = vmatpush.bf16.msrb.mxu2 %v6585_v6  ;;  %v7801_v24 = vor.u32 %v8624_v62, %v7798_v39 }
 0x1d4   : > { %v8054_v15 = vld [vmem:[#allocation12 + $0xfe0] sm:$0xf0]  ;;  %4656 = vmatpush.bf16.msrb.mxu3 %v6841_v7  ;;  %4619 = vmatmul.bf16.vlgmr.msrb.gmra.mxu0 %v9704_v29 }
 0x1d5   : > { %4663 = vmatpush.bf16.msra.mxu0 %v7289_v63  ;;  %4676 = vmatpush.bf16.msra.mxu1 %v7545_v4  ;;  %v8480_v16 = vld [vmem:[#allocation12 + $0x944] sm:$0xf]  ;;  %v8057_v25 = vor.u32 %v8688_v14, %v8054_v15 }
 0x1d6   : > { %v7222_v21 = vld [vmem:[#allocation12 + $0x960] sm:$0xf0]  ;;  %4632 = vmatmul.bf16.vlgmr.msrb.gmra.mxu1 %v9706_v0 }
 0x1d7   : > { %v8544_v42 = vld [vmem:[#allocation12 + $0xb44] sm:$0xf]  ;;  %v7225_v32 = vor.u32 %v8480_v16, %v7222_v21  ;;  %4644 = vmatpush.bf16.msrb.mxu2 %v6553_v53 }
 0x1d8   : > { %v7478_v23 = vld [vmem:[#allocation12 + $0xb60] sm:$0xf0]  ;;  %4657 = vmatpush.bf16.msrb.mxu3 %v6809_v19 }
 0x1d9   : > { %v8616_v17 = vld [vmem:[#allocation12 + $0xd84] sm:$0xf]  ;;  %4664 = vmatpush.bf16.msra.mxu0 %v7257_v11  ;;  %4677 = vmatpush.bf16.msra.mxu1 %v7513_v45  ;;  %v7481_v30 = vor.u32 %v8544_v42, %v7478_v23 }
 0x1da   : > { %v7766_v60 = vld [vmem:[#allocation12 + $0xda0] sm:$0xf0]  ;;  %4645 = vmatmul.bf16.vlgmr.msrb.gmra.mxu2 %v9711_v26 }
 0x1db   : > { %v8680_v49 = vld [vmem:[#allocation12 + $0xf84] sm:$0xf]  ;;  %4689 = vmatpush.bf16.msra.mxu2 %v7801_v24  ;;  %v7769_v38 = vor.u32 %v8616_v17, %v7766_v60  ;;  %4658 = vmatmul.bf16.vlgmr.msrb.gmra.mxu3 %v9713_v27 }
 0x1dc   : > { %v8022_v20 = vld [vmem:[#allocation12 + $0xfa0] sm:$0xf0]  ;;  %4702 = vmatpush.bf16.msra.mxu3 %v8057_v25 }
 0x1dd   : > { %v8472_v34 = vld [vmem:[#allocation12 + $0x904] sm:$0xf]  ;;  %v8025_v43 = vor.u32 %v8680_v49, %v8022_v20  ;;  %4665 = vmatpush.bf16.msra.mxu0 %v7225_v32  ;;  %4678 = vmatpush.bf16.msra.mxu1 %v7481_v30  ;;  %v6268_v49 = vld [vmem:[#allocation12 + $0x1c8] sm:$0xf] }
 0x1de   : > { %v7190_v36 = vld [vmem:[#allocation12 + $0x920] sm:$0xf0]  ;;  %v8245_v20 = vld [vmem:[#allocation12 + $0x1e4] sm:$0xf0] }
 0x1df   : > { %v8536_v50 = vld [vmem:[#allocation12 + $0xb04] sm:$0xf]  ;;  %v7193_v28 = vor.u32 %v8472_v34, %v7190_v36  ;;  %4690 = vmatpush.bf16.msra.mxu2 %v7769_v38  ;;  %v6524_v34 = vld [vmem:[#allocation12 + $0x3c8] sm:$0xf] }
 0x1e0   : > { %v7446_v3 = vld [vmem:[#allocation12 + $0xb20] sm:$0xf0]  ;;  %4703 = vmatpush.bf16.msra.mxu3 %v8025_v43  ;;  %v8309_v36 = vld [vmem:[#allocation12 + $0x3e4] sm:$0xf0] }
 0x1e1   : > { %v8608_v44 = vld [vmem:[#allocation12 + $0xd44] sm:$0xf]  ;;  %v7449_v51 = vor.u32 %v8536_v50, %v7446_v3  ;;  %4666 = vmatpush.bf16.msra.mxu0 %v7193_v28  ;;  %v6236_v28 = vld [vmem:[#allocation12 + $0x188] sm:$0xf] }
 0x1e2   : > { %v7734_v47 = vld [vmem:[#allocation12 + $0xd60] sm:$0xf0] }
 0x1e3   : > { %v8672_v48 = vld [vmem:[#allocation12 + $0xf44] sm:$0xf]  ;;  %v7737_v9 = vor.u32 %v8608_v44, %v7734_v47  ;;  %4679 = vmatpush.bf16.msra.mxu1 %v7449_v51  ;;  %v8237_v51 = vld [vmem:[#allocation12 + $0x1a4] sm:$0xf0] }
 0x1e4   : > { %v7990_v40 = vld [vmem:[#allocation12 + $0xf60] sm:$0xf0] }
 0x1e5   : > { %v8464_v33 = vld [vmem:[#allocation12 + $0x8c4] sm:$0xf]  ;;  %v7993_v31 = vor.u32 %v8672_v48, %v7990_v40  ;;  %4691 = vmatpush.bf16.msra.mxu2 %v7737_v9  ;;  %v6269_v48 = vor.u32 %v8245_v20, %v6268_v49  ;;  %v6525_v40 = vor.u32 %v8309_v36, %v6524_v34  ;;  %v6140_v49 = vld [vmem:[#allocation12 + $0xc8] sm:$0xf] }
 0x1e6   : > { %v7158_v37 = vld [vmem:[#allocation12 + $0x8e0] sm:$0xf0]  ;;  %v8213_v20 = vld [vmem:[#allocation12 + $0xe4] sm:$0xf0] }
 0x1e7   : > { %v8528_v56 = vld [vmem:[#allocation12 + $0xac4] sm:$0xf]  ;;  %v7161_v59 = vor.u32 %v8464_v33, %v7158_v37  ;;  %4704 = vmatpush.bf16.msra.mxu3 %v7993_v31  ;;  %v6492_v33 = vld [vmem:[#allocation12 + $0x388] sm:$0xf] }
 0x1e8   : > { %v7414_v41 = vld [vmem:[#allocation12 + $0xae0] sm:$0xf0]  ;;  %v6396_v34 = vld [vmem:[#allocation12 + $0x2c8] sm:$0xf] }
 0x1e9   : > { %v8600_v52 = vld [vmem:[#allocation12 + $0xd04] sm:$0xf]  ;;  %v7417_v61 = vor.u32 %v8528_v56, %v7414_v41  ;;  %4667 = vmatpush.bf16.msra.mxu0 %v7161_v59  ;;  %v8301_v41 = vld [vmem:[#allocation12 + $0x3a4] sm:$0xf0] }
 0x1ea   : > { %v7702_v54 = vld [vmem:[#allocation12 + $0xd20] sm:$0xf0]  ;;  %v7036_v59 = vld [vmem:[#allocation12 + $0x7c8] sm:$0xf] }
 0x1eb   : > { %v8664_v10 = vld [vmem:[#allocation12 + $0xf04] sm:$0xf]  ;;  %v7705_v5 = vor.u32 %v8600_v52, %v7702_v54  ;;  %4680 = vmatpush.bf16.msra.mxu1 %v7417_v61  ;;  %v8437_v61 = vld [vmem:[#allocation12 + $0x7e4] sm:$0xf0] }
 0x1ec   : > { %v7958_v57 = vld [vmem:[#allocation12 + $0xf20] sm:$0xf0]  ;;  %v8277_v36 = vld [vmem:[#allocation12 + $0x2e4] sm:$0xf0] }
 0x1ed   : > { %v8456_v63 = vld [vmem:[#allocation12 + $0x884] sm:$0xf]  ;;  %v7961_v6 = vor.u32 %v8664_v10, %v7958_v57  ;;  %4692 = vmatpush.bf16.msra.mxu2 %v7705_v5  ;;  %v6780_v10 = vld [vmem:[#allocation12 + $0x5c8] sm:$0xf] }
 0x1ee   : > { %v7126_v4 = vld [vmem:[#allocation12 + $0x8a0] sm:$0xf0]  ;;  %v8373_v57 = vld [vmem:[#allocation12 + $0x5e4] sm:$0xf0] }
 0x1ef   : > { %v8520_v1 = vld [vmem:[#allocation12 + $0xa84] sm:$0xf]  ;;  %v7129_v22 = vor.u32 %v8456_v63, %v7126_v4  ;;  %4705 = vmatpush.bf16.msra.mxu3 %v7961_v6  ;;  %v6237_v63 = vor.u32 %v8237_v51, %v6236_v28  ;;  %v6493_v4 = vor.u32 %v8301_v41, %v6492_v33  ;;  %v6204_v5 = vld [vmem:[#allocation12 + $0x148] sm:$0xf] }
 0x1f0   : > { %v7382_v58 = vld [vmem:[#allocation12 + $0xaa0] sm:$0xf0]  ;;  %v8229_v6 = vld [vmem:[#allocation12 + $0x164] sm:$0xf0] }
 0x1f1   : > { %v8592_v7 = vld [vmem:[#allocation12 + $0xcc4] sm:$0xf]  ;;  %v7385_v46 = vor.u32 %v8520_v1, %v7382_v58  ;;  %4668 = vmatpush.bf16.msra.mxu0 %v7129_v22  ;;  %v6748_v22 = vld [vmem:[#allocation12 + $0x588] sm:$0xf] }
 0x1f2   : > { %v7670_v8 = vld [vmem:[#allocation12 + $0xce0] sm:$0xf0]  ;;  %v6364_v33 = vld [vmem:[#allocation12 + $0x288] sm:$0xf] }
 0x1f3   : > { %v8656_v12 = vld [vmem:[#allocation12 + $0xec4] sm:$0xf]  ;;  %v7673_v11 = vor.u32 %v8592_v7, %v7670_v8  ;;  %4681 = vmatpush.bf16.msra.mxu1 %v7385_v46  ;;  %v6781_v7 = vor.u32 %v8373_v57, %v6780_v10  ;;  %v7037_v8 = vor.u32 %v8437_v61, %v7036_v59  ;;  %v8365_v46 = vld [vmem:[#allocation12 + $0x5a4] sm:$0xf0] }
 0x1f4   : > { %v7926_v13 = vld [vmem:[#allocation12 + $0xee0] sm:$0xf0]  ;;  %v8341_v41 = vld [vmem:[#allocation12 + $0x4e4] sm:$0xf0] }
 0x1f5   : > { %v8448_v62 = vld [vmem:[#allocation12 + $0x844] sm:$0xf]  ;;  %v7929_v45 = vor.u32 %v8656_v12, %v7926_v13  ;;  %4693 = vmatpush.bf16.msra.mxu2 %v7673_v11  ;;  %v6460_v12 = vld [vmem:[#allocation12 + $0x348] sm:$0xf] }
 0x1f6   : > { %v7094_v39 = vld [vmem:[#allocation12 + $0x860] sm:$0xf0]  ;;  %v8293_v13 = vld [vmem:[#allocation12 + $0x364] sm:$0xf0] }
 0x1f7   : > { %v8512_v14 = vld [vmem:[#allocation12 + $0xa44] sm:$0xf]  ;;  %v7097_v42 = vor.u32 %v8448_v62, %v7094_v39  ;;  %4706 = vmatpush.bf16.msra.mxu3 %v7929_v45  ;;  %v7004_v62 = vld [vmem:[#allocation12 + $0x788] sm:$0xf] }
 0x1f8   : > { %v7350_v15 = vld [vmem:[#allocation12 + $0xa60] sm:$0xf0]  ;;  %v8429_v39 = vld [vmem:[#allocation12 + $0x7a4] sm:$0xf0] }
 0x1f9   : > { %v8584_v16 = vld [vmem:[#allocation12 + $0xc84] sm:$0xf]  ;;  %v7353_v23 = vor.u32 %v8512_v14, %v7350_v15  ;;  %4669 = vmatpush.bf16.msra.mxu0 %v7097_v42  ;;  %v6205_v14 = vor.u32 %v8229_v6, %v6204_v5  ;;  %v6461_v15 = vor.u32 %v8293_v13, %v6460_v12  ;;  %v6172_v11 = vld [vmem:[#allocation12 + $0x108] sm:$0xf] }
 0x1fa   : > { %v7638_v53 = vld [vmem:[#allocation12 + $0xca0] sm:$0xf0]  ;;  %v8221_v45 = vld [vmem:[#allocation12 + $0x124] sm:$0xf0] }
 0x1fb   : > { %v8648_v19 = vld [vmem:[#allocation12 + $0xe84] sm:$0xf]  ;;  %v7641_v32 = vor.u32 %v8584_v16, %v7638_v53  ;;  %4682 = vmatpush.bf16.msra.mxu1 %v7353_v23  ;;  %v6749_v16 = vor.u32 %v8365_v46, %v6748_v22  ;;  %v7005_v53 = vor.u32 %v8429_v39, %v7004_v62  ;;  %v6716_v42 = vld [vmem:[#allocation12 + $0x548] sm:$0xf] }
 0x1fc   : > { %v7894_v21 = vld [vmem:[#allocation12 + $0xea0] sm:$0xf0]  ;;  %v8357_v23 = vld [vmem:[#allocation12 + $0x564] sm:$0xf0] }
 0x1fd   : > { %v8440_v24 = vld [vmem:[#allocation12 + $0x804] sm:$0xf]  ;;  %v7897_v30 = vor.u32 %v8648_v19, %v7894_v21  ;;  %4694 = vmatpush.bf16.msra.mxu2 %v7641_v32  ;;  %v6428_v19 = vld [vmem:[#allocation12 + $0x308] sm:$0xf]  ;;  %v6717_v32 = vor.u32 %v8357_v23, %v6716_v42 }
 0x1fe   : > { %v7062_v25 = vld [vmem:[#allocation12 + $0x820] sm:$0xf0]  ;;  %v8285_v21 = vld [vmem:[#allocation12 + $0x324] sm:$0xf0] }
 0x1ff   : > { %v8504_v17 = vld [vmem:[#allocation12 + $0xa04] sm:$0xf]  ;;  %v7065_v44 = vor.u32 %v8440_v24, %v7062_v25  ;;  %4707 = vmatpush.bf16.msra.mxu3 %v7897_v30  ;;  %v6972_v24 = vld [vmem:[#allocation12 + $0x748] sm:$0xf] }
 0x200   : > { %v7318_v60 = vld [vmem:[#allocation12 + $0xa20] sm:$0xf0]  ;;  %v8421_v25 = vld [vmem:[#allocation12 + $0x764] sm:$0xf0] }
 0x201   : > { %v8576_v50 = vld [vmem:[#allocation12 + $0xc44] sm:$0xf]  ;;  %v7321_v47 = vor.u32 %v8504_v17, %v7318_v60  ;;  %4670 = vmatpush.bf16.msra.mxu0 %v7065_v44  ;;  %v6173_v17 = vor.u32 %v8221_v45, %v6172_v11  ;;  %v6429_v60 = vor.u32 %v8285_v21, %v6428_v19  ;;  %v6973_v30 = vor.u32 %v8421_v25, %v6972_v24  ;;  %v6076_v10 = vld [vmem:[#allocation12 + $0x48] sm:$0xf] }
 0x202   : > { %v7606_v3 = vld [vmem:[#allocation12 + $0xc60] sm:$0xf0]  ;;  %v6141_v44 = vor.u32 %v8213_v20, %v6140_v49  ;;  %v8197_v57 = vld [vmem:[#allocation12 + $0x64] sm:$0xf0] }
 0x203   : > { %v8640_v38 = vld [vmem:[#allocation12 + $0xe44] sm:$0xf]  ;;  %v7609_v37 = vor.u32 %v8576_v50, %v7606_v3  ;;  %4683 = vmatpush.bf16.msra.mxu1 %v7321_v47  ;;  %v6684_v50 = vld [vmem:[#allocation12 + $0x508] sm:$0xf]  ;;  %v6397_v47 = vor.u32 %v8277_v36, %v6396_v34 }
 0x204   : > { %v7862_v43 = vld [vmem:[#allocation12 + $0xe60] sm:$0xf0]  ;;  %4671 = vmatmul.bf16.vlgmr.msra.gmra.mxu0 %v9720_v2  ;;  %v8349_v3 = vld [vmem:[#allocation12 + $0x524] sm:$0xf0] }
 0x205   : > { %v7865_v56 = vor.u32 %v8640_v38, %v7862_v43  ;;  %v8568_v9 = vld [vmem:[#allocation12 + $0xc04] sm:$0xf]  ;;  %4715 = vmatpush.bf16.msrb.mxu0 %v6269_v48  ;;  %4695 = vmatpush.bf16.msra.mxu2 %v7609_v37  ;;  %v6940_v38 = vld [vmem:[#allocation12 + $0x708] sm:$0xf]  ;;  %v6685_v28 = vor.u32 %v8349_v3, %v6684_v50 }
 0x206   : > { %v7574_v31 = vld [vmem:[#allocation12 + $0xc20] sm:$0xf0]  ;;  %4684 = vmatmul.bf16.vlgmr.msra.gmra.mxu1 %v9722_v55  ;;  %v8413_v43 = vld [vmem:[#allocation12 + $0x724] sm:$0xf0] }
 0x207   : > { %v8632_v52 = vld [vmem:[#allocation12 + $0xe04] sm:$0xf]  ;;  %4728 = vmatpush.bf16.msrb.mxu1 %v6525_v40  ;;  %4708 = vmatpush.bf16.msra.mxu3 %v7865_v56  ;;  %v7577_v1 = vor.u32 %v8568_v9, %v7574_v31  ;;  %v6108_v48 = vld [vmem:[#allocation12 + $0x88] sm:$0xf]  ;;  %v6941_v51 = vor.u32 %v8413_v43, %v6940_v38 }
 0x208   : > { %v7830_v54 = vld [vmem:[#allocation12 + $0xe20] sm:$0xf0]  ;;  %v8205_v40 = vld [vmem:[#allocation12 + $0xa4] sm:$0xf0] }
 0x209   : > { %v7833_v58 = vor.u32 %v8632_v52, %v7830_v54  ;;  %4716 = vmatpush.bf16.msrb.mxu0 %v6237_v63  ;;  %4696 = vmatpush.bf16.msra.mxu2 %v7577_v1  ;;  %v8269_v37 = vld [vmem:[#allocation12 + $0x2a4] sm:$0xf0]  ;;  %v6109_v52 = vor.u32 %v8205_v40, %v6108_v48 }
 0x20a   : > { %v6652_v56 = vld [vmem:[#allocation12 + $0x4c8] sm:$0xf]  ;;  %v6365_v54 = vor.u32 %v8269_v37, %v6364_v33 }
 0x20b   : > { %4729 = vmatpush.bf16.msrb.mxu1 %v6493_v4  ;;  %4709 = vmatpush.bf16.msra.mxu3 %v7833_v58  ;;  %v6908_v9 = vld [vmem:[#allocation12 + $0x6c8] sm:$0xf]  ;;  %v6653_v59 = vor.u32 %v8341_v41, %v6652_v56 }
 0x20c   : > { %4697 = vmatmul.bf16.vlgmr.msra.gmra.mxu2 %v9726_v35  ;;  %v8405_v31 = vld [vmem:[#allocation12 + $0x6e4] sm:$0xf0] }
 0x20d   : > { %4741 = vmatpush.bf16.msrb.mxu2 %v6781_v7  ;;  %4717 = vmatpush.bf16.msrb.mxu0 %v6205_v14  ;;  %v6909_v61 = vor.u32 %v8405_v31, %v6908_v9  ;;  %v6332_v63 = vld [vmem:[#allocation12 + $0x248] sm:$0xf]  ;;  %v6077_v7 = vor.u32 %v8197_v57, %v6076_v10 }
 0x20e   : > { %4710 = vmatmul.bf16.vlgmr.msra.gmra.mxu3 %v9728_v18  ;;  %v8261_v4 = vld [vmem:[#allocation12 + $0x264] sm:$0xf0] }
 0x20f   : > { %4754 = vmatpush.bf16.msrb.mxu3 %v7037_v8  ;;  %4730 = vmatpush.bf16.msrb.mxu1 %v6461_v15  ;;  %v6620_v1 = vld [vmem:[#allocation12 + $0x488] sm:$0xf]  ;;  %v6333_v8 = vor.u32 %v8261_v4, %v6332_v63 }
 0x210   : > { %v8333_v58 = vld [vmem:[#allocation12 + $0x4a4] sm:$0xf0] }
 0x211   : > { %4742 = vmatpush.bf16.msrb.mxu2 %v6749_v16  ;;  %4718 = vmatpush.bf16.msrb.mxu0 %v6173_v17  ;;  %v6876_v5 = vld [vmem:[#allocation12 + $0x688] sm:$0xf]  ;;  %v6621_v46 = vor.u32 %v8333_v58, %v6620_v1 }
 0x212   : > { %v8397_v6 = vld [vmem:[#allocation12 + $0x6a4] sm:$0xf0] }
 0x213   : > { %4755 = vmatpush.bf16.msrb.mxu3 %v7005_v53  ;;  %4731 = vmatpush.bf16.msrb.mxu1 %v6429_v60  ;;  %v6044_v12 = vld [vmem:[#allocation12 + $0x8] sm:$0xf]  ;;  %v6877_v62 = vor.u32 %v8397_v6, %v6876_v5 }
 0x214   : > { %v8189_v13 = vld [vmem:[#allocation12 + $0x24] sm:$0xf0] }
 0x215   : > { %4743 = vmatpush.bf16.msrb.mxu2 %v6717_v32  ;;  %4719 = vmatpush.bf16.msrb.mxu0 %v6141_v44  ;;  %v6300_v22 = vld [vmem:[#allocation12 + $0x208] sm:$0xf]  ;;  %v6045_v42 = vor.u32 %v8189_v13, %v6044_v12 }
 0x216   : > { %v8253_v39 = vld [vmem:[#allocation12 + $0x224] sm:$0xf0] }
 0x217   : > { %4756 = vmatpush.bf16.msrb.mxu3 %v6973_v30  ;;  %4732 = vmatpush.bf16.msrb.mxu1 %v6397_v47  ;;  %v7292_v14 = vld [vmem:[#allocation12 + $0x9c8] sm:$0xf]  ;;  %v6301_v23 = vor.u32 %v8253_v39, %v6300_v22 }
 0x218   : > { %v8501_v15 = vld [vmem:[#allocation12 + $0x9e4] sm:$0xf0] }
 0x219   : > { %4744 = vmatpush.bf16.msrb.mxu2 %v6685_v28  ;;  %4720 = vmatpush.bf16.msrb.mxu0 %v6109_v52  ;;  %v7548_v11 = vld [vmem:[#allocation12 + $0xbc8] sm:$0xf]  ;;  %v7293_v24 = vor.u32 %v8501_v15, %v7292_v14 }
 0x21a   : > { %v8565_v45 = vld [vmem:[#allocation12 + $0xbe4] sm:$0xf0] }
 0x21b   : > { %4757 = vmatpush.bf16.msrb.mxu3 %v6941_v51  ;;  %4733 = vmatpush.bf16.msrb.mxu1 %v6365_v54  ;;  %v6588_v16 = vld [vmem:[#allocation12 + $0x448] sm:$0xf]  ;;  %v7549_v25 = vor.u32 %v8565_v45, %v7548_v11 }
 0x21c   : > { %v8325_v53 = vld [vmem:[#allocation12 + $0x464] sm:$0xf0] }
 0x21d   : > { %4745 = vmatpush.bf16.msrb.mxu2 %v6653_v59  ;;  %v6844_v19 = vld [vmem:[#allocation12 + $0x648] sm:$0xf]  ;;  %4721 = vmatpush.bf16.msrb.mxu0 %v6077_v7  ;;  %v6589_v20 = vor.u32 %v8325_v53, %v6588_v16 }
 0x21e   : > { %v8389_v21 = vld [vmem:[#allocation12 + $0x664] sm:$0xf0] }
 0x21f   : > { %4758 = vmatpush.bf16.msrb.mxu3 %v6909_v61  ;;  %4734 = vmatpush.bf16.msrb.mxu1 %v6333_v8  ;;  %v7260_v17 = vld [vmem:[#allocation12 + $0x988] sm:$0xf]  ;;  %v6845_v32 = vor.u32 %v8389_v21, %v6844_v19 }
 0x220   : > { %v8493_v60 = vld [vmem:[#allocation12 + $0x9a4] sm:$0xf0] }
 0x221   : > { %4746 = vmatpush.bf16.msrb.mxu2 %v6621_v46  ;;  %v7516_v49 = vld [vmem:[#allocation12 + $0xb88] sm:$0xf]  ;;  %4722 = vmatpush.bf16.msrb.mxu0 %v6045_v42  ;;  %v7261_v48 = vor.u32 %v8493_v60, %v7260_v17 }
 0x222   : > { %v8557_v30 = vld [vmem:[#allocation12 + $0xba4] sm:$0xf0] }
 0x223   : > { %4759 = vmatpush.bf16.msrb.mxu3 %v6877_v62  ;;  %v6556_v34 = vld [vmem:[#allocation12 + $0x408] sm:$0xf]  ;;  %4735 = vmatpush.bf16.msrb.mxu1 %v6301_v23  ;;  %v7517_v40 = vor.u32 %v8557_v30, %v7516_v49 }
 0x224   : > { %v8317_v36 = vld [vmem:[#allocation12 + $0x424] sm:$0xf0]  ;;  %4723 = vmatmul.bf16.vlgmr.msrb.gmra.mxu0 %v9704_v29 }
 0x225   : > { %v6812_v50 = vld [vmem:[#allocation12 + $0x608] sm:$0xf]  ;;  %4767 = vmatpush.bf16.msra.mxu0 %v7293_v24  ;;  %4747 = vmatpush.bf16.msrb.mxu2 %v6589_v20  ;;  %v6557_v28 = vor.u32 %v8317_v36, %v6556_v34 }
 0x226   : > { %v8381_v3 = vld [vmem:[#allocation12 + $0x624] sm:$0xf0]  ;;  %4736 = vmatmul.bf16.vlgmr.msrb.gmra.mxu1 %v9706_v0 }
 0x227   : > { %v7804_v38 = vld [vmem:[#allocation12 + $0xdc8] sm:$0xf]  ;;  %4780 = vmatpush.bf16.msra.mxu1 %v7549_v25  ;;  %4760 = vmatpush.bf16.msrb.mxu3 %v6845_v32  ;;  %v6813_v51 = vor.u32 %v8381_v3, %v6812_v50 }
 0x228   : > { %v8629_v43 = vld [vmem:[#allocation12 + $0xde4] sm:$0xf0] }
 0x229   : > { %v8060_v44 = vld [vmem:[#allocation12 + $0xfc8] sm:$0xf]  ;;  %v7805_v56 = vor.u32 %v8629_v43, %v7804_v38  ;;  %4768 = vmatpush.bf16.msra.mxu0 %v7261_v48  ;;  %4748 = vmatpush.bf16.msrb.mxu2 %v6557_v28 }
 0x22a   : > { %v8693_v47 = vld [vmem:[#allocation12 + $0xfe4] sm:$0xf0] }
 0x22b   : > { %v7228_v33 = vld [vmem:[#allocation12 + $0x948] sm:$0xf]  ;;  %v8061_v41 = vor.u32 %v8693_v47, %v8060_v44  ;;  %4781 = vmatpush.bf16.msra.mxu1 %v7517_v40  ;;  %4761 = vmatpush.bf16.msrb.mxu3 %v6813_v51 }
 0x22c   : > { %v8485_v37 = vld [vmem:[#allocation12 + $0x964] sm:$0xf0]  ;;  %4749 = vmatmul.bf16.vlgmr.msrb.gmra.mxu2 %v9711_v26 }
 0x22d   : > { %v7484_v9 = vld [vmem:[#allocation12 + $0xb48] sm:$0xf]  ;;  %v7229_v59 = vor.u32 %v8485_v37, %v7228_v33  ;;  %4793 = vmatpush.bf16.msra.mxu2 %v7805_v56 }
 0x22e   : > { %v8549_v31 = vld [vmem:[#allocation12 + $0xb64] sm:$0xf0]  ;;  %4762 = vmatmul.bf16.vlgmr.msrb.gmra.mxu3 %v9713_v27 }
 0x22f   : > { %v7772_v52 = vld [vmem:[#allocation12 + $0xd88] sm:$0xf]  ;;  %v7485_v61 = vor.u32 %v8549_v31, %v7484_v9  ;;  %4806 = vmatpush.bf16.msra.mxu3 %v8061_v41  ;;  %4769 = vmatpush.bf16.msra.mxu0 %v7229_v59  ;;  %v8241_v59 = vld [vmem:[#allocation12 + $0x1cc] sm:$0xf] }
 0x230   : > { %v8621_v54 = vld [vmem:[#allocation12 + $0xda4] sm:$0xf0] }
 0x231   : > { %v8028_v10 = vld [vmem:[#allocation12 + $0xf88] sm:$0xf]  ;;  %v7773_v1 = vor.u32 %v8621_v54, %v7772_v52  ;;  %4782 = vmatpush.bf16.msra.mxu1 %v7485_v61  ;;  %v6270_v61 = vld [vmem:[#allocation12 + $0x1e8] sm:$0xf0] }
 0x232   : > { %v8685_v57 = vld [vmem:[#allocation12 + $0xfa4] sm:$0xf0] }
 0x233   : > { %v7196_v63 = vld [vmem:[#allocation12 + $0x908] sm:$0xf]  ;;  %v8029_v58 = vor.u32 %v8685_v57, %v8028_v10  ;;  %4794 = vmatpush.bf16.msra.mxu2 %v7773_v1 }
 0x234   : > { %v8477_v4 = vld [vmem:[#allocation12 + $0x924] sm:$0xf0] }
 0x235   : > { %v7452_v5 = vld [vmem:[#allocation12 + $0xb08] sm:$0xf]  ;;  %v7197_v22 = vor.u32 %v8477_v4, %v7196_v63  ;;  %4807 = vmatpush.bf16.msra.mxu3 %v8029_v58  ;;  %v8305_v63 = vld [vmem:[#allocation12 + $0x3cc] sm:$0xf] }
 0x236   : > { %v8541_v6 = vld [vmem:[#allocation12 + $0xb24] sm:$0xf0]  ;;  %v6526_v4 = vld [vmem:[#allocation12 + $0x3e8] sm:$0xf0] }
 0x237   : > { %v7740_v7 = vld [vmem:[#allocation12 + $0xd48] sm:$0xf]  ;;  %v7453_v46 = vor.u32 %v8541_v6, %v7452_v5  ;;  %4770 = vmatpush.bf16.msra.mxu0 %v7197_v22  ;;  %v6529_v22 = vor.u32 %v8305_v63, %v6526_v4 }
 0x238   : > { %v8613_v8 = vld [vmem:[#allocation12 + $0xd64] sm:$0xf0] }
 0x239   : > { %v7996_v12 = vld [vmem:[#allocation12 + $0xf48] sm:$0xf]  ;;  %v7741_v14 = vor.u32 %v8613_v8, %v7740_v7  ;;  %4783 = vmatpush.bf16.msra.mxu1 %v7453_v46  ;;  %v6238_v46 = vld [vmem:[#allocation12 + $0x1a8] sm:$0xf0] }
 0x23a   : > { %v8677_v13 = vld [vmem:[#allocation12 + $0xf64] sm:$0xf0] }
 0x23b   : > { %v7164_v62 = vld [vmem:[#allocation12 + $0x8c8] sm:$0xf]  ;;  %v7997_v15 = vor.u32 %v8677_v13, %v7996_v12  ;;  %4795 = vmatpush.bf16.msra.mxu2 %v7741_v14  ;;  %v8233_v12 = vld [vmem:[#allocation12 + $0x18c] sm:$0xf]  ;;  %v6273_v13 = vor.u32 %v8241_v59, %v6270_v61 }
 0x23c   : > { %v8469_v39 = vld [vmem:[#allocation12 + $0x8e4] sm:$0xf0]  ;;  %v6974_v59 = vld [vmem:[#allocation12 + $0x768] sm:$0xf0] }
 0x23d   : > { %v7420_v11 = vld [vmem:[#allocation12 + $0xac8] sm:$0xf]  ;;  %v7165_v42 = vor.u32 %v8469_v39, %v7164_v62  ;;  %4808 = vmatpush.bf16.msra.mxu3 %v7997_v15  ;;  %v8297_v62 = vld [vmem:[#allocation12 + $0x38c] sm:$0xf] }
 0x23e   : > { %v8533_v45 = vld [vmem:[#allocation12 + $0xae4] sm:$0xf0]  ;;  %v6494_v39 = vld [vmem:[#allocation12 + $0x3a8] sm:$0xf0] }
 0x23f   : > { %v7708_v16 = vld [vmem:[#allocation12 + $0xd08] sm:$0xf]  ;;  %v7421_v23 = vor.u32 %v8533_v45, %v7420_v11  ;;  %4771 = vmatpush.bf16.msra.mxu0 %v7165_v42  ;;  %v8433_v42 = vld [vmem:[#allocation12 + $0x7cc] sm:$0xf] }
 0x240   : > { %v8605_v53 = vld [vmem:[#allocation12 + $0xd24] sm:$0xf0] }
 0x241   : > { %v7964_v19 = vld [vmem:[#allocation12 + $0xf08] sm:$0xf]  ;;  %v7709_v17 = vor.u32 %v8605_v53, %v7708_v16  ;;  %4784 = vmatpush.bf16.msra.mxu1 %v7421_v23  ;;  %v7038_v23 = vld [vmem:[#allocation12 + $0x7e8] sm:$0xf0] }
 0x242   : > { %v8669_v21 = vld [vmem:[#allocation12 + $0xf24] sm:$0xf0] }
 0x243   : > { %v7132_v24 = vld [vmem:[#allocation12 + $0x888] sm:$0xf]  ;;  %v7965_v60 = vor.u32 %v8669_v21, %v7964_v19  ;;  %4796 = vmatpush.bf16.msra.mxu2 %v7709_v17  ;;  %v8369_v19 = vld [vmem:[#allocation12 + $0x5cc] sm:$0xf]  ;;  %v6497_v17 = vor.u32 %v8297_v62, %v6494_v39 }
 0x244   : > { %v8461_v25 = vld [vmem:[#allocation12 + $0x8a4] sm:$0xf0]  ;;  %v6782_v21 = vld [vmem:[#allocation12 + $0x5e8] sm:$0xf0] }
 0x245   : > { %v7388_v49 = vld [vmem:[#allocation12 + $0xa88] sm:$0xf]  ;;  %v7133_v50 = vor.u32 %v8461_v25, %v7132_v24  ;;  %4809 = vmatpush.bf16.msra.mxu3 %v7965_v60  ;;  %v9744_v24 = vld [vmem:[#allocation14] sm:$0xff]  ;;  %v6241_v25 = vor.u32 %v8233_v12, %v6238_v46  ;;  %v8345_v12 = vld [vmem:[#allocation12 + $0x50c] sm:$0xf] }
 0x246   : > { %v8525_v20 = vld [vmem:[#allocation12 + $0xaa4] sm:$0xf0]  ;;  %v6942_v46 = vld [vmem:[#allocation12 + $0x728] sm:$0xf0] }
 0x247   : > { %v7676_v32 = vld [vmem:[#allocation12 + $0xcc8] sm:$0xf]  ;;  %v7389_v3 = vor.u32 %v8525_v20, %v7388_v49  ;;  %4772 = vmatpush.bf16.msra.mxu0 %v7133_v50  ;;  %v8225_v20 = vld [vmem:[#allocation12 + $0x14c] sm:$0xf] }
 0x248   : > { %v8597_v30 = vld [vmem:[#allocation12 + $0xce4] sm:$0xf0]  ;;  %v6462_v50 = vld [vmem:[#allocation12 + $0x368] sm:$0xf0] }
 0x249   : > { %v7932_v34 = vld [vmem:[#allocation12 + $0xec8] sm:$0xf]  ;;  %v7677_v44 = vor.u32 %v8597_v30, %v7676_v32  ;;  %4785 = vmatpush.bf16.msra.mxu1 %v7389_v3  ;;  %v6206_v32 = vld [vmem:[#allocation12 + $0x168] sm:$0xf0]  ;;  %v4491_v3 = vperm.slane %v9744_v24, 0 }
 0x24a   : > { %v8661_v36 = vld [vmem:[#allocation12 + $0xee4] sm:$0xf0]  ;;  %v8289_v30 = vld [vmem:[#allocation12 + $0x34c] sm:$0xf] }
 0x24b   : > { %v7100_v38 = vld [vmem:[#allocation12 + $0x848] sm:$0xf]  ;;  %v7933_v47 = vor.u32 %v8661_v36, %v7932_v34  ;;  %4797 = vmatpush.bf16.msra.mxu2 %v7677_v44  ;;  %v6785_v34 = vor.u32 %v8369_v19, %v6782_v21  ;;  %v7041_v36 = vor.u32 %v8433_v42, %v7038_v23  ;;  %v8425_v44 = vld [vmem:[#allocation12 + $0x78c] sm:$0xf] }
 0x24c   : > { %v8453_v43 = vld [vmem:[#allocation12 + $0x864] sm:$0xf0]  ;;  %v8265_v19 = vld [vmem:[#allocation12 + $0x28c] sm:$0xf] }
 0x24d   : > { %v7356_v48 = vld [vmem:[#allocation12 + $0xa48] sm:$0xf]  ;;  %v7101_v56 = vor.u32 %v8453_v43, %v7100_v38  ;;  %4810 = vmatpush.bf16.msra.mxu3 %v7933_v47  ;;  %v8361_v38 = vld [vmem:[#allocation12 + $0x58c] sm:$0xf] }
 0x24e   : > { %v8517_v40 = vld [vmem:[#allocation12 + $0xa64] sm:$0xf0]  ;;  %v6750_v43 = vld [vmem:[#allocation12 + $0x5a8] sm:$0xf0] }
 0x24f   : > { %v7644_v28 = vld [vmem:[#allocation12 + $0xc88] sm:$0xf]  ;;  %v7357_v41 = vor.u32 %v8517_v40, %v7356_v48  ;;  %4773 = vmatpush.bf16.msra.mxu0 %v7101_v56  ;;  %v7006_v47 = vld [vmem:[#allocation12 + $0x7a8] sm:$0xf0]  ;;  %v6209_v48 = vor.u32 %v8225_v20, %v6206_v32  ;;  %v6465_v40 = vor.u32 %v8289_v30, %v6462_v50  ;;  %v4542_v30 = vpop.f32.mrf.mxu2 }
 0x250   : > { %v8589_v51 = vld [vmem:[#allocation12 + $0xca4] sm:$0xf0]  ;;  %v6366_v21 = vld [vmem:[#allocation12 + $0x2a8] sm:$0xf0] }
 0x251   : > { %v7900_v33 = vld [vmem:[#allocation12 + $0xe88] sm:$0xf]  ;;  %v7645_v54 = vor.u32 %v8589_v51, %v7644_v28  ;;  %4786 = vmatpush.bf16.msra.mxu1 %v7357_v41  ;;  %v4516_v28 = vpop.f32.mrf.mxu0  ;;  %v4529_v51 = vpop.f32.mrf.mxu1  ;;  %v6753_v41 = vor.u32 %v8361_v38, %v6750_v43  ;;  %v8337_v42 = vld [vmem:[#allocation12 + $0x4cc] sm:$0xf] }
 0x252   : > { %v8653_v37 = vld [vmem:[#allocation12 + $0xea4] sm:$0xf0]  ;;  %v4517_v56 = vadd.f32 %v4516_v28, %v4491_v3  ;;  %v6654_v23 = vld [vmem:[#allocation12 + $0x4e8] sm:$0xf0] }
 0x253   : > { %v7068_v9 = vld [vmem:[#allocation12 + $0x808] sm:$0xf]  ;;  %v7901_v10 = vor.u32 %v8653_v37, %v7900_v33  ;;  %4798 = vmatpush.bf16.msra.mxu2 %v7645_v54  ;;  %v8217_v33 = vld [vmem:[#allocation12 + $0x10c] sm:$0xf] }
 0x254   : > { %v8445_v31 = vld [vmem:[#allocation12 + $0x824] sm:$0xf0]  ;;  %v6174_v37 = vld [vmem:[#allocation12 + $0x128] sm:$0xf0]  ;;  %v4530_v61 = vadd.f32 %v4529_v51, %v4517_v56 }
 0x255   : > { %v7324_v52 = vld [vmem:[#allocation12 + $0xa08] sm:$0xf]  ;;  %v7069_v7 = vor.u32 %v8445_v31, %v7068_v9  ;;  %4811 = vmatpush.bf16.msra.mxu3 %v7901_v10  ;;  %v7009_v9 = vor.u32 %v8425_v44, %v7006_v47  ;;  %v8281_v31 = vld [vmem:[#allocation12 + $0x30c] sm:$0xf]  ;;  %v6177_v63 = vor.u32 %v8217_v33, %v6174_v37 }
 0x256   : > { %v8509_v57 = vld [vmem:[#allocation12 + $0xa24] sm:$0xf0]  ;;  %v8353_v54 = vld [vmem:[#allocation12 + $0x54c] sm:$0xf]  ;;  %v4543_v44 = vadd.f32 %v4542_v30, %v4530_v61 }
 0x257   : > { %v7612_v1 = vld [vmem:[#allocation12 + $0xc48] sm:$0xf]  ;;  %v7325_v8 = vor.u32 %v8509_v57, %v7324_v52  ;;  %4774 = vmatpush.bf16.msra.mxu0 %v7069_v7  ;;  %v6430_v52 = vld [vmem:[#allocation12 + $0x328] sm:$0xf0] }
 0x258   : > { %v8581_v58 = vld [vmem:[#allocation12 + $0xc64] sm:$0xf0]  ;;  %v6718_v10 = vld [vmem:[#allocation12 + $0x568] sm:$0xf0]  ;;  %v6433_v4 = vor.u32 %v8281_v31, %v6430_v52 }
 0x259   : > { %v7868_v5 = vld [vmem:[#allocation12 + $0xe48] sm:$0xf]  ;;  %v7613_v14 = vor.u32 %v8581_v58, %v7612_v1  ;;  %4787 = vmatpush.bf16.msra.mxu1 %v7325_v8  ;;  %v8417_v57 = vld [vmem:[#allocation12 + $0x74c] sm:$0xf] }
 0x25a   : > { %v8645_v6 = vld [vmem:[#allocation12 + $0xe64] sm:$0xf0]  ;;  %4775 = vmatmul.bf16.vlgmr.msra.gmra.mxu0 %v9720_v2  ;;  %v8209_v1 = vld [vmem:[#allocation12 + $0xcc] sm:$0xf] }
 0x25b   : > { %v7869_v15 = vor.u32 %v8645_v6, %v7868_v5  ;;  %v7580_v11 = vld [vmem:[#allocation12 + $0xc08] sm:$0xf]  ;;  %4819 = vmatpush.bf16.msrb.mxu0 %v6273_v13  ;;  %4799 = vmatpush.bf16.msra.mxu2 %v7613_v14  ;;  %v6142_v58 = vld [vmem:[#allocation12 + $0xe8] sm:$0xf0]  ;;  %v6721_v5 = vor.u32 %v8353_v54, %v6718_v10  ;;  %v6977_v6 = vor.u32 %v8417_v57, %v6974_v59  ;;  %v4518_v14 = vpop.f32.mrf.mxu0 }
 0x25c   : > { %v8573_v45 = vld [vmem:[#allocation12 + $0xc24] sm:$0xf0]  ;;  %4788 = vmatmul.bf16.vlgmr.msra.gmra.mxu1 %v9722_v55  ;;  %v8273_v7 = vld [vmem:[#allocation12 + $0x2cc] sm:$0xf]  ;;  %v6145_v62 = vor.u32 %v8209_v1, %v6142_v58 }
 0x25d   : > { %v7836_v16 = vld [vmem:[#allocation12 + $0xe08] sm:$0xf]  ;;  %4832 = vmatpush.bf16.msrb.mxu1 %v6529_v22  ;;  %4812 = vmatpush.bf16.msra.mxu3 %v7869_v15  ;;  %v7581_v60 = vor.u32 %v8573_v45, %v7580_v11  ;;  %v6398_v8 = vld [vmem:[#allocation12 + $0x2e8] sm:$0xf0]  ;;  %v4531_v15 = vpop.f32.mrf.mxu1 }
 0x25e   : > { %v8637_v53 = vld [vmem:[#allocation12 + $0xe24] sm:$0xf0]  ;;  %v6686_v13 = vld [vmem:[#allocation12 + $0x528] sm:$0xf0]  ;;  %v6401_v39 = vor.u32 %v8273_v7, %v6398_v8 }
 0x25f   : > { %v7837_v49 = vor.u32 %v8637_v53, %v7836_v16  ;;  %4820 = vmatpush.bf16.msrb.mxu0 %v6241_v25  ;;  %4800 = vmatpush.bf16.msra.mxu2 %v7581_v60  ;;  %v8409_v22 = vld [vmem:[#allocation12 + $0x70c] sm:$0xf]  ;;  %v6689_v16 = vor.u32 %v8345_v12, %v6686_v13  ;;  %v4544_v13 = vpop.f32.mrf.mxu2 }
 0x260   : > { %v8201_v11 = vld [vmem:[#allocation12 + $0x8c] sm:$0xf]  ;;  %v6945_v53 = vor.u32 %v8409_v22, %v6942_v46 }
 0x261   : > { %4833 = vmatpush.bf16.msrb.mxu1 %v6497_v17  ;;  %4813 = vmatpush.bf16.msra.mxu3 %v7837_v49  ;;  %v6110_v45 = vld [vmem:[#allocation12 + $0xa8] sm:$0xf0]  ;;  %v6369_v49 = vor.u32 %v8265_v19, %v6366_v21 }
 0x262   : > { %4801 = vmatmul.bf16.vlgmr.msra.gmra.mxu2 %v9726_v35  ;;  %v8401_v25 = vld [vmem:[#allocation12 + $0x6cc] sm:$0xf]  ;;  %v6113_v60 = vor.u32 %v8201_v11, %v6110_v45 }
 0x263   : > { %4845 = vmatpush.bf16.msrb.mxu2 %v6785_v34  ;;  %4821 = vmatpush.bf16.msrb.mxu0 %v6209_v48  ;;  %v6910_v17 = vld [vmem:[#allocation12 + $0x6e8] sm:$0xf0]  ;;  %v4555_v34 = vpop.f32.mrf.mxu3 }
 0x264   : > { %4814 = vmatmul.bf16.vlgmr.msra.gmra.mxu3 %v9728_v18  ;;  %v8193_v20 = vld [vmem:[#allocation12 + $0x4c] sm:$0xf]  ;;  %v6913_v50 = vor.u32 %v8401_v25, %v6910_v17  ;;  %v4556_v28 = vadd.f32 %v4555_v34, %v4543_v44 }
 0x265   : > { %4858 = vmatpush.bf16.msrb.mxu3 %v7041_v36  ;;  %4834 = vmatpush.bf16.msrb.mxu1 %v6465_v40  ;;  %v6078_v32 = vld [vmem:[#allocation12 + $0x68] sm:$0xf0]  ;;  %v6657_v36 = vor.u32 %v8337_v42, %v6654_v23  ;;  %v4581_v31 = vpop.f32.mrf.mxu1 }
 0x266   : > { %v8257_v3 = vld [vmem:[#allocation12 + $0x24c] sm:$0xf]  ;;  %v6081_v51 = vor.u32 %v8193_v20, %v6078_v32 }
 0x267   : > { %4846 = vmatpush.bf16.msrb.mxu2 %v6753_v41  ;;  %4822 = vmatpush.bf16.msrb.mxu0 %v6177_v63  ;;  %v6334_v38 = vld [vmem:[#allocation12 + $0x268] sm:$0xf0] }
 0x268   : > { %v8329_v43 = vld [vmem:[#allocation12 + $0x48c] sm:$0xf]  ;;  %v6337_v33 = vor.u32 %v8257_v3, %v6334_v38 }
 0x269   : > { %4859 = vmatpush.bf16.msrb.mxu3 %v7009_v9  ;;  %4835 = vmatpush.bf16.msrb.mxu1 %v6433_v4  ;;  %v6622_v47 = vld [vmem:[#allocation12 + $0x4a8] sm:$0xf0]  ;;  %v4568_v9 = vpop.f32.mrf.mxu0 }
 0x26a   : > { %v8393_v48 = vld [vmem:[#allocation12 + $0x68c] sm:$0xf]  ;;  %v6625_v52 = vor.u32 %v8329_v43, %v6622_v47  ;;  %v4569_v61 = vadd.f32 %v4568_v9, %v4556_v28 }
 0x26b   : > { %4847 = vmatpush.bf16.msrb.mxu2 %v6721_v5  ;;  %4823 = vmatpush.bf16.msrb.mxu0 %v6145_v62  ;;  %v6878_v40 = vld [vmem:[#allocation12 + $0x6a8] sm:$0xf0]  ;;  %v4557_v22 = vpop.f32.mrf.mxu3 }
 0x26c   : > { %v8185_v37 = vld [vmem:[#allocation12 + $0xc] sm:$0xf]  ;;  %v6881_v54 = vor.u32 %v8393_v48, %v6878_v40  ;;  %v4582_v7 = vadd.f32 %v4581_v31, %v4569_v61  ;;  %v4492_v31 = vperm.slane %v9744_v24, 1 }
 0x26d   : > { %4860 = vmatpush.bf16.msrb.mxu3 %v6977_v6  ;;  %4836 = vmatpush.bf16.msrb.mxu1 %v6401_v39  ;;  %v6046_v56 = vld [vmem:[#allocation12 + $0x28] sm:$0xf0]  ;;  %v4583_v20 = vpop.f32.mrf.mxu1 }
 0x26e   : > { %v8249_v41 = vld [vmem:[#allocation12 + $0x20c] sm:$0xf]  ;;  %v6049_v8 = vor.u32 %v8185_v37, %v6046_v56 }
 0x26f   : > { %4848 = vmatpush.bf16.msrb.mxu2 %v6689_v16  ;;  %4824 = vmatpush.bf16.msrb.mxu0 %v6113_v60  ;;  %v6302_v10 = vld [vmem:[#allocation12 + $0x228] sm:$0xf0] }
 0x270   : > { %v8497_v57 = vld [vmem:[#allocation12 + $0x9cc] sm:$0xf]  ;;  %v6305_v12 = vor.u32 %v8249_v41, %v6302_v10 }
 0x271   : > { %4861 = vmatpush.bf16.msrb.mxu3 %v6945_v53  ;;  %4837 = vmatpush.bf16.msrb.mxu1 %v6369_v49  ;;  %v7294_v59 = vld [vmem:[#allocation12 + $0x9e8] sm:$0xf0]  ;;  %v4570_v49 = vpop.f32.mrf.mxu0 }
 0x272   : > { %v8561_v63 = vld [vmem:[#allocation12 + $0xbcc] sm:$0xf]  ;;  %v7297_v46 = vor.u32 %v8497_v57, %v7294_v59 }
 0x273   : > { %4849 = vmatpush.bf16.msrb.mxu2 %v6657_v36  ;;  %v7550_v4 = vld [vmem:[#allocation12 + $0xbe8] sm:$0xf0]  ;;  %4825 = vmatpush.bf16.msrb.mxu0 %v6081_v51  ;;  %v4607_v37 = vpop.f32.mrf.mxu3 }
 0x274   : > { %v8321_v1 = vld [vmem:[#allocation12 + $0x44c] sm:$0xf]  ;;  %v7553_v62 = vor.u32 %v8561_v63, %v7550_v4 }
 0x275   : > { %4862 = vmatpush.bf16.msrb.mxu3 %v6913_v50  ;;  %v6590_v58 = vld [vmem:[#allocation12 + $0x468] sm:$0xf0]  ;;  %4838 = vmatpush.bf16.msrb.mxu1 %v6337_v33  ;;  %v4594_v33 = vpop.f32.mrf.mxu2 }
 0x276   : > { %v8385_v5 = vld [vmem:[#allocation12 + $0x64c] sm:$0xf]  ;;  %v6593_v11 = vor.u32 %v8321_v1, %v6590_v58  ;;  %v4595_v56 = vadd.f32 %v4594_v33, %v4582_v7  ;;  %v4633_v7 = vpop.f32.mrf.mxu1 }
 0x277   : > { %v6846_v6 = vld [vmem:[#allocation12 + $0x668] sm:$0xf0]  ;;  %4850 = vmatpush.bf16.msrb.mxu2 %v6625_v52  ;;  %4826 = vmatpush.bf16.msrb.mxu0 %v6049_v8 }
 0x278   : > { %v8489_v39 = vld [vmem:[#allocation12 + $0x98c] sm:$0xf]  ;;  %v6849_v45 = vor.u32 %v8385_v5, %v6846_v6  ;;  %v9754_v4 = vadd.f32 %v4607_v37, %v4595_v56 }
 0x279   : > { %4863 = vmatpush.bf16.msrb.mxu3 %v6881_v54  ;;  %v7262_v14 = vld [vmem:[#allocation12 + $0x9a8] sm:$0xf0]  ;;  %4839 = vmatpush.bf16.msrb.mxu1 %v6305_v12  ;;  %v4620_v6 = vpop.f32.mrf.mxu0 }
 0x27a   : > { %v8553_v15 = vld [vmem:[#allocation12 + $0xb8c] sm:$0xf]  ;;  %v7265_v32 = vor.u32 %v8489_v39, %v7262_v14  ;;  %4827 = vmatmul.bf16.vlgmr.msrb.gmra.mxu0 %v9704_v29  ;;  %v4621_v8 = vadd.f32 %v4620_v6, %v4492_v31 }
 0x27b   : > { %v7518_v16 = vld [vmem:[#allocation12 + $0xba8] sm:$0xf0]  ;;  %4871 = vmatpush.bf16.msra.mxu0 %v7297_v46  ;;  %4851 = vmatpush.bf16.msrb.mxu2 %v6593_v11 }
 0x27c   : > { %v8313_v53 = vld [vmem:[#allocation12 + $0x40c] sm:$0xf]  ;;  %v7521_v30 = vor.u32 %v8553_v15, %v7518_v16  ;;  %4840 = vmatmul.bf16.vlgmr.msrb.gmra.mxu1 %v9706_v0 }
 0x27d   : > { %v6558_v19 = vld [vmem:[#allocation12 + $0x428] sm:$0xf0]  ;;  %4884 = vmatpush.bf16.msra.mxu1 %v7553_v62  ;;  %4864 = vmatpush.bf16.msrb.mxu3 %v6849_v45  ;;  %v4634_v45 = vadd.f32 %v4633_v7, %v4621_v8  ;;  %v6276_v7 = vld [vmem:[#allocation12 + $0x1d0] sm:$0xf] }
 0x27e   : > { %v8377_v21 = vld [vmem:[#allocation12 + $0x60c] sm:$0xf]  ;;  %v6561_v34 = vor.u32 %v8313_v53, %v6558_v19  ;;  %v8246_v8 = vld [vmem:[#allocation12 + $0x1ec] sm:$0xf0] }
 0x27f   : > { %v6814_v42 = vld [vmem:[#allocation12 + $0x628] sm:$0xf0]  ;;  %4872 = vmatpush.bf16.msra.mxu0 %v7265_v32 }
 0x280   : > { %v8625_v23 = vld [vmem:[#allocation12 + $0xdcc] sm:$0xf]  ;;  %v6817_v36 = vor.u32 %v8377_v21, %v6814_v42  ;;  %4852 = vmatpush.bf16.msrb.mxu2 %v6561_v34  ;;  %v4596_v21 = vpop.f32.mrf.mxu2  ;;  %v4609_v42 = vpop.f32.mrf.mxu3 }
 0x281   : > { %v7806_v25 = vld [vmem:[#allocation12 + $0xde8] sm:$0xf0]  ;;  %4885 = vmatpush.bf16.msra.mxu1 %v7521_v30  ;;  %v6500_v21 = vld [vmem:[#allocation12 + $0x390] sm:$0xf] }
 0x282   : > { %v8689_v17 = vld [vmem:[#allocation12 + $0xfcc] sm:$0xf]  ;;  %v7809_v38 = vor.u32 %v8625_v23, %v7806_v25  ;;  %4865 = vmatpush.bf16.msrb.mxu3 %v6817_v36 }
 0x283   : > { %v8062_v60 = vld [vmem:[#allocation12 + $0xfe8] sm:$0xf0]  ;;  %4853 = vmatmul.bf16.vlgmr.msrb.gmra.mxu2 %v9711_v26 }
 0x284   : > { %v8481_v50 = vld [vmem:[#allocation12 + $0x94c] sm:$0xf]  ;;  %v8065_v43 = vor.u32 %v8689_v17, %v8062_v60  ;;  %4897 = vmatpush.bf16.msra.mxu2 %v7809_v38  ;;  %v4622_v38 = vpop.f32.mrf.mxu0 }
 0x285   : > { %v7230_v3 = vld [vmem:[#allocation12 + $0x968] sm:$0xf0]  ;;  %4866 = vmatmul.bf16.vlgmr.msrb.gmra.mxu3 %v9713_v27 }
 0x286   : > { %v8545_v44 = vld [vmem:[#allocation12 + $0xb4c] sm:$0xf]  ;;  %v7233_v41 = vor.u32 %v8481_v50, %v7230_v3  ;;  %4910 = vmatpush.bf16.msra.mxu3 %v8065_v43  ;;  %v4635_v43 = vpop.f32.mrf.mxu1 }
 0x287   : > { %v7486_v47 = vld [vmem:[#allocation12 + $0xb68] sm:$0xf0] }
 0x288   : > { %v8617_v48 = vld [vmem:[#allocation12 + $0xd8c] sm:$0xf]  ;;  %v7489_v9 = vor.u32 %v8545_v44, %v7486_v47  ;;  %4873 = vmatpush.bf16.msra.mxu0 %v7233_v41 }
 0x289   : > { %v7774_v40 = vld [vmem:[#allocation12 + $0xda8] sm:$0xf0] }
 0x28a   : > { %v8681_v28 = vld [vmem:[#allocation12 + $0xf8c] sm:$0xf]  ;;  %v7777_v10 = vor.u32 %v8617_v48, %v7774_v40  ;;  %4886 = vmatpush.bf16.msra.mxu1 %v7489_v9 }
 0x28b   : > { %v8030_v51 = vld [vmem:[#allocation12 + $0xfa8] sm:$0xf0] }
 0x28c   : > { %v8473_v52 = vld [vmem:[#allocation12 + $0x90c] sm:$0xf]  ;;  %v8033_v57 = vor.u32 %v8681_v28, %v8030_v51  ;;  %4898 = vmatpush.bf16.msra.mxu2 %v7777_v10 }
 0x28d   : > { %v7198_v54 = vld [vmem:[#allocation12 + $0x928] sm:$0xf0] }
 0x28e   : > { %v8537_v59 = vld [vmem:[#allocation12 + $0xb0c] sm:$0xf]  ;;  %v7201_v12 = vor.u32 %v8473_v52, %v7198_v54  ;;  %4911 = vmatpush.bf16.msra.mxu3 %v8033_v57  ;;  %v4646_v52 = vpop.f32.mrf.mxu2  ;;  %v4659_v54 = vpop.f32.mrf.mxu3 }
 0x28f   : > { %v7454_v61 = vld [vmem:[#allocation12 + $0xb28] sm:$0xf0] }
 0x290   : > { %v8609_v63 = vld [vmem:[#allocation12 + $0xd4c] sm:$0xf]  ;;  %v7457_v13 = vor.u32 %v8537_v59, %v7454_v61  ;;  %4874 = vmatpush.bf16.msra.mxu0 %v7201_v12  ;;  %v6532_v12 = vld [vmem:[#allocation12 + $0x3d0] sm:$0xf] }
 0x291   : > { %v7742_v1 = vld [vmem:[#allocation12 + $0xd68] sm:$0xf0] }
 0x292   : > { %v8673_v58 = vld [vmem:[#allocation12 + $0xf4c] sm:$0xf]  ;;  %v7745_v62 = vor.u32 %v8609_v63, %v7742_v1  ;;  %4887 = vmatpush.bf16.msra.mxu1 %v7457_v13  ;;  %v4647_v1 = vadd.f32 %v4646_v52, %v4634_v45  ;;  %v8310_v13 = vld [vmem:[#allocation12 + $0x3ec] sm:$0xf0]  ;;  %v6277_v45 = vor.u32 %v8246_v8, %v6276_v7 }
 0x293   : > { %v7998_v5 = vld [vmem:[#allocation12 + $0xf68] sm:$0xf0]  ;;  %v8358_v7 = vld [vmem:[#allocation12 + $0x56c] sm:$0xf0] }
 0x294   : > { %v8465_v22 = vld [vmem:[#allocation12 + $0x8cc] sm:$0xf]  ;;  %v8001_v39 = vor.u32 %v8673_v58, %v7998_v5  ;;  %4899 = vmatpush.bf16.msra.mxu2 %v7745_v62  ;;  %v6980_v8 = vld [vmem:[#allocation12 + $0x750] sm:$0xf] }
 0x295   : > { %v7166_v46 = vld [vmem:[#allocation12 + $0x8e8] sm:$0xf0] }
 0x296   : > { %v8529_v14 = vld [vmem:[#allocation12 + $0xacc] sm:$0xf]  ;;  %v7169_v23 = vor.u32 %v8465_v22, %v7166_v46  ;;  %4912 = vmatpush.bf16.msra.mxu3 %v8001_v39  ;;  %v9758_v46 = vadd.f32 %v4659_v54, %v4647_v1  ;;  %v8286_v1 = vld [vmem:[#allocation12 + $0x32c] sm:$0xf0] }
 0x297   : > { %v7422_v15 = vld [vmem:[#allocation12 + $0xae8] sm:$0xf0] }
 0x298   : > { %v8601_v11 = vld [vmem:[#allocation12 + $0xd0c] sm:$0xf]  ;;  %v7425_v25 = vor.u32 %v8529_v14, %v7422_v15  ;;  %4875 = vmatpush.bf16.msra.mxu0 %v7169_v23 }
 0x299   : > { %v7710_v16 = vld [vmem:[#allocation12 + $0xd28] sm:$0xf0] }
 0x29a   : > { %v8665_v53 = vld [vmem:[#allocation12 + $0xf0c] sm:$0xf]  ;;  %v7713_v49 = vor.u32 %v8601_v11, %v7710_v16  ;;  %4888 = vmatpush.bf16.msra.mxu1 %v7425_v25  ;;  %v6533_v16 = vor.u32 %v8310_v13, %v6532_v12  ;;  %v8302_v25 = vld [vmem:[#allocation12 + $0x3ac] sm:$0xf0] }
 0x29b   : > { %v7966_v19 = vld [vmem:[#allocation12 + $0xf28] sm:$0xf0]  ;;  %v6501_v43 = vor.u32 %v8302_v25, %v6500_v21  ;;  %v8422_v12 = vld [vmem:[#allocation12 + $0x76c] sm:$0xf0] }
 0x29c   : > { %v8457_v17 = vld [vmem:[#allocation12 + $0x88c] sm:$0xf]  ;;  %v7969_v20 = vor.u32 %v8665_v53, %v7966_v19  ;;  %4900 = vmatpush.bf16.msra.mxu2 %v7713_v49  ;;  %v6244_v53 = vld [vmem:[#allocation12 + $0x190] sm:$0xf] }
 0x29d   : > { %v7134_v60 = vld [vmem:[#allocation12 + $0x8a8] sm:$0xf0]  ;;  %v8238_v19 = vld [vmem:[#allocation12 + $0x1ac] sm:$0xf0] }
 0x29e   : > { %v8521_v32 = vld [vmem:[#allocation12 + $0xa8c] sm:$0xf]  ;;  %v7137_v44 = vor.u32 %v8457_v17, %v7134_v60  ;;  %4913 = vmatpush.bf16.msra.mxu3 %v7969_v20  ;;  %v6245_v38 = vor.u32 %v8238_v19, %v6244_v53  ;;  %v8278_v53 = vld [vmem:[#allocation12 + $0x2ec] sm:$0xf0] }
 0x29f   : > { %v7390_v30 = vld [vmem:[#allocation12 + $0xaa8] sm:$0xf0]  ;;  %v6692_v19 = vld [vmem:[#allocation12 + $0x510] sm:$0xf] }
 0x2a0   : > { %v8593_v34 = vld [vmem:[#allocation12 + $0xccc] sm:$0xf]  ;;  %v7393_v47 = vor.u32 %v8521_v32, %v7390_v30  ;;  %4876 = vmatpush.bf16.msra.mxu0 %v7137_v44  ;;  %v6788_v32 = vld [vmem:[#allocation12 + $0x5d0] sm:$0xf]  ;;  %v4648_v30 = vpop.f32.mrf.mxu2 }
 0x2a1   : > { %v7678_v36 = vld [vmem:[#allocation12 + $0xce8] sm:$0xf0]  ;;  %v8350_v21 = vld [vmem:[#allocation12 + $0x52c] sm:$0xf0] }
 0x2a2   : > { %v8657_v50 = vld [vmem:[#allocation12 + $0xecc] sm:$0xf]  ;;  %v7681_v28 = vor.u32 %v8593_v34, %v7678_v36  ;;  %4889 = vmatpush.bf16.msra.mxu1 %v7393_v47  ;;  %v4661_v34 = vpop.f32.mrf.mxu3  ;;  %v8374_v36 = vld [vmem:[#allocation12 + $0x5ec] sm:$0xf0] }
 0x2a3   : > { %v7934_v3 = vld [vmem:[#allocation12 + $0xee8] sm:$0xf0]  ;;  %v8270_v30 = vld [vmem:[#allocation12 + $0x2ac] sm:$0xf0] }
 0x2a4   : > { %v8449_v48 = vld [vmem:[#allocation12 + $0x84c] sm:$0xf]  ;;  %v7937_v51 = vor.u32 %v8657_v50, %v7934_v3  ;;  %4901 = vmatpush.bf16.msra.mxu2 %v7681_v28  ;;  %v7044_v50 = vld [vmem:[#allocation12 + $0x7d0] sm:$0xf]  ;;  %v6789_v28 = vor.u32 %v8374_v36, %v6788_v32 }
 0x2a5   : > { %v7102_v40 = vld [vmem:[#allocation12 + $0x868] sm:$0xf0]  ;;  %v8438_v3 = vld [vmem:[#allocation12 + $0x7ec] sm:$0xf0] }
 0x2a6   : > { %v8513_v33 = vld [vmem:[#allocation12 + $0xa4c] sm:$0xf]  ;;  %v7105_v10 = vor.u32 %v8449_v48, %v7102_v40  ;;  %4914 = vmatpush.bf16.msra.mxu3 %v7937_v51  ;;  %v6212_v48 = vld [vmem:[#allocation12 + $0x150] sm:$0xf]  ;;  %v7045_v51 = vor.u32 %v8438_v3, %v7044_v50 }
 0x2a7   : > { %v7358_v37 = vld [vmem:[#allocation12 + $0xa68] sm:$0xf0]  ;;  %v8230_v40 = vld [vmem:[#allocation12 + $0x16c] sm:$0xf0] }
 0x2a8   : > { %v8585_v56 = vld [vmem:[#allocation12 + $0xc8c] sm:$0xf]  ;;  %v7361_v57 = vor.u32 %v8513_v33, %v7358_v37  ;;  %4877 = vmatpush.bf16.msra.mxu0 %v7105_v10  ;;  %v6468_v33 = vld [vmem:[#allocation12 + $0x350] sm:$0xf]  ;;  %v6213_v52 = vor.u32 %v8230_v40, %v6212_v48 }
 0x2a9   : > { %v7646_v41 = vld [vmem:[#allocation12 + $0xca8] sm:$0xf0]  ;;  %v8294_v37 = vld [vmem:[#allocation12 + $0x36c] sm:$0xf0] }
 0x2aa   : > { %v8649_v9 = vld [vmem:[#allocation12 + $0xe8c] sm:$0xf]  ;;  %v7649_v58 = vor.u32 %v8585_v56, %v7646_v41  ;;  %4890 = vmatpush.bf16.msra.mxu1 %v7361_v57  ;;  %v6756_v56 = vld [vmem:[#allocation12 + $0x590] sm:$0xf]  ;;  %v6469_v54 = vor.u32 %v8294_v37, %v6468_v33 }
 0x2ab   : > { %v7902_v31 = vld [vmem:[#allocation12 + $0xea8] sm:$0xf0]  ;;  %v8366_v41 = vld [vmem:[#allocation12 + $0x5ac] sm:$0xf0] }
 0x2ac   : > { %v8441_v59 = vld [vmem:[#allocation12 + $0x80c] sm:$0xf]  ;;  %v7905_v5 = vor.u32 %v8649_v9, %v7902_v31  ;;  %4902 = vmatpush.bf16.msra.mxu2 %v7649_v58  ;;  %v7012_v9 = vld [vmem:[#allocation12 + $0x790] sm:$0xf] }
 0x2ad   : > { %v7070_v61 = vld [vmem:[#allocation12 + $0x828] sm:$0xf0]  ;;  %v8430_v31 = vld [vmem:[#allocation12 + $0x7ac] sm:$0xf0] }
 0x2ae   : > { %v8505_v63 = vld [vmem:[#allocation12 + $0xa0c] sm:$0xf]  ;;  %v7073_v15 = vor.u32 %v8441_v59, %v7070_v61  ;;  %4915 = vmatpush.bf16.msra.mxu3 %v7905_v5  ;;  %v6180_v10 = vld [vmem:[#allocation12 + $0x110] sm:$0xf]  ;;  %v6757_v59 = vor.u32 %v8366_v41, %v6756_v56  ;;  %v7013_v61 = vor.u32 %v8430_v31, %v7012_v9  ;;  %v4672_v5 = vpop.f32.mrf.mxu0  ;;  %v4698_v41 = vpop.f32.mrf.mxu2 }
 0x2af   : > { %v7326_v6 = vld [vmem:[#allocation12 + $0xa28] sm:$0xf0]  ;;  %v8222_v57 = vld [vmem:[#allocation12 + $0x12c] sm:$0xf0]  ;;  %v4673_v13 = vadd.f32 %v4672_v5, %v9758_v46  ;;  %v4711_v9 = vpop.f32.mrf.mxu3 }
 0x2b0   : > { %v8577_v22 = vld [vmem:[#allocation12 + $0xc4c] sm:$0xf]  ;;  %v7329_v11 = vor.u32 %v8505_v63, %v7326_v6  ;;  %4878 = vmatpush.bf16.msra.mxu0 %v7073_v15  ;;  %v6436_v63 = vld [vmem:[#allocation12 + $0x310] sm:$0xf]  ;;  %v4685_v6 = vpop.f32.mrf.mxu1 }
 0x2b1   : > { %v7614_v62 = vld [vmem:[#allocation12 + $0xc68] sm:$0xf0]  ;;  %v6724_v58 = vld [vmem:[#allocation12 + $0x550] sm:$0xf]  ;;  %v4686_v15 = vadd.f32 %v4685_v6, %v4673_v13 }
 0x2b2   : > { %v8641_v39 = vld [vmem:[#allocation12 + $0xe4c] sm:$0xf]  ;;  %v7617_v42 = vor.u32 %v8577_v22, %v7614_v62  ;;  %4891 = vmatpush.bf16.msra.mxu1 %v7329_v11  ;;  %v6181_v22 = vor.u32 %v8222_v57, %v6180_v10  ;;  %v6437_v62 = vor.u32 %v8286_v1, %v6436_v63  ;;  %v6725_v11 = vor.u32 %v8358_v7, %v6724_v58  ;;  %v6372_v32 = vld [vmem:[#allocation12 + $0x290] sm:$0xf] }
 0x2b3   : > { %v7870_v14 = vld [vmem:[#allocation12 + $0xe68] sm:$0xf0]  ;;  %4879 = vmatmul.bf16.vlgmr.msra.gmra.mxu0 %v9720_v2  ;;  %v6660_v34 = vld [vmem:[#allocation12 + $0x4d0] sm:$0xf]  ;;  %v4699_v10 = vadd.f32 %v4698_v41, %v4686_v15 }
 0x2b4   : > { %v7873_v23 = vor.u32 %v8641_v39, %v7870_v14  ;;  %v8569_v17 = vld [vmem:[#allocation12 + $0xc0c] sm:$0xf]  ;;  %4923 = vmatpush.bf16.msrb.mxu0 %v6277_v45  ;;  %4903 = vmatpush.bf16.msra.mxu2 %v7617_v42  ;;  %v6148_v39 = vld [vmem:[#allocation12 + $0xd0] sm:$0xf]  ;;  %v6981_v45 = vor.u32 %v8422_v12, %v6980_v8 }
 0x2b5   : > { %v7582_v60 = vld [vmem:[#allocation12 + $0xc28] sm:$0xf0]  ;;  %4892 = vmatmul.bf16.vlgmr.msra.gmra.mxu1 %v9722_v55  ;;  %v8214_v14 = vld [vmem:[#allocation12 + $0xec] sm:$0xf0]  ;;  %v9765_v58 = vadd.f32 %v4711_v9, %v4699_v10 }
 0x2b6   : > { %v8633_v49 = vld [vmem:[#allocation12 + $0xe0c] sm:$0xf]  ;;  %4936 = vmatpush.bf16.msrb.mxu1 %v6533_v16  ;;  %4916 = vmatpush.bf16.msra.mxu3 %v7873_v23  ;;  %v7585_v44 = vor.u32 %v8569_v17, %v7582_v60  ;;  %v6404_v16 = vld [vmem:[#allocation12 + $0x2d0] sm:$0xf]  ;;  %v6149_v46 = vor.u32 %v8214_v14, %v6148_v39  ;;  %v4674_v36 = vpop.f32.mrf.mxu0 }
 0x2b7   : > { %v7838_v20 = vld [vmem:[#allocation12 + $0xe28] sm:$0xf0]  ;;  %v6948_v42 = vld [vmem:[#allocation12 + $0x710] sm:$0xf]  ;;  %v6405_v25 = vor.u32 %v8278_v53, %v6404_v16 }
 0x2b8   : > { %v7841_v47 = vor.u32 %v8633_v49, %v7838_v20  ;;  %4924 = vmatpush.bf16.msrb.mxu0 %v6245_v38  ;;  %4904 = vmatpush.bf16.msra.mxu2 %v7585_v44  ;;  %v8414_v23 = vld [vmem:[#allocation12 + $0x72c] sm:$0xf0]  ;;  %v6693_v49 = vor.u32 %v8350_v21, %v6692_v19  ;;  %v4687_v50 = vpop.f32.mrf.mxu1 }
 0x2b9   : > { %v6116_v17 = vld [vmem:[#allocation12 + $0x90] sm:$0xf]  ;;  %v6949_v20 = vor.u32 %v8414_v23, %v6948_v42 }
 0x2ba   : > { %4937 = vmatpush.bf16.msrb.mxu1 %v6501_v43  ;;  %4917 = vmatpush.bf16.msra.mxu3 %v7841_v47  ;;  %v8206_v60 = vld [vmem:[#allocation12 + $0xac] sm:$0xf0]  ;;  %v6373_v47 = vor.u32 %v8270_v30, %v6372_v32 }
 0x2bb   : > { %4905 = vmatmul.bf16.vlgmr.msra.gmra.mxu2 %v9726_v35  ;;  %v8342_v3 = vld [vmem:[#allocation12 + $0x4ec] sm:$0xf0]  ;;  %v6117_v44 = vor.u32 %v8206_v60, %v6116_v17  ;;  %v4713_v17 = vpop.f32.mrf.mxu3 }
 0x2bc   : > { %4949 = vmatpush.bf16.msrb.mxu2 %v6789_v28  ;;  %4925 = vmatpush.bf16.msrb.mxu0 %v6213_v52  ;;  %v6916_v38 = vld [vmem:[#allocation12 + $0x6d0] sm:$0xf]  ;;  %v6661_v28 = vor.u32 %v8342_v3, %v6660_v34 }
 0x2bd   : > { %4918 = vmatmul.bf16.vlgmr.msra.gmra.mxu3 %v9728_v18  ;;  %v8406_v43 = vld [vmem:[#allocation12 + $0x6ec] sm:$0xf0] }
 0x2be   : > { %4962 = vmatpush.bf16.msrb.mxu3 %v7045_v51  ;;  %4938 = vmatpush.bf16.msrb.mxu1 %v6469_v54  ;;  %v6084_v48 = vld [vmem:[#allocation12 + $0x50] sm:$0xf]  ;;  %v6917_v51 = vor.u32 %v8406_v43, %v6916_v38 }
 0x2bf   : > { %v8198_v40 = vld [vmem:[#allocation12 + $0x6c] sm:$0xf0] }
 0x2c0   : > { %4950 = vmatpush.bf16.msrb.mxu2 %v6757_v59  ;;  %4926 = vmatpush.bf16.msrb.mxu0 %v6181_v22  ;;  %v6340_v33 = vld [vmem:[#allocation12 + $0x250] sm:$0xf]  ;;  %v6085_v57 = vor.u32 %v8198_v40, %v6084_v48 }
 0x2c1   : > { %v8262_v37 = vld [vmem:[#allocation12 + $0x26c] sm:$0xf0] }
 0x2c2   : > { %4963 = vmatpush.bf16.msrb.mxu3 %v7013_v61  ;;  %4939 = vmatpush.bf16.msrb.mxu1 %v6437_v62  ;;  %v6628_v56 = vld [vmem:[#allocation12 + $0x490] sm:$0xf]  ;;  %v6341_v59 = vor.u32 %v8262_v37, %v6340_v33 }
 0x2c3   : > { %v8334_v31 = vld [vmem:[#allocation12 + $0x4ac] sm:$0xf0] }
 0x2c4   : > { %4951 = vmatpush.bf16.msrb.mxu2 %v6725_v11  ;;  %4927 = vmatpush.bf16.msrb.mxu0 %v6149_v46  ;;  %v6884_v52 = vld [vmem:[#allocation12 + $0x690] sm:$0xf]  ;;  %v6629_v5 = vor.u32 %v8334_v31, %v6628_v56 }
 0x2c5   : > { %v8398_v54 = vld [vmem:[#allocation12 + $0x6ac] sm:$0xf0] }
 0x2c6   : > { %4964 = vmatpush.bf16.msrb.mxu3 %v6981_v45  ;;  %4940 = vmatpush.bf16.msrb.mxu1 %v6405_v25  ;;  %v6052_v61 = vld [vmem:[#allocation12 + $0x10] sm:$0xf]  ;;  %v6885_v6 = vor.u32 %v8398_v54, %v6884_v52  ;;  %v4700_v25 = vpop.f32.mrf.mxu2  ;;  %v4493_v52 = vperm.slane %v9744_v24, 2 }
 0x2c7   : > { %v8190_v63 = vld [vmem:[#allocation12 + $0x2c] sm:$0xf0] }
 0x2c8   : > { %4952 = vmatpush.bf16.msrb.mxu2 %v6693_v49  ;;  %4928 = vmatpush.bf16.msrb.mxu0 %v6117_v44  ;;  %v6308_v1 = vld [vmem:[#allocation12 + $0x210] sm:$0xf]  ;;  %v6053_v11 = vor.u32 %v8190_v63, %v6052_v61 }
 0x2c9   : > { %v8254_v7 = vld [vmem:[#allocation12 + $0x22c] sm:$0xf0] }
 0x2ca   : > { %4965 = vmatpush.bf16.msrb.mxu3 %v6949_v20  ;;  %4941 = vmatpush.bf16.msrb.mxu1 %v6373_v47  ;;  %v7300_v8 = vld [vmem:[#allocation12 + $0x9d0] sm:$0xf]  ;;  %v6309_v45 = vor.u32 %v8254_v7, %v6308_v1  ;;  %v4724_v7 = vpop.f32.mrf.mxu0 }
 0x2cb   : > { %v8502_v12 = vld [vmem:[#allocation12 + $0x9ec] sm:$0xf0]  ;;  %v4725_v24 = vadd.f32 %v4724_v7, %v4493_v52 }
 0x2cc   : > { %4953 = vmatpush.bf16.msrb.mxu2 %v6661_v28  ;;  %v7556_v13 = vld [vmem:[#allocation12 + $0xbd0] sm:$0xf]  ;;  %4929 = vmatpush.bf16.msrb.mxu0 %v6085_v57  ;;  %v7301_v16 = vor.u32 %v8502_v12, %v7300_v8  ;;  %v4737_v8 = vpop.f32.mrf.mxu1 }
 0x2cd   : > { %v8566_v22 = vld [vmem:[#allocation12 + $0xbec] sm:$0xf0] }
 0x2ce   : > { %4966 = vmatpush.bf16.msrb.mxu3 %v6917_v51  ;;  %v6596_v62 = vld [vmem:[#allocation12 + $0x450] sm:$0xf]  ;;  %4942 = vmatpush.bf16.msrb.mxu1 %v6341_v59  ;;  %v7557_v53 = vor.u32 %v8566_v22, %v7556_v13 }
 0x2cf   : > { %v8326_v39 = vld [vmem:[#allocation12 + $0x46c] sm:$0xf0] }
 0x2d0   : > { %v6852_v14 = vld [vmem:[#allocation12 + $0x650] sm:$0xf]  ;;  %4954 = vmatpush.bf16.msrb.mxu2 %v6629_v5  ;;  %v6597_v23 = vor.u32 %v8326_v39, %v6596_v62  ;;  %4930 = vmatpush.bf16.msrb.mxu0 %v6053_v11  ;;  %v4738_v11 = vadd.f32 %v4737_v8, %v4725_v24  ;;  %v8306_v24 = vld [vmem:[#allocation12 + $0x3d4] sm:$0xf] }
 0x2d1   : > { %v8390_v15 = vld [vmem:[#allocation12 + $0x66c] sm:$0xf0] }
 0x2d2   : > { %4967 = vmatpush.bf16.msrb.mxu3 %v6885_v6  ;;  %v7268_v19 = vld [vmem:[#allocation12 + $0x990] sm:$0xf]  ;;  %v6853_v46 = vor.u32 %v8390_v15, %v6852_v14  ;;  %4943 = vmatpush.bf16.msrb.mxu1 %v6309_v45 }
 0x2d3   : > { %v8494_v21 = vld [vmem:[#allocation12 + $0x9ac] sm:$0xf0]  ;;  %4931 = vmatmul.bf16.vlgmr.msrb.gmra.mxu0 %v9704_v29 }
 0x2d4   : > { %v7524_v42 = vld [vmem:[#allocation12 + $0xb90] sm:$0xf]  ;;  %4975 = vmatpush.bf16.msra.mxu0 %v7301_v16  ;;  %v7269_v38 = vor.u32 %v8494_v21, %v7268_v19  ;;  %4955 = vmatpush.bf16.msrb.mxu2 %v6597_v23 }
 0x2d5   : > { %v8558_v60 = vld [vmem:[#allocation12 + $0xbac] sm:$0xf0]  ;;  %4944 = vmatmul.bf16.vlgmr.msrb.gmra.mxu1 %v9706_v0 }
 0x2d6   : > { %v6564_v49 = vld [vmem:[#allocation12 + $0x410] sm:$0xf]  ;;  %4988 = vmatpush.bf16.msra.mxu1 %v7557_v53  ;;  %v7525_v43 = vor.u32 %v8558_v60, %v7524_v42  ;;  %4968 = vmatpush.bf16.msrb.mxu3 %v6853_v46 }
 0x2d7   : > { %v8318_v20 = vld [vmem:[#allocation12 + $0x42c] sm:$0xf0] }
 0x2d8   : > { %v6820_v32 = vld [vmem:[#allocation12 + $0x610] sm:$0xf]  ;;  %v6565_v44 = vor.u32 %v8318_v20, %v6564_v49  ;;  %4976 = vmatpush.bf16.msra.mxu0 %v7269_v38 }
 0x2d9   : > { %v8382_v30 = vld [vmem:[#allocation12 + $0x62c] sm:$0xf0] }
 0x2da   : > { %v7812_v34 = vld [vmem:[#allocation12 + $0xdd0] sm:$0xf]  ;;  %v6821_v47 = vor.u32 %v8382_v30, %v6820_v32  ;;  %4989 = vmatpush.bf16.msra.mxu1 %v7525_v43  ;;  %4956 = vmatpush.bf16.msrb.mxu2 %v6565_v44 }
 0x2db   : > { %v8630_v36 = vld [vmem:[#allocation12 + $0xdec] sm:$0xf0] }
 0x2dc   : > { %v8068_v50 = vld [vmem:[#allocation12 + $0xfd0] sm:$0xf]  ;;  %v7813_v28 = vor.u32 %v8630_v36, %v7812_v34  ;;  %4969 = vmatpush.bf16.msrb.mxu3 %v6821_v47 }
 0x2dd   : > { %v8694_v3 = vld [vmem:[#allocation12 + $0xfec] sm:$0xf0]  ;;  %4957 = vmatmul.bf16.vlgmr.msrb.gmra.mxu2 %v9711_v26 }
 0x2de   : > { %v7236_v48 = vld [vmem:[#allocation12 + $0x950] sm:$0xf]  ;;  %v8069_v51 = vor.u32 %v8694_v3, %v8068_v50  ;;  %5001 = vmatpush.bf16.msra.mxu2 %v7813_v28  ;;  %v4726_v50 = vpop.f32.mrf.mxu0  ;;  %v4739_v3 = vpop.f32.mrf.mxu1 }
 0x2df   : > { %v8486_v40 = vld [vmem:[#allocation12 + $0x96c] sm:$0xf0]  ;;  %4970 = vmatmul.bf16.vlgmr.msrb.gmra.mxu3 %v9713_v27  ;;  %v6790_v50 = vld [vmem:[#allocation12 + $0x5f0] sm:$0xf0] }
 0x2e0   : > { %v7492_v33 = vld [vmem:[#allocation12 + $0xb50] sm:$0xf]  ;;  %v7237_v54 = vor.u32 %v8486_v40, %v7236_v48  ;;  %5014 = vmatpush.bf16.msra.mxu3 %v8069_v51  ;;  %v8434_v3 = vld [vmem:[#allocation12 + $0x7d4] sm:$0xf] }
 0x2e1   : > { %v8550_v37 = vld [vmem:[#allocation12 + $0xb6c] sm:$0xf0] }
 0x2e2   : > { %v7780_v56 = vld [vmem:[#allocation12 + $0xd90] sm:$0xf]  ;;  %v7493_v10 = vor.u32 %v8550_v37, %v7492_v33  ;;  %4977 = vmatpush.bf16.msra.mxu0 %v7237_v54 }
 0x2e3   : > { %v8622_v41 = vld [vmem:[#allocation12 + $0xdac] sm:$0xf0] }
 0x2e4   : > { %v8036_v9 = vld [vmem:[#allocation12 + $0xf90] sm:$0xf]  ;;  %v7781_v61 = vor.u32 %v8622_v41, %v7780_v56  ;;  %4990 = vmatpush.bf16.msra.mxu1 %v7493_v10 }
 0x2e5   : > { %v8686_v31 = vld [vmem:[#allocation12 + $0xfac] sm:$0xf0] }
 0x2e6   : > { %v7204_v57 = vld [vmem:[#allocation12 + $0x910] sm:$0xf]  ;;  %v8037_v63 = vor.u32 %v8686_v31, %v8036_v9  ;;  %5002 = vmatpush.bf16.msra.mxu2 %v7781_v61  ;;  %v4750_v9 = vpop.f32.mrf.mxu2  ;;  %v4763_v31 = vpop.f32.mrf.mxu3 }
 0x2e7   : > { %v8478_v59 = vld [vmem:[#allocation12 + $0x92c] sm:$0xf0] }
 0x2e8   : > { %v7460_v1 = vld [vmem:[#allocation12 + $0xb10] sm:$0xf]  ;;  %v7205_v62 = vor.u32 %v8478_v59, %v7204_v57  ;;  %5015 = vmatpush.bf16.msra.mxu3 %v8037_v63  ;;  %v4751_v57 = vadd.f32 %v4750_v9, %v4738_v11  ;;  %v6758_v9 = vld [vmem:[#allocation12 + $0x5b0] sm:$0xf0] }
 0x2e9   : > { %v8542_v5 = vld [vmem:[#allocation12 + $0xb2c] sm:$0xf0] }
 0x2ea   : > { %v7748_v6 = vld [vmem:[#allocation12 + $0xd50] sm:$0xf]  ;;  %v7461_v39 = vor.u32 %v8542_v5, %v7460_v1  ;;  %4978 = vmatpush.bf16.msra.mxu0 %v7205_v62  ;;  %v6534_v62 = vld [vmem:[#allocation12 + $0x3f0] sm:$0xf0] }
 0x2eb   : > { %v8614_v12 = vld [vmem:[#allocation12 + $0xd6c] sm:$0xf0] }
 0x2ec   : > { %v8004_v13 = vld [vmem:[#allocation12 + $0xf50] sm:$0xf]  ;;  %v7749_v45 = vor.u32 %v8614_v12, %v7748_v6  ;;  %4991 = vmatpush.bf16.msra.mxu1 %v7461_v39  ;;  %v9772_v6 = vadd.f32 %v4763_v31, %v4751_v57  ;;  %v8426_v31 = vld [vmem:[#allocation12 + $0x794] sm:$0xf] }
 0x2ed   : > { %v8678_v22 = vld [vmem:[#allocation12 + $0xf6c] sm:$0xf0]  ;;  %v8218_v57 = vld [vmem:[#allocation12 + $0x114] sm:$0xf] }
 0x2ee   : > { %v7172_v14 = vld [vmem:[#allocation12 + $0x8d0] sm:$0xf]  ;;  %v8005_v16 = vor.u32 %v8678_v22, %v8004_v13  ;;  %5003 = vmatpush.bf16.msra.mxu2 %v7749_v45  ;;  %v8242_v13 = vld [vmem:[#allocation12 + $0x1d4] sm:$0xf] }
 0x2ef   : > { %v8470_v15 = vld [vmem:[#allocation12 + $0x8ec] sm:$0xf0]  ;;  %v6278_v22 = vld [vmem:[#allocation12 + $0x1f0] sm:$0xf0] }
 0x2f0   : > { %v7428_v53 = vld [vmem:[#allocation12 + $0xad0] sm:$0xf]  ;;  %v7173_v25 = vor.u32 %v8470_v15, %v7172_v14  ;;  %5016 = vmatpush.bf16.msra.mxu3 %v8005_v16 }
 0x2f1   : > { %v8534_v19 = vld [vmem:[#allocation12 + $0xaec] sm:$0xf0] }
 0x2f2   : > { %v7716_v21 = vld [vmem:[#allocation12 + $0xd10] sm:$0xf]  ;;  %v7429_v17 = vor.u32 %v8534_v19, %v7428_v53  ;;  %4979 = vmatpush.bf16.msra.mxu0 %v7173_v25  ;;  %v6281_v53 = vor.u32 %v8242_v13, %v6278_v22  ;;  %v6537_v19 = vor.u32 %v8306_v24, %v6534_v62  ;;  %v6726_v13 = vld [vmem:[#allocation12 + $0x570] sm:$0xf0] }
 0x2f3   : > { %v8606_v42 = vld [vmem:[#allocation12 + $0xd2c] sm:$0xf0]  ;;  %v8418_v22 = vld [vmem:[#allocation12 + $0x754] sm:$0xf] }
 0x2f4   : > { %v7972_v23 = vld [vmem:[#allocation12 + $0xf10] sm:$0xf]  ;;  %v7717_v20 = vor.u32 %v8606_v42, %v7716_v21  ;;  %4992 = vmatpush.bf16.msra.mxu1 %v7429_v17  ;;  %v8234_v21 = vld [vmem:[#allocation12 + $0x194] sm:$0xf]  ;;  %v4752_v17 = vpop.f32.mrf.mxu2 }
 0x2f5   : > { %v8670_v46 = vld [vmem:[#allocation12 + $0xf2c] sm:$0xf0]  ;;  %v6246_v42 = vld [vmem:[#allocation12 + $0x1b0] sm:$0xf0] }
 0x2f6   : > { %v7140_v60 = vld [vmem:[#allocation12 + $0x890] sm:$0xf]  ;;  %v7973_v32 = vor.u32 %v8670_v46, %v7972_v23  ;;  %5004 = vmatpush.bf16.msra.mxu2 %v7717_v20  ;;  %v8298_v23 = vld [vmem:[#allocation12 + $0x394] sm:$0xf] }
 0x2f7   : > { %v8462_v49 = vld [vmem:[#allocation12 + $0x8ac] sm:$0xf0]  ;;  %v6982_v24 = vld [vmem:[#allocation12 + $0x770] sm:$0xf0] }
 0x2f8   : > { %v7396_v30 = vld [vmem:[#allocation12 + $0xa90] sm:$0xf]  ;;  %v7141_v47 = vor.u32 %v8462_v49, %v7140_v60  ;;  %5017 = vmatpush.bf16.msra.mxu3 %v7973_v32  ;;  %v4765_v60 = vpop.f32.mrf.mxu3  ;;  %v6502_v49 = vld [vmem:[#allocation12 + $0x3b0] sm:$0xf0] }
 0x2f9   : > { %v8526_v34 = vld [vmem:[#allocation12 + $0xaac] sm:$0xf0]  ;;  %v8202_v60 = vld [vmem:[#allocation12 + $0x94] sm:$0xf] }
 0x2fa   : > { %v7684_v36 = vld [vmem:[#allocation12 + $0xcd0] sm:$0xf]  ;;  %v7397_v48 = vor.u32 %v8526_v34, %v7396_v30  ;;  %4980 = vmatpush.bf16.msra.mxu0 %v7141_v47 }
 0x2fb   : > { %v8598_v38 = vld [vmem:[#allocation12 + $0xcec] sm:$0xf0] }
 0x2fc   : > { %v7940_v43 = vld [vmem:[#allocation12 + $0xed0] sm:$0xf]  ;;  %v7685_v51 = vor.u32 %v8598_v38, %v7684_v36  ;;  %4993 = vmatpush.bf16.msra.mxu1 %v7397_v48  ;;  %v8370_v36 = vld [vmem:[#allocation12 + $0x5d4] sm:$0xf] }
 0x2fd   : > { %v8662_v44 = vld [vmem:[#allocation12 + $0xeec] sm:$0xf0]  ;;  %v7046_v38 = vld [vmem:[#allocation12 + $0x7f0] sm:$0xf0] }
 0x2fe   : > { %v7108_v40 = vld [vmem:[#allocation12 + $0x850] sm:$0xf]  ;;  %v7941_v33 = vor.u32 %v8662_v44, %v7940_v43  ;;  %5005 = vmatpush.bf16.msra.mxu2 %v7685_v51  ;;  %v6249_v43 = vor.u32 %v8234_v21, %v6246_v42  ;;  %v6505_v44 = vor.u32 %v8298_v23, %v6502_v49  ;;  %v6793_v51 = vor.u32 %v8370_v36, %v6790_v50  ;;  %v6406_v21 = vld [vmem:[#allocation12 + $0x2f0] sm:$0xf0] }
 0x2ff   : > { %v8454_v28 = vld [vmem:[#allocation12 + $0x86c] sm:$0xf0]  ;;  %v8346_v42 = vld [vmem:[#allocation12 + $0x514] sm:$0xf] }
 0x300   : > { %v7364_v37 = vld [vmem:[#allocation12 + $0xa50] sm:$0xf]  ;;  %v7109_v59 = vor.u32 %v8454_v28, %v7108_v40  ;;  %5018 = vmatpush.bf16.msra.mxu3 %v7941_v33  ;;  %v8226_v40 = vld [vmem:[#allocation12 + $0x154] sm:$0xf]  ;;  %v7049_v33 = vor.u32 %v8434_v3, %v7046_v38 }
 0x301   : > { %v8518_v56 = vld [vmem:[#allocation12 + $0xa6c] sm:$0xf0]  ;;  %v6214_v28 = vld [vmem:[#allocation12 + $0x170] sm:$0xf0] }
 0x302   : > { %v7652_v41 = vld [vmem:[#allocation12 + $0xc90] sm:$0xf]  ;;  %v7365_v61 = vor.u32 %v8518_v56, %v7364_v37  ;;  %4981 = vmatpush.bf16.msra.mxu0 %v7109_v59  ;;  %v8290_v37 = vld [vmem:[#allocation12 + $0x354] sm:$0xf] }
 0x303   : > { %v8590_v52 = vld [vmem:[#allocation12 + $0xcac] sm:$0xf0]  ;;  %v6470_v56 = vld [vmem:[#allocation12 + $0x370] sm:$0xf0] }
 0x304   : > { %v7908_v54 = vld [vmem:[#allocation12 + $0xe90] sm:$0xf]  ;;  %v7653_v7 = vor.u32 %v8590_v52, %v7652_v41  ;;  %4994 = vmatpush.bf16.msra.mxu1 %v7365_v61  ;;  %v8362_v41 = vld [vmem:[#allocation12 + $0x594] sm:$0xf] }
 0x305   : > { %v8654_v10 = vld [vmem:[#allocation12 + $0xeac] sm:$0xf0]  ;;  %v7014_v52 = vld [vmem:[#allocation12 + $0x7b0] sm:$0xf0]  ;;  %v6761_v61 = vor.u32 %v8362_v41, %v6758_v9  ;;  %v4802_v9 = vpop.f32.mrf.mxu2 }
 0x306   : > { %v7076_v63 = vld [vmem:[#allocation12 + $0x810] sm:$0xf]  ;;  %v7909_v8 = vor.u32 %v8654_v10, %v7908_v54  ;;  %5006 = vmatpush.bf16.msra.mxu2 %v7653_v7  ;;  %v6217_v54 = vor.u32 %v8226_v40, %v6214_v28  ;;  %v6473_v10 = vor.u32 %v8290_v37, %v6470_v56  ;;  %v6182_v59 = vld [vmem:[#allocation12 + $0x130] sm:$0xf0] }
 0x307   : > { %v8446_v1 = vld [vmem:[#allocation12 + $0x82c] sm:$0xf0]  ;;  %v8354_v7 = vld [vmem:[#allocation12 + $0x554] sm:$0xf] }
 0x308   : > { %v7332_v5 = vld [vmem:[#allocation12 + $0xa10] sm:$0xf]  ;;  %v7077_v45 = vor.u32 %v8446_v1, %v7076_v63  ;;  %5019 = vmatpush.bf16.msra.mxu3 %v7909_v8  ;;  %v7017_v63 = vor.u32 %v8426_v31, %v7014_v52  ;;  %v8282_v1 = vld [vmem:[#allocation12 + $0x314] sm:$0xf]  ;;  %v4776_v8 = vpop.f32.mrf.mxu0  ;;  %v4815_v31 = vpop.f32.mrf.mxu3 }
 0x309   : > { %v8510_v12 = vld [vmem:[#allocation12 + $0xa2c] sm:$0xf0]  ;;  %v4777_v62 = vadd.f32 %v4776_v8, %v9772_v6  ;;  %v6694_v23 = vld [vmem:[#allocation12 + $0x530] sm:$0xf0] }
 0x30a   : > { %v7620_v39 = vld [vmem:[#allocation12 + $0xc50] sm:$0xf]  ;;  %v7333_v16 = vor.u32 %v8510_v12, %v7332_v5  ;;  %4982 = vmatpush.bf16.msra.mxu0 %v7077_v45  ;;  %v6438_v5 = vld [vmem:[#allocation12 + $0x330] sm:$0xf0]  ;;  %v4789_v12 = vpop.f32.mrf.mxu1 }
 0x30b   : > { %v8582_v14 = vld [vmem:[#allocation12 + $0xc6c] sm:$0xf0]  ;;  %v4790_v45 = vadd.f32 %v4789_v12, %v4777_v62  ;;  %v6118_v49 = vld [vmem:[#allocation12 + $0xb0] sm:$0xf0] }
 0x30c   : > { %v7876_v15 = vld [vmem:[#allocation12 + $0xe50] sm:$0xf]  ;;  %v7621_v46 = vor.u32 %v8582_v14, %v7620_v39  ;;  %4995 = vmatpush.bf16.msra.mxu1 %v7333_v16  ;;  %v6185_v39 = vor.u32 %v8218_v57, %v6182_v59  ;;  %v6441_v14 = vor.u32 %v8282_v1, %v6438_v5  ;;  %v6729_v16 = vor.u32 %v8354_v7, %v6726_v13  ;;  %v8338_v36 = vld [vmem:[#allocation12 + $0x4d4] sm:$0xf] }
 0x30d   : > { %v8646_v11 = vld [vmem:[#allocation12 + $0xe6c] sm:$0xf0]  ;;  %4983 = vmatmul.bf16.vlgmr.msra.gmra.mxu0 %v9720_v2  ;;  %v6662_v38 = vld [vmem:[#allocation12 + $0x4f0] sm:$0xf0]  ;;  %v4803_v57 = vadd.f32 %v4802_v9, %v4790_v45 }
 0x30e   : > { %v7877_v25 = vor.u32 %v8646_v11, %v7876_v15  ;;  %v7588_v20 = vld [vmem:[#allocation12 + $0xc10] sm:$0xf]  ;;  %5027 = vmatpush.bf16.msrb.mxu0 %v6281_v53  ;;  %5007 = vmatpush.bf16.msra.mxu2 %v7621_v46  ;;  %v8210_v15 = vld [vmem:[#allocation12 + $0xd4] sm:$0xf]  ;;  %v6985_v53 = vor.u32 %v8418_v22, %v6982_v24 }
 0x30f   : > { %v8574_v32 = vld [vmem:[#allocation12 + $0xc2c] sm:$0xf0]  ;;  %4996 = vmatmul.bf16.vlgmr.msra.gmra.mxu1 %v9722_v55  ;;  %v6150_v11 = vld [vmem:[#allocation12 + $0xf0] sm:$0xf0]  ;;  %v9779_v7 = vadd.f32 %v4815_v31, %v4803_v57 }
 0x310   : > { %v7844_v30 = vld [vmem:[#allocation12 + $0xe10] sm:$0xf]  ;;  %5040 = vmatpush.bf16.msrb.mxu1 %v6537_v19  ;;  %5020 = vmatpush.bf16.msra.mxu3 %v7877_v25  ;;  %v7589_v47 = vor.u32 %v8574_v32, %v7588_v20  ;;  %v8274_v19 = vld [vmem:[#allocation12 + $0x2d4] sm:$0xf]  ;;  %v6153_v6 = vor.u32 %v8210_v15, %v6150_v11  ;;  %v6697_v20 = vor.u32 %v8346_v42, %v6694_v23  ;;  %v4778_v50 = vpop.f32.mrf.mxu0 }
 0x311   : > { %v8638_v34 = vld [vmem:[#allocation12 + $0xe2c] sm:$0xf0]  ;;  %v8410_v46 = vld [vmem:[#allocation12 + $0x714] sm:$0xf]  ;;  %v6409_v17 = vor.u32 %v8274_v19, %v6406_v21 }
 0x312   : > { %v7845_v48 = vor.u32 %v8638_v34, %v7844_v30  ;;  %5028 = vmatpush.bf16.msrb.mxu0 %v6249_v43  ;;  %5008 = vmatpush.bf16.msra.mxu2 %v7589_v47  ;;  %v6950_v25 = vld [vmem:[#allocation12 + $0x730] sm:$0xf0]  ;;  %v4791_v3 = vpop.f32.mrf.mxu1  ;;  %v6121_v47 = vor.u32 %v8202_v60, %v6118_v49  ;;  %v4817_v60 = vpop.f32.mrf.mxu3 }
 0x313   : > { %v6953_v32 = vor.u32 %v8410_v46, %v6950_v25  ;;  %v8266_v30 = vld [vmem:[#allocation12 + $0x294] sm:$0xf] }
 0x314   : > { %5041 = vmatpush.bf16.msrb.mxu1 %v6505_v44  ;;  %5021 = vmatpush.bf16.msra.mxu3 %v7845_v48  ;;  %v6374_v34 = vld [vmem:[#allocation12 + $0x2b0] sm:$0xf0] }
 0x315   : > { %5009 = vmatmul.bf16.vlgmr.msra.gmra.mxu2 %v9726_v35  ;;  %v8402_v43 = vld [vmem:[#allocation12 + $0x6d4] sm:$0xf]  ;;  %v6377_v48 = vor.u32 %v8266_v30, %v6374_v34 }
 0x316   : > { %5053 = vmatpush.bf16.msrb.mxu2 %v6793_v51  ;;  %5029 = vmatpush.bf16.msrb.mxu0 %v6217_v54  ;;  %v6918_v44 = vld [vmem:[#allocation12 + $0x6f0] sm:$0xf0]  ;;  %v6665_v51 = vor.u32 %v8338_v36, %v6662_v38 }
 0x317   : > { %5022 = vmatmul.bf16.vlgmr.msra.gmra.mxu3 %v9728_v18  ;;  %v8194_v40 = vld [vmem:[#allocation12 + $0x54] sm:$0xf] }
 0x318   : > { %5066 = vmatpush.bf16.msrb.mxu3 %v7049_v33  ;;  %5042 = vmatpush.bf16.msrb.mxu1 %v6473_v10  ;;  %v6086_v28 = vld [vmem:[#allocation12 + $0x70] sm:$0xf0]  ;;  %v6921_v33 = vor.u32 %v8402_v43, %v6918_v44 }
 0x319   : > { %v8258_v37 = vld [vmem:[#allocation12 + $0x254] sm:$0xf]  ;;  %v6089_v59 = vor.u32 %v8194_v40, %v6086_v28 }
 0x31a   : > { %5054 = vmatpush.bf16.msrb.mxu2 %v6761_v61  ;;  %5030 = vmatpush.bf16.msrb.mxu0 %v6185_v39  ;;  %v6342_v56 = vld [vmem:[#allocation12 + $0x270] sm:$0xf0] }
 0x31b   : > { %v8330_v41 = vld [vmem:[#allocation12 + $0x494] sm:$0xf]  ;;  %v6345_v61 = vor.u32 %v8258_v37, %v6342_v56 }
 0x31c   : > { %5067 = vmatpush.bf16.msrb.mxu3 %v7017_v63  ;;  %5043 = vmatpush.bf16.msrb.mxu1 %v6441_v14  ;;  %v6630_v52 = vld [vmem:[#allocation12 + $0x4b0] sm:$0xf0] }
 0x31d   : > { %v8394_v54 = vld [vmem:[#allocation12 + $0x694] sm:$0xf]  ;;  %v6633_v8 = vor.u32 %v8330_v41, %v6630_v52 }
 0x31e   : > { %5055 = vmatpush.bf16.msrb.mxu2 %v6729_v16  ;;  %5031 = vmatpush.bf16.msrb.mxu0 %v6153_v6  ;;  %v6886_v10 = vld [vmem:[#allocation12 + $0x6b0] sm:$0xf0] }
 0x31f   : > { %v8186_v63 = vld [vmem:[#allocation12 + $0x14] sm:$0xf]  ;;  %v6889_v12 = vor.u32 %v8394_v54, %v6886_v10  ;;  %v9783_v54 = vld [vmem:[#allocation14] sm:$0xff] }
 0x320   : > { %5068 = vmatpush.bf16.msrb.mxu3 %v6985_v53  ;;  %5044 = vmatpush.bf16.msrb.mxu1 %v6409_v17  ;;  %v6054_v1 = vld [vmem:[#allocation12 + $0x30] sm:$0xf0]  ;;  %v4804_v17 = vpop.f32.mrf.mxu2  ;;  %v4494_v10 = vperm.slane %v9783_v54, 3 }
 0x321   : > { %v8250_v5 = vld [vmem:[#allocation12 + $0x214] sm:$0xf]  ;;  %v6057_v16 = vor.u32 %v8186_v63, %v6054_v1 }
 0x322   : > { %5056 = vmatpush.bf16.msrb.mxu2 %v6697_v20  ;;  %5032 = vmatpush.bf16.msrb.mxu0 %v6121_v47  ;;  %v6310_v13 = vld [vmem:[#allocation12 + $0x230] sm:$0xf0] }
 0x323   : > { %v8498_v22 = vld [vmem:[#allocation12 + $0x9d4] sm:$0xf]  ;;  %v6313_v53 = vor.u32 %v8250_v5, %v6310_v13 }
 0x324   : > { %5069 = vmatpush.bf16.msrb.mxu3 %v6953_v32  ;;  %5045 = vmatpush.bf16.msrb.mxu1 %v6377_v48  ;;  %v7302_v24 = vld [vmem:[#allocation12 + $0x9f0] sm:$0xf0] }
 0x325   : > { %v8562_v62 = vld [vmem:[#allocation12 + $0xbd4] sm:$0xf]  ;;  %v7305_v19 = vor.u32 %v8498_v22, %v7302_v24  ;;  %v4828_v22 = vpop.f32.mrf.mxu0  ;;  %v4841_v24 = vpop.f32.mrf.mxu1 }
 0x326   : > { %5057 = vmatpush.bf16.msrb.mxu2 %v6665_v51  ;;  %v7558_v39 = vld [vmem:[#allocation12 + $0xbf0] sm:$0xf0]  ;;  %5033 = vmatpush.bf16.msrb.mxu0 %v6089_v59 }
 0x327   : > { %v8322_v14 = vld [vmem:[#allocation12 + $0x454] sm:$0xf]  ;;  %v7561_v21 = vor.u32 %v8562_v62, %v7558_v39 }
 0x328   : > { %5070 = vmatpush.bf16.msrb.mxu3 %v6921_v33  ;;  %v6598_v15 = vld [vmem:[#allocation12 + $0x470] sm:$0xf0]  ;;  %5046 = vmatpush.bf16.msrb.mxu1 %v6345_v61 }
 0x329   : > { %v8386_v11 = vld [vmem:[#allocation12 + $0x654] sm:$0xf]  ;;  %v6601_v25 = vor.u32 %v8322_v14, %v6598_v15  ;;  %v4829_v15 = vadd.f32 %v4828_v22, %v4494_v10  ;;  %v4854_v10 = vpop.f32.mrf.mxu2 }
 0x32a   : > { %v6854_v45 = vld [vmem:[#allocation12 + $0x670] sm:$0xf0]  ;;  %5058 = vmatpush.bf16.msrb.mxu2 %v6633_v8  ;;  %5034 = vmatpush.bf16.msrb.mxu0 %v6057_v16 }
 0x32b   : > { %v8490_v42 = vld [vmem:[#allocation12 + $0x994] sm:$0xf]  ;;  %v6857_v6 = vor.u32 %v8386_v11, %v6854_v45 }
 0x32c   : > { %5071 = vmatpush.bf16.msrb.mxu3 %v6889_v12  ;;  %v7270_v23 = vld [vmem:[#allocation12 + $0x9b0] sm:$0xf0]  ;;  %5047 = vmatpush.bf16.msrb.mxu1 %v6313_v53 }
 0x32d   : > { %v8554_v46 = vld [vmem:[#allocation12 + $0xb94] sm:$0xf]  ;;  %v7273_v43 = vor.u32 %v8490_v42, %v7270_v23  ;;  %5035 = vmatmul.bf16.vlgmr.msrb.gmra.mxu0 %v9704_v29 }
 0x32e   : > { %v7526_v49 = vld [vmem:[#allocation12 + $0xbb0] sm:$0xf0]  ;;  %5079 = vmatpush.bf16.msra.mxu0 %v7305_v19  ;;  %5059 = vmatpush.bf16.msrb.mxu2 %v6601_v25  ;;  %v4842_v19 = vadd.f32 %v4841_v24, %v4829_v15  ;;  %v6284_v15 = vld [vmem:[#allocation12 + $0x1d8] sm:$0xf] }
 0x32f   : > { %v8314_v20 = vld [vmem:[#allocation12 + $0x414] sm:$0xf]  ;;  %v7529_v44 = vor.u32 %v8554_v46, %v7526_v49  ;;  %5048 = vmatmul.bf16.vlgmr.msrb.gmra.mxu1 %v9706_v0 }
 0x330   : > { %v6566_v32 = vld [vmem:[#allocation12 + $0x430] sm:$0xf0]  ;;  %5092 = vmatpush.bf16.msra.mxu1 %v7561_v21  ;;  %5072 = vmatpush.bf16.msrb.mxu3 %v6857_v6 }
 0x331   : > { %v8378_v30 = vld [vmem:[#allocation12 + $0x614] sm:$0xf]  ;;  %v6569_v47 = vor.u32 %v8314_v20, %v6566_v32 }
 0x332   : > { %v6822_v34 = vld [vmem:[#allocation12 + $0x630] sm:$0xf0]  ;;  %5080 = vmatpush.bf16.msra.mxu0 %v7273_v43  ;;  %v4830_v43 = vpop.f32.mrf.mxu0 }
 0x333   : > { %v8626_v36 = vld [vmem:[#allocation12 + $0xdd4] sm:$0xf]  ;;  %v6825_v48 = vor.u32 %v8378_v30, %v6822_v34  ;;  %5060 = vmatpush.bf16.msrb.mxu2 %v6569_v47 }
 0x334   : > { %v7814_v50 = vld [vmem:[#allocation12 + $0xdf0] sm:$0xf0]  ;;  %5093 = vmatpush.bf16.msra.mxu1 %v7529_v44  ;;  %v4843_v44 = vpop.f32.mrf.mxu1 }
 0x335   : > { %v8690_v3 = vld [vmem:[#allocation12 + $0xfd4] sm:$0xf]  ;;  %v7817_v51 = vor.u32 %v8626_v36, %v7814_v50  ;;  %5073 = vmatpush.bf16.msrb.mxu3 %v6825_v48  ;;  %v6796_v44 = vld [vmem:[#allocation12 + $0x5d8] sm:$0xf] }
 0x336   : > { %v8070_v38 = vld [vmem:[#allocation12 + $0xff0] sm:$0xf0]  ;;  %5061 = vmatmul.bf16.vlgmr.msrb.gmra.mxu2 %v9711_v26 }
 0x337   : > { %v8482_v40 = vld [vmem:[#allocation12 + $0x954] sm:$0xf]  ;;  %v8073_v33 = vor.u32 %v8690_v3, %v8070_v38  ;;  %5105 = vmatpush.bf16.msra.mxu2 %v7817_v51 }
 0x338   : > { %v7238_v28 = vld [vmem:[#allocation12 + $0x970] sm:$0xf0]  ;;  %5074 = vmatmul.bf16.vlgmr.msrb.gmra.mxu3 %v9713_v27 }
 0x339   : > { %v8546_v37 = vld [vmem:[#allocation12 + $0xb54] sm:$0xf]  ;;  %v7241_v57 = vor.u32 %v8482_v40, %v7238_v28  ;;  %5118 = vmatpush.bf16.msra.mxu3 %v8073_v33 }
 0x33a   : > { %v7494_v56 = vld [vmem:[#allocation12 + $0xb70] sm:$0xf0] }
 0x33b   : > { %v8618_v41 = vld [vmem:[#allocation12 + $0xd94] sm:$0xf]  ;;  %v7497_v59 = vor.u32 %v8546_v37, %v7494_v56  ;;  %5081 = vmatpush.bf16.msra.mxu0 %v7241_v57  ;;  %v4867_v57 = vpop.f32.mrf.mxu3 }
 0x33c   : > { %v7782_v9 = vld [vmem:[#allocation12 + $0xdb0] sm:$0xf0] }
 0x33d   : > { %v8682_v31 = vld [vmem:[#allocation12 + $0xf94] sm:$0xf]  ;;  %v7785_v1 = vor.u32 %v8618_v41, %v7782_v9  ;;  %5094 = vmatpush.bf16.msra.mxu1 %v7497_v59 }
 0x33e   : > { %v8038_v52 = vld [vmem:[#allocation12 + $0xfb0] sm:$0xf0] }
 0x33f   : > { %v8474_v61 = vld [vmem:[#allocation12 + $0x914] sm:$0xf]  ;;  %v8041_v5 = vor.u32 %v8682_v31, %v8038_v52  ;;  %5106 = vmatpush.bf16.msra.mxu2 %v7785_v1  ;;  %v4855_v1 = vadd.f32 %v4854_v10, %v4842_v19  ;;  %v8295_v10 = vld [vmem:[#allocation12 + $0x374] sm:$0xf0] }
 0x340   : > { %v7206_v63 = vld [vmem:[#allocation12 + $0x930] sm:$0xf0] }
 0x341   : > { %v8538_v8 = vld [vmem:[#allocation12 + $0xb14] sm:$0xf]  ;;  %v7209_v11 = vor.u32 %v8474_v61, %v7206_v63  ;;  %5119 = vmatpush.bf16.msra.mxu3 %v8041_v5  ;;  %v9788_v24 = vadd.f32 %v4867_v57, %v4855_v1  ;;  %v6764_v57 = vld [vmem:[#allocation12 + $0x598] sm:$0xf] }
 0x342   : > { %v7462_v12 = vld [vmem:[#allocation12 + $0xb30] sm:$0xf0] }
 0x343   : > { %v8610_v13 = vld [vmem:[#allocation12 + $0xd54] sm:$0xf]  ;;  %v7465_v45 = vor.u32 %v8538_v8, %v7462_v12  ;;  %5082 = vmatpush.bf16.msra.mxu0 %v7209_v11  ;;  %v8247_v11 = vld [vmem:[#allocation12 + $0x1f4] sm:$0xf0] }
 0x344   : > { %v7750_v62 = vld [vmem:[#allocation12 + $0xd70] sm:$0xf0] }
 0x345   : > { %v8674_v39 = vld [vmem:[#allocation12 + $0xf54] sm:$0xf]  ;;  %v7753_v21 = vor.u32 %v8610_v13, %v7750_v62  ;;  %5095 = vmatpush.bf16.msra.mxu1 %v7465_v45  ;;  %v6540_v45 = vld [vmem:[#allocation12 + $0x3d8] sm:$0xf] }
 0x346   : > { %v8006_v14 = vld [vmem:[#allocation12 + $0xf70] sm:$0xf0] }
 0x347   : > { %v8466_v16 = vld [vmem:[#allocation12 + $0x8d4] sm:$0xf]  ;;  %v8009_v42 = vor.u32 %v8674_v39, %v8006_v14  ;;  %5107 = vmatpush.bf16.msra.mxu2 %v7753_v21 }
 0x348   : > { %v7174_v53 = vld [vmem:[#allocation12 + $0x8f0] sm:$0xf0] }
 0x349   : > { %v8530_v23 = vld [vmem:[#allocation12 + $0xad4] sm:$0xf]  ;;  %v7177_v49 = vor.u32 %v8466_v16, %v7174_v53  ;;  %5120 = vmatpush.bf16.msra.mxu3 %v8009_v42  ;;  %v8311_v16 = vld [vmem:[#allocation12 + $0x3f4] sm:$0xf0] }
 0x34a   : > { %v7430_v46 = vld [vmem:[#allocation12 + $0xaf0] sm:$0xf0] }
 0x34b   : > { %v8602_v25 = vld [vmem:[#allocation12 + $0xd14] sm:$0xf]  ;;  %v7433_v20 = vor.u32 %v8530_v23, %v7430_v46  ;;  %5083 = vmatpush.bf16.msra.mxu0 %v7177_v49  ;;  %v6508_v49 = vld [vmem:[#allocation12 + $0x398] sm:$0xf] }
 0x34c   : > { %v7718_v6 = vld [vmem:[#allocation12 + $0xd30] sm:$0xf0] }
 0x34d   : > { %v8666_v17 = vld [vmem:[#allocation12 + $0xf14] sm:$0xf]  ;;  %v7721_v34 = vor.u32 %v8602_v25, %v7718_v6  ;;  %5096 = vmatpush.bf16.msra.mxu1 %v7433_v20  ;;  %v6285_v25 = vor.u32 %v8247_v11, %v6284_v15  ;;  %v6541_v6 = vor.u32 %v8311_v16, %v6540_v45  ;;  %v4880_v15 = vpop.f32.mrf.mxu0  ;;  %v4893_v11 = vpop.f32.mrf.mxu1  ;;  %v8359_v45 = vld [vmem:[#allocation12 + $0x574] sm:$0xf0] }
 0x34e   : > { %v7974_v60 = vld [vmem:[#allocation12 + $0xf30] sm:$0xf0]  ;;  %v6988_v16 = vld [vmem:[#allocation12 + $0x758] sm:$0xf] }
 0x34f   : > { %v8458_v32 = vld [vmem:[#allocation12 + $0x894] sm:$0xf]  ;;  %v7977_v36 = vor.u32 %v8666_v17, %v7974_v60  ;;  %5108 = vmatpush.bf16.msra.mxu2 %v7721_v34  ;;  %v6252_v17 = vld [vmem:[#allocation12 + $0x198] sm:$0xf]  ;;  %v4869_v34 = vpop.f32.mrf.mxu3 }
 0x350   : > { %v7142_v30 = vld [vmem:[#allocation12 + $0x8b0] sm:$0xf0]  ;;  %v8239_v60 = vld [vmem:[#allocation12 + $0x1b4] sm:$0xf0] }
 0x351   : > { %v8522_v50 = vld [vmem:[#allocation12 + $0xa94] sm:$0xf]  ;;  %v7145_v28 = vor.u32 %v8458_v32, %v7142_v30  ;;  %5121 = vmatpush.bf16.msra.mxu3 %v7977_v36  ;;  %v4856_v30 = vpop.f32.mrf.mxu2  ;;  %v8303_v36 = vld [vmem:[#allocation12 + $0x3b4] sm:$0xf0] }
 0x352   : > { %v7398_v3 = vld [vmem:[#allocation12 + $0xab0] sm:$0xf0]  ;;  %v6956_v30 = vld [vmem:[#allocation12 + $0x718] sm:$0xf] }
 0x353   : > { %v8594_v38 = vld [vmem:[#allocation12 + $0xcd4] sm:$0xf]  ;;  %v7401_v51 = vor.u32 %v8522_v50, %v7398_v3  ;;  %5084 = vmatpush.bf16.msra.mxu0 %v7145_v28  ;;  %v6253_v28 = vor.u32 %v8239_v60, %v6252_v17  ;;  %v6412_v60 = vld [vmem:[#allocation12 + $0x2d8] sm:$0xf] }
 0x354   : > { %v7686_v47 = vld [vmem:[#allocation12 + $0xcf0] sm:$0xf0]  ;;  %v8415_v34 = vld [vmem:[#allocation12 + $0x734] sm:$0xf0] }
 0x355   : > { %v8658_v48 = vld [vmem:[#allocation12 + $0xed4] sm:$0xf]  ;;  %v7689_v56 = vor.u32 %v8594_v38, %v7686_v47  ;;  %5097 = vmatpush.bf16.msra.mxu1 %v7401_v51  ;;  %v8375_v47 = vld [vmem:[#allocation12 + $0x5f4] sm:$0xf0]  ;;  %v6509_v51 = vor.u32 %v8303_v36, %v6508_v49 }
 0x356   : > { %v7942_v40 = vld [vmem:[#allocation12 + $0xef0] sm:$0xf0]  ;;  %v8279_v49 = vld [vmem:[#allocation12 + $0x2f4] sm:$0xf0] }
 0x357   : > { %v8450_v33 = vld [vmem:[#allocation12 + $0x854] sm:$0xf]  ;;  %v7945_v41 = vor.u32 %v8658_v48, %v7942_v40  ;;  %5109 = vmatpush.bf16.msra.mxu2 %v7689_v56  ;;  %v7052_v48 = vld [vmem:[#allocation12 + $0x7d8] sm:$0xf]  ;;  %v6413_v36 = vor.u32 %v8279_v49, %v6412_v60 }
 0x358   : > { %v7110_v37 = vld [vmem:[#allocation12 + $0x870] sm:$0xf0]  ;;  %v8439_v40 = vld [vmem:[#allocation12 + $0x7f4] sm:$0xf0] }
 0x359   : > { %v8514_v9 = vld [vmem:[#allocation12 + $0xa54] sm:$0xf]  ;;  %v7113_v5 = vor.u32 %v8450_v33, %v7110_v37  ;;  %5122 = vmatpush.bf16.msra.mxu3 %v7945_v41  ;;  %v6220_v56 = vld [vmem:[#allocation12 + $0x158] sm:$0xf] }
 0x35a   : > { %v7366_v31 = vld [vmem:[#allocation12 + $0xa70] sm:$0xf0]  ;;  %v8231_v41 = vld [vmem:[#allocation12 + $0x174] sm:$0xf0] }
 0x35b   : > { %v8586_v52 = vld [vmem:[#allocation12 + $0xc94] sm:$0xf]  ;;  %v7369_v8 = vor.u32 %v8514_v9, %v7366_v31  ;;  %5085 = vmatpush.bf16.msra.mxu0 %v7113_v5  ;;  %v6797_v9 = vor.u32 %v8375_v47, %v6796_v44  ;;  %v7053_v31 = vor.u32 %v8439_v40, %v7052_v48  ;;  %v6221_v1 = vor.u32 %v8231_v41, %v6220_v56  ;;  %v6380_v44 = vld [vmem:[#allocation12 + $0x298] sm:$0xf]  ;;  %v4882_v40 = vpop.f32.mrf.mxu0 }
 0x35c   : > { %v7654_v59 = vld [vmem:[#allocation12 + $0xcb0] sm:$0xf0]  ;;  %v8271_v47 = vld [vmem:[#allocation12 + $0x2b4] sm:$0xf0] }
 0x35d   : > { %v8650_v61 = vld [vmem:[#allocation12 + $0xe94] sm:$0xf]  ;;  %v7657_v62 = vor.u32 %v8586_v52, %v7654_v59  ;;  %5098 = vmatpush.bf16.msra.mxu1 %v7369_v8  ;;  %v6476_v52 = vld [vmem:[#allocation12 + $0x358] sm:$0xf]  ;;  %v6381_v41 = vor.u32 %v8271_v47, %v6380_v44 }
 0x35e   : > { %v7910_v63 = vld [vmem:[#allocation12 + $0xeb0] sm:$0xf0]  ;;  %v8367_v59 = vld [vmem:[#allocation12 + $0x5b4] sm:$0xf0]  ;;  %v6477_v5 = vor.u32 %v8295_v10, %v6476_v52 }
 0x35f   : > { %v8442_v12 = vld [vmem:[#allocation12 + $0x814] sm:$0xf]  ;;  %v7913_v39 = vor.u32 %v8650_v61, %v7910_v63  ;;  %5110 = vmatpush.bf16.msra.mxu2 %v7657_v62  ;;  %v7020_v61 = vld [vmem:[#allocation12 + $0x798] sm:$0xf] }
 0x360   : > { %v7078_v13 = vld [vmem:[#allocation12 + $0x830] sm:$0xf0]  ;;  %v8431_v63 = vld [vmem:[#allocation12 + $0x7b4] sm:$0xf0] }
 0x361   : > { %v8506_v22 = vld [vmem:[#allocation12 + $0xa14] sm:$0xf]  ;;  %v7081_v23 = vor.u32 %v8442_v12, %v7078_v13  ;;  %5123 = vmatpush.bf16.msra.mxu3 %v7913_v39  ;;  %v6188_v8 = vld [vmem:[#allocation12 + $0x118] sm:$0xf]  ;;  %v6765_v13 = vor.u32 %v8367_v59, %v6764_v57 }
 0x362   : > { %v7334_v14 = vld [vmem:[#allocation12 + $0xa30] sm:$0xf0]  ;;  %v8223_v12 = vld [vmem:[#allocation12 + $0x134] sm:$0xf0] }
 0x363   : > { %v8578_v53 = vld [vmem:[#allocation12 + $0xc54] sm:$0xf]  ;;  %v7337_v46 = vor.u32 %v8506_v22, %v7334_v14  ;;  %5086 = vmatpush.bf16.msra.mxu0 %v7081_v23  ;;  %v7021_v22 = vor.u32 %v8431_v63, %v7020_v61  ;;  %v6444_v62 = vld [vmem:[#allocation12 + $0x318] sm:$0xf]  ;;  %v4906_v63 = vpop.f32.mrf.mxu2 }
 0x364   : > { %v7622_v19 = vld [vmem:[#allocation12 + $0xc70] sm:$0xf0]  ;;  %v8287_v39 = vld [vmem:[#allocation12 + $0x334] sm:$0xf0] }
 0x365   : > { %v8642_v21 = vld [vmem:[#allocation12 + $0xe54] sm:$0xf]  ;;  %v7625_v20 = vor.u32 %v8578_v53, %v7622_v19  ;;  %5099 = vmatpush.bf16.msra.mxu1 %v7337_v46  ;;  %v6732_v14 = vld [vmem:[#allocation12 + $0x558] sm:$0xf]  ;;  %v4881_v19 = vadd.f32 %v4880_v15, %v9788_v24 }
 0x366   : > { %v7878_v42 = vld [vmem:[#allocation12 + $0xe70] sm:$0xf0]  ;;  %5087 = vmatmul.bf16.vlgmr.msra.gmra.mxu0 %v9720_v2  ;;  %v8423_v53 = vld [vmem:[#allocation12 + $0x774] sm:$0xf0] }
 0x367   : > { %v7881_v32 = vor.u32 %v8642_v21, %v7878_v42  ;;  %v8570_v50 = vld [vmem:[#allocation12 + $0xc14] sm:$0xf]  ;;  %5131 = vmatpush.bf16.msrb.mxu0 %v6285_v25  ;;  %5111 = vmatpush.bf16.msra.mxu2 %v7625_v20  ;;  %v6189_v21 = vor.u32 %v8223_v12, %v6188_v8  ;;  %v6445_v42 = vor.u32 %v8287_v39, %v6444_v62  ;;  %v6156_v23 = vld [vmem:[#allocation12 + $0xd8] sm:$0xf] }
 0x368   : > { %v7590_v3 = vld [vmem:[#allocation12 + $0xc30] sm:$0xf0]  ;;  %5100 = vmatmul.bf16.vlgmr.msra.gmra.mxu1 %v9722_v55  ;;  %v8215_v46 = vld [vmem:[#allocation12 + $0xf4] sm:$0xf0]  ;;  %v4894_v25 = vadd.f32 %v4893_v11, %v4881_v19  ;;  %v6989_v17 = vor.u32 %v8423_v53, %v6988_v16 }
 0x369   : > { %v8634_v38 = vld [vmem:[#allocation12 + $0xe14] sm:$0xf]  ;;  %5144 = vmatpush.bf16.msrb.mxu1 %v6541_v6  ;;  %5124 = vmatpush.bf16.msra.mxu3 %v7881_v32  ;;  %v7593_v33 = vor.u32 %v8570_v50, %v7590_v3  ;;  %v6733_v6 = vor.u32 %v8359_v45, %v6732_v14  ;;  %v6700_v20 = vld [vmem:[#allocation12 + $0x518] sm:$0xf]  ;;  %v6157_v24 = vor.u32 %v8215_v46, %v6156_v23 }
 0x36a   : > { %v7846_v43 = vld [vmem:[#allocation12 + $0xe30] sm:$0xf0]  ;;  %v8351_v32 = vld [vmem:[#allocation12 + $0x534] sm:$0xf0] }
 0x36b   : > { %v7849_v37 = vor.u32 %v8634_v38, %v7846_v43  ;;  %5132 = vmatpush.bf16.msrb.mxu0 %v6253_v28  ;;  %5112 = vmatpush.bf16.msra.mxu2 %v7593_v33  ;;  %v6124_v50 = vld [vmem:[#allocation12 + $0x98] sm:$0xf]  ;;  %v6701_v38 = vor.u32 %v8351_v32, %v6700_v20  ;;  %v6957_v43 = vor.u32 %v8415_v34, %v6956_v30  ;;  %v4895_v28 = vpop.f32.mrf.mxu1 }
 0x36c   : > { %v8207_v3 = vld [vmem:[#allocation12 + $0xb4] sm:$0xf0] }
 0x36d   : > { %5145 = vmatpush.bf16.msrb.mxu1 %v6509_v51  ;;  %5125 = vmatpush.bf16.msra.mxu3 %v7849_v37  ;;  %v6668_v48 = vld [vmem:[#allocation12 + $0x4d8] sm:$0xf]  ;;  %v6125_v56 = vor.u32 %v8207_v3, %v6124_v50  ;;  %v4908_v3 = vpop.f32.mrf.mxu2 }
 0x36e   : > { %5113 = vmatmul.bf16.vlgmr.msra.gmra.mxu2 %v9726_v35  ;;  %v8343_v51 = vld [vmem:[#allocation12 + $0x4f4] sm:$0xf0] }
 0x36f   : > { %5157 = vmatpush.bf16.msrb.mxu2 %v6797_v9  ;;  %5133 = vmatpush.bf16.msrb.mxu0 %v6221_v1  ;;  %v6924_v33 = vld [vmem:[#allocation12 + $0x6d8] sm:$0xf]  ;;  %v6669_v52 = vor.u32 %v8343_v51, %v6668_v48  ;;  %v4919_v1 = vpop.f32.mrf.mxu3 }
 0x370   : > { %5126 = vmatmul.bf16.vlgmr.msra.gmra.mxu3 %v9728_v18  ;;  %v8407_v37 = vld [vmem:[#allocation12 + $0x6f4] sm:$0xf0] }
 0x371   : > { %5170 = vmatpush.bf16.msrb.mxu3 %v7053_v31  ;;  %5146 = vmatpush.bf16.msrb.mxu1 %v6477_v5  ;;  %v6092_v9 = vld [vmem:[#allocation12 + $0x58] sm:$0xf]  ;;  %v6925_v10 = vor.u32 %v8407_v37, %v6924_v33 }
 0x372   : > { %v8199_v31 = vld [vmem:[#allocation12 + $0x74] sm:$0xf0] }
 0x373   : > { %5158 = vmatpush.bf16.msrb.mxu2 %v6765_v13  ;;  %5134 = vmatpush.bf16.msrb.mxu0 %v6189_v21  ;;  %v6348_v57 = vld [vmem:[#allocation12 + $0x258] sm:$0xf]  ;;  %v4907_v13 = vadd.f32 %v4906_v63, %v4894_v25 }
 0x374   : > { %v8263_v59 = vld [vmem:[#allocation12 + $0x274] sm:$0xf0] }
 0x375   : > { %5171 = vmatpush.bf16.msrb.mxu3 %v7021_v22  ;;  %5147 = vmatpush.bf16.msrb.mxu1 %v6445_v42  ;;  %v6636_v61 = vld [vmem:[#allocation12 + $0x498] sm:$0xf]  ;;  %v6093_v22 = vor.u32 %v8199_v31, %v6092_v9  ;;  %v6349_v62 = vor.u32 %v8263_v59, %v6348_v57  ;;  %v9795_v11 = vadd.f32 %v4919_v1, %v4907_v13  ;;  %v4495_v13 = vperm.slane %v9783_v54, 4 }
 0x376   : > { %v8335_v5 = vld [vmem:[#allocation12 + $0x4b4] sm:$0xf0] }
 0x377   : > { %5159 = vmatpush.bf16.msrb.mxu2 %v6733_v6  ;;  %5135 = vmatpush.bf16.msrb.mxu0 %v6157_v24  ;;  %v6892_v8 = vld [vmem:[#allocation12 + $0x698] sm:$0xf]  ;;  %v6637_v45 = vor.u32 %v8335_v5, %v6636_v61 }
 0x378   : > { %v8399_v12 = vld [vmem:[#allocation12 + $0x6b4] sm:$0xf0] }
 0x379   : > { %5172 = vmatpush.bf16.msrb.mxu3 %v6989_v17  ;;  %5148 = vmatpush.bf16.msrb.mxu1 %v6413_v36  ;;  %v6060_v39 = vld [vmem:[#allocation12 + $0x18] sm:$0xf]  ;;  %v6893_v16 = vor.u32 %v8399_v12, %v6892_v8 }
 0x37a   : > { %v8191_v14 = vld [vmem:[#allocation12 + $0x34] sm:$0xf0] }
 0x37b   : > { %5160 = vmatpush.bf16.msrb.mxu2 %v6701_v38  ;;  %5136 = vmatpush.bf16.msrb.mxu0 %v6125_v56  ;;  %v6316_v15 = vld [vmem:[#allocation12 + $0x218] sm:$0xf]  ;;  %v6061_v60 = vor.u32 %v8191_v14, %v6060_v39  ;;  %v4921_v38 = vpop.f32.mrf.mxu3 }
 0x37c   : > { %v8255_v53 = vld [vmem:[#allocation12 + $0x234] sm:$0xf0] }
 0x37d   : > { %5173 = vmatpush.bf16.msrb.mxu3 %v6957_v43  ;;  %5149 = vmatpush.bf16.msrb.mxu1 %v6381_v41  ;;  %v7308_v19 = vld [vmem:[#allocation12 + $0x9d8] sm:$0xf]  ;;  %v6317_v49 = vor.u32 %v8255_v53, %v6316_v15 }
 0x37e   : > { %v8503_v21 = vld [vmem:[#allocation12 + $0x9f4] sm:$0xf0] }
 0x37f   : > { %5161 = vmatpush.bf16.msrb.mxu2 %v6669_v52  ;;  %v7564_v42 = vld [vmem:[#allocation12 + $0xbd8] sm:$0xf]  ;;  %5137 = vmatpush.bf16.msrb.mxu0 %v6093_v22  ;;  %v7309_v20 = vor.u32 %v8503_v21, %v7308_v19  ;;  %v4932_v21 = vpop.f32.mrf.mxu0 }
 0x380   : > { %v8567_v23 = vld [vmem:[#allocation12 + $0xbf4] sm:$0xf0]  ;;  %v4933_v54 = vadd.f32 %v4932_v21, %v4495_v13  ;;  %v4958_v13 = vpop.f32.mrf.mxu2 }
 0x381   : > { %5174 = vmatpush.bf16.msrb.mxu3 %v6925_v10  ;;  %v6604_v46 = vld [vmem:[#allocation12 + $0x458] sm:$0xf]  ;;  %5150 = vmatpush.bf16.msrb.mxu1 %v6349_v62  ;;  %v7565_v32 = vor.u32 %v8567_v23, %v7564_v42  ;;  %v4945_v42 = vpop.f32.mrf.mxu1 }
 0x382   : > { %v8327_v25 = vld [vmem:[#allocation12 + $0x474] sm:$0xf0] }
 0x383   : > { %v6860_v6 = vld [vmem:[#allocation12 + $0x658] sm:$0xf]  ;;  %5162 = vmatpush.bf16.msrb.mxu2 %v6637_v45  ;;  %v6605_v36 = vor.u32 %v8327_v25, %v6604_v46  ;;  %5138 = vmatpush.bf16.msrb.mxu0 %v6061_v60 }
 0x384   : > { %v8391_v17 = vld [vmem:[#allocation12 + $0x674] sm:$0xf0] }
 0x385   : > { %5175 = vmatpush.bf16.msrb.mxu3 %v6893_v16  ;;  %v7276_v30 = vld [vmem:[#allocation12 + $0x998] sm:$0xf]  ;;  %v6861_v50 = vor.u32 %v8391_v17, %v6860_v6  ;;  %5151 = vmatpush.bf16.msrb.mxu1 %v6317_v49 }
 0x386   : > { %v8495_v34 = vld [vmem:[#allocation12 + $0x9b4] sm:$0xf0]  ;;  %5139 = vmatmul.bf16.vlgmr.msrb.gmra.mxu0 %v9704_v29 }
 0x387   : > { %v7532_v24 = vld [vmem:[#allocation12 + $0xb98] sm:$0xf]  ;;  %5183 = vmatpush.bf16.msra.mxu0 %v7309_v20  ;;  %v7277_v56 = vor.u32 %v8495_v34, %v7276_v30  ;;  %5163 = vmatpush.bf16.msrb.mxu2 %v6605_v36  ;;  %v4946_v20 = vadd.f32 %v4945_v42, %v4933_v54  ;;  %v8243_v54 = vld [vmem:[#allocation12 + $0x1dc] sm:$0xf] }
 0x388   : > { %v8559_v43 = vld [vmem:[#allocation12 + $0xbb4] sm:$0xf0]  ;;  %5152 = vmatmul.bf16.vlgmr.msrb.gmra.mxu1 %v9706_v0 }
 0x389   : > { %v6572_v44 = vld [vmem:[#allocation12 + $0x418] sm:$0xf]  ;;  %5196 = vmatpush.bf16.msra.mxu1 %v7565_v32  ;;  %v7533_v41 = vor.u32 %v8559_v43, %v7532_v24  ;;  %5176 = vmatpush.bf16.msrb.mxu3 %v6861_v50 }
 0x38a   : > { %v8319_v47 = vld [vmem:[#allocation12 + $0x434] sm:$0xf0] }
 0x38b   : > { %v6828_v48 = vld [vmem:[#allocation12 + $0x618] sm:$0xf]  ;;  %v6573_v9 = vor.u32 %v8319_v47, %v6572_v44  ;;  %5184 = vmatpush.bf16.msra.mxu0 %v7277_v56  ;;  %v4934_v56 = vpop.f32.mrf.mxu0 }
 0x38c   : > { %v8383_v40 = vld [vmem:[#allocation12 + $0x634] sm:$0xf0] }
 0x38d   : > { %v7820_v28 = vld [vmem:[#allocation12 + $0xdd8] sm:$0xf]  ;;  %v6829_v31 = vor.u32 %v8383_v40, %v6828_v48  ;;  %5197 = vmatpush.bf16.msra.mxu1 %v7533_v41  ;;  %5164 = vmatpush.bf16.msrb.mxu2 %v6573_v9  ;;  %v4947_v41 = vpop.f32.mrf.mxu1 }
 0x38e   : > { %v8631_v51 = vld [vmem:[#allocation12 + $0xdf4] sm:$0xf0]  ;;  %v8371_v41 = vld [vmem:[#allocation12 + $0x5dc] sm:$0xf] }
 0x38f   : > { %v8076_v33 = vld [vmem:[#allocation12 + $0xfd8] sm:$0xf]  ;;  %v7821_v57 = vor.u32 %v8631_v51, %v7820_v28  ;;  %5177 = vmatpush.bf16.msrb.mxu3 %v6829_v31 }
 0x390   : > { %v8695_v37 = vld [vmem:[#allocation12 + $0xff4] sm:$0xf0]  ;;  %5165 = vmatmul.bf16.vlgmr.msrb.gmra.mxu2 %v9711_v26 }
 0x391   : > { %v7244_v52 = vld [vmem:[#allocation12 + $0x958] sm:$0xf]  ;;  %v8077_v59 = vor.u32 %v8695_v37, %v8076_v33  ;;  %5209 = vmatpush.bf16.msra.mxu2 %v7821_v57 }
 0x392   : > { %v8487_v10 = vld [vmem:[#allocation12 + $0x974] sm:$0xf0]  ;;  %5178 = vmatmul.bf16.vlgmr.msrb.gmra.mxu3 %v9713_v27 }
 0x393   : > { %v7500_v61 = vld [vmem:[#allocation12 + $0xb58] sm:$0xf]  ;;  %v7245_v22 = vor.u32 %v8487_v10, %v7244_v52  ;;  %5222 = vmatpush.bf16.msra.mxu3 %v8077_v59 }
 0x394   : > { %v8551_v63 = vld [vmem:[#allocation12 + $0xb74] sm:$0xf0] }
 0x395   : > { %v7788_v1 = vld [vmem:[#allocation12 + $0xd98] sm:$0xf]  ;;  %v7501_v62 = vor.u32 %v8551_v63, %v7500_v61  ;;  %5185 = vmatpush.bf16.msra.mxu0 %v7245_v22  ;;  %v4971_v22 = vpop.f32.mrf.mxu3 }
 0x396   : > { %v8623_v5 = vld [vmem:[#allocation12 + $0xdb4] sm:$0xf0] }
 0x397   : > { %v8044_v8 = vld [vmem:[#allocation12 + $0xf98] sm:$0xf]  ;;  %v7789_v15 = vor.u32 %v8623_v5, %v7788_v1  ;;  %5198 = vmatpush.bf16.msra.mxu1 %v7501_v62 }
 0x398   : > { %v8687_v12 = vld [vmem:[#allocation12 + $0xfb4] sm:$0xf0] }
 0x399   : > { %v7212_v39 = vld [vmem:[#allocation12 + $0x918] sm:$0xf]  ;;  %v8045_v45 = vor.u32 %v8687_v12, %v8044_v8  ;;  %5210 = vmatpush.bf16.msra.mxu2 %v7789_v15  ;;  %v4959_v15 = vadd.f32 %v4958_v13, %v4946_v20  ;;  %v6478_v13 = vld [vmem:[#allocation12 + $0x378] sm:$0xf0] }
 0x39a   : > { %v8479_v14 = vld [vmem:[#allocation12 + $0x934] sm:$0xf0] }
 0x39b   : > { %v7468_v16 = vld [vmem:[#allocation12 + $0xb18] sm:$0xf]  ;;  %v7213_v6 = vor.u32 %v8479_v14, %v7212_v39  ;;  %5223 = vmatpush.bf16.msra.mxu3 %v8045_v45  ;;  %v9802_v42 = vadd.f32 %v4971_v22, %v4959_v15  ;;  %v8363_v22 = vld [vmem:[#allocation12 + $0x59c] sm:$0xf] }
 0x39c   : > { %v8543_v53 = vld [vmem:[#allocation12 + $0xb34] sm:$0xf0] }
 0x39d   : > { %v7756_v19 = vld [vmem:[#allocation12 + $0xd58] sm:$0xf]  ;;  %v7469_v17 = vor.u32 %v8543_v53, %v7468_v16  ;;  %5186 = vmatpush.bf16.msra.mxu0 %v7213_v6  ;;  %v6286_v6 = vld [vmem:[#allocation12 + $0x1f8] sm:$0xf0] }
 0x39e   : > { %v8615_v23 = vld [vmem:[#allocation12 + $0xd74] sm:$0xf0] }
 0x39f   : > { %v8012_v46 = vld [vmem:[#allocation12 + $0xf58] sm:$0xf]  ;;  %v7757_v32 = vor.u32 %v8615_v23, %v7756_v19  ;;  %5199 = vmatpush.bf16.msra.mxu1 %v7469_v17  ;;  %v8307_v17 = vld [vmem:[#allocation12 + $0x3dc] sm:$0xf] }
 0x3a0   : > { %v8679_v25 = vld [vmem:[#allocation12 + $0xf74] sm:$0xf0] }
 0x3a1   : > { %v7180_v60 = vld [vmem:[#allocation12 + $0x8d8] sm:$0xf]  ;;  %v8013_v30 = vor.u32 %v8679_v25, %v8012_v46  ;;  %5211 = vmatpush.bf16.msra.mxu2 %v7757_v32 }
 0x3a2   : > { %v8471_v49 = vld [vmem:[#allocation12 + $0x8f4] sm:$0xf0] }
 0x3a3   : > { %v7436_v34 = vld [vmem:[#allocation12 + $0xad8] sm:$0xf]  ;;  %v7181_v43 = vor.u32 %v8471_v49, %v7180_v60  ;;  %5224 = vmatpush.bf16.msra.mxu3 %v8013_v30  ;;  %v6542_v60 = vld [vmem:[#allocation12 + $0x3f8] sm:$0xf0] }
 0x3a4   : > { %v8535_v24 = vld [vmem:[#allocation12 + $0xaf4] sm:$0xf0] }
 0x3a5   : > { %v7724_v36 = vld [vmem:[#allocation12 + $0xd18] sm:$0xf]  ;;  %v7437_v44 = vor.u32 %v8535_v24, %v7436_v34  ;;  %5187 = vmatpush.bf16.msra.mxu0 %v7181_v43  ;;  %v8299_v43 = vld [vmem:[#allocation12 + $0x39c] sm:$0xf] }
 0x3a6   : > { %v8607_v50 = vld [vmem:[#allocation12 + $0xd34] sm:$0xf0] }
 0x3a7   : > { %v7980_v3 = vld [vmem:[#allocation12 + $0xf18] sm:$0xf]  ;;  %v7725_v40 = vor.u32 %v8607_v50, %v7724_v36  ;;  %5200 = vmatpush.bf16.msra.mxu1 %v7437_v44  ;;  %v6289_v36 = vor.u32 %v8243_v54, %v6286_v6  ;;  %v6545_v50 = vor.u32 %v8307_v17, %v6542_v60  ;;  %v4984_v54 = vpop.f32.mrf.mxu0  ;;  %v4997_v6 = vpop.f32.mrf.mxu1  ;;  %v6734_v17 = vld [vmem:[#allocation12 + $0x578] sm:$0xf0] }
 0x3a8   : > { %v8671_v38 = vld [vmem:[#allocation12 + $0xf34] sm:$0xf0]  ;;  %v8419_v60 = vld [vmem:[#allocation12 + $0x75c] sm:$0xf] }
 0x3a9   : > { %v7148_v47 = vld [vmem:[#allocation12 + $0x898] sm:$0xf]  ;;  %v7981_v28 = vor.u32 %v8671_v38, %v7980_v3  ;;  %5212 = vmatpush.bf16.msra.mxu2 %v7725_v40  ;;  %v8235_v3 = vld [vmem:[#allocation12 + $0x19c] sm:$0xf]  ;;  %v4973_v40 = vpop.f32.mrf.mxu3 }
 0x3aa   : > { %v8463_v48 = vld [vmem:[#allocation12 + $0x8b4] sm:$0xf0]  ;;  %v6254_v38 = vld [vmem:[#allocation12 + $0x1b8] sm:$0xf0] }
 0x3ab   : > { %v7404_v51 = vld [vmem:[#allocation12 + $0xa98] sm:$0xf]  ;;  %v7149_v10 = vor.u32 %v8463_v48, %v7148_v47  ;;  %5225 = vmatpush.bf16.msra.mxu3 %v7981_v28  ;;  %v4960_v48 = vpop.f32.mrf.mxu2  ;;  %v6510_v28 = vld [vmem:[#allocation12 + $0x3b8] sm:$0xf0] }
 0x3ac   : > { %v8527_v33 = vld [vmem:[#allocation12 + $0xab4] sm:$0xf0]  ;;  %v8411_v48 = vld [vmem:[#allocation12 + $0x71c] sm:$0xf] }
 0x3ad   : > { %v7692_v37 = vld [vmem:[#allocation12 + $0xcd8] sm:$0xf]  ;;  %v7405_v57 = vor.u32 %v8527_v33, %v7404_v51  ;;  %5188 = vmatpush.bf16.msra.mxu0 %v7149_v10  ;;  %v6257_v10 = vor.u32 %v8235_v3, %v6254_v38  ;;  %v8275_v38 = vld [vmem:[#allocation12 + $0x2dc] sm:$0xf] }
 0x3ae   : > { %v8599_v9 = vld [vmem:[#allocation12 + $0xcf4] sm:$0xf0]  ;;  %v6958_v40 = vld [vmem:[#allocation12 + $0x738] sm:$0xf0] }
 0x3af   : > { %v7948_v31 = vld [vmem:[#allocation12 + $0xed8] sm:$0xf]  ;;  %v7693_v63 = vor.u32 %v8599_v9, %v7692_v37  ;;  %5201 = vmatpush.bf16.msra.mxu1 %v7405_v57  ;;  %v6798_v9 = vld [vmem:[#allocation12 + $0x5f8] sm:$0xf0]  ;;  %v6513_v57 = vor.u32 %v8299_v43, %v6510_v28 }
 0x3b0   : > { %v8663_v52 = vld [vmem:[#allocation12 + $0xef4] sm:$0xf0]  ;;  %v6414_v43 = vld [vmem:[#allocation12 + $0x2f8] sm:$0xf0] }
 0x3b1   : > { %v7116_v59 = vld [vmem:[#allocation12 + $0x858] sm:$0xf]  ;;  %v7949_v1 = vor.u32 %v8663_v52, %v7948_v31  ;;  %5213 = vmatpush.bf16.msra.mxu2 %v7693_v63  ;;  %v8435_v31 = vld [vmem:[#allocation12 + $0x7dc] sm:$0xf]  ;;  %v6417_v28 = vor.u32 %v8275_v38, %v6414_v43 }
 0x3b2   : > { %v8455_v61 = vld [vmem:[#allocation12 + $0x874] sm:$0xf0]  ;;  %v7054_v52 = vld [vmem:[#allocation12 + $0x7f8] sm:$0xf0] }
 0x3b3   : > { %v7372_v5 = vld [vmem:[#allocation12 + $0xa58] sm:$0xf]  ;;  %v7117_v45 = vor.u32 %v8455_v61, %v7116_v59  ;;  %5226 = vmatpush.bf16.msra.mxu3 %v7949_v1  ;;  %v8227_v63 = vld [vmem:[#allocation12 + $0x15c] sm:$0xf] }
 0x3b4   : > { %v8519_v8 = vld [vmem:[#allocation12 + $0xa74] sm:$0xf0]  ;;  %v6222_v1 = vld [vmem:[#allocation12 + $0x178] sm:$0xf0] }
 0x3b5   : > { %v7660_v12 = vld [vmem:[#allocation12 + $0xc98] sm:$0xf]  ;;  %v7373_v16 = vor.u32 %v8519_v8, %v7372_v5  ;;  %5189 = vmatpush.bf16.msra.mxu0 %v7117_v45  ;;  %v6801_v5 = vor.u32 %v8371_v41, %v6798_v9  ;;  %v7057_v8 = vor.u32 %v8435_v31, %v7054_v52  ;;  %v6225_v15 = vor.u32 %v8227_v63, %v6222_v1  ;;  %v8267_v41 = vld [vmem:[#allocation12 + $0x29c] sm:$0xf]  ;;  %v4986_v52 = vpop.f32.mrf.mxu0 }
 0x3b6   : > { %v8591_v62 = vld [vmem:[#allocation12 + $0xcb4] sm:$0xf0]  ;;  %v6382_v9 = vld [vmem:[#allocation12 + $0x2b8] sm:$0xf0] }
 0x3b7   : > { %v7916_v39 = vld [vmem:[#allocation12 + $0xe98] sm:$0xf]  ;;  %v7661_v23 = vor.u32 %v8591_v62, %v7660_v12  ;;  %5202 = vmatpush.bf16.msra.mxu1 %v7373_v16  ;;  %v8291_v12 = vld [vmem:[#allocation12 + $0x35c] sm:$0xf]  ;;  %v6385_v1 = vor.u32 %v8267_v41, %v6382_v9 }
 0x3b8   : > { %v8655_v14 = vld [vmem:[#allocation12 + $0xeb4] sm:$0xf0]  ;;  %v6766_v62 = vld [vmem:[#allocation12 + $0x5b8] sm:$0xf0]  ;;  %v6481_v45 = vor.u32 %v8291_v12, %v6478_v13 }
 0x3b9   : > { %v7084_v53 = vld [vmem:[#allocation12 + $0x818] sm:$0xf]  ;;  %v7917_v46 = vor.u32 %v8655_v14, %v7916_v39  ;;  %5214 = vmatpush.bf16.msra.mxu2 %v7661_v23  ;;  %v8427_v39 = vld [vmem:[#allocation12 + $0x79c] sm:$0xf] }
 0x3ba   : > { %v8447_v19 = vld [vmem:[#allocation12 + $0x834] sm:$0xf0]  ;;  %v7022_v14 = vld [vmem:[#allocation12 + $0x7b8] sm:$0xf0] }
 0x3bb   : > { %v7340_v21 = vld [vmem:[#allocation12 + $0xa18] sm:$0xf]  ;;  %v7085_v34 = vor.u32 %v8447_v19, %v7084_v53  ;;  %5227 = vmatpush.bf16.msra.mxu3 %v7917_v46  ;;  %v8219_v16 = vld [vmem:[#allocation12 + $0x11c] sm:$0xf]  ;;  %v6769_v19 = vor.u32 %v8363_v22, %v6766_v62 }
 0x3bc   : > { %v8511_v25 = vld [vmem:[#allocation12 + $0xa34] sm:$0xf0]  ;;  %v6190_v53 = vld [vmem:[#allocation12 + $0x138] sm:$0xf0] }
 0x3bd   : > { %v7628_v49 = vld [vmem:[#allocation12 + $0xc58] sm:$0xf]  ;;  %v7341_v24 = vor.u32 %v8511_v25, %v7340_v21  ;;  %5190 = vmatpush.bf16.msra.mxu0 %v7085_v34  ;;  %v7025_v21 = vor.u32 %v8427_v39, %v7022_v14  ;;  %v8283_v23 = vld [vmem:[#allocation12 + $0x31c] sm:$0xf]  ;;  %v5010_v14 = vpop.f32.mrf.mxu2 }
 0x3be   : > { %v8583_v20 = vld [vmem:[#allocation12 + $0xc74] sm:$0xf0]  ;;  %v6446_v46 = vld [vmem:[#allocation12 + $0x338] sm:$0xf0] }
 0x3bf   : > { %v7884_v32 = vld [vmem:[#allocation12 + $0xe58] sm:$0xf]  ;;  %v7629_v44 = vor.u32 %v8583_v20, %v7628_v49  ;;  %5203 = vmatpush.bf16.msra.mxu1 %v7341_v24  ;;  %v8355_v25 = vld [vmem:[#allocation12 + $0x55c] sm:$0xf]  ;;  %v4985_v20 = vadd.f32 %v4984_v54, %v9802_v42 }
 0x3c0   : > { %v8647_v30 = vld [vmem:[#allocation12 + $0xe74] sm:$0xf0]  ;;  %5191 = vmatmul.bf16.vlgmr.msra.gmra.mxu0 %v9720_v2  ;;  %v6990_v49 = vld [vmem:[#allocation12 + $0x778] sm:$0xf0] }
 0x3c1   : > { %v7885_v47 = vor.u32 %v8647_v30, %v7884_v32  ;;  %v7596_v51 = vld [vmem:[#allocation12 + $0xc18] sm:$0xf]  ;;  %5235 = vmatpush.bf16.msrb.mxu0 %v6289_v36  ;;  %5215 = vmatpush.bf16.msra.mxu2 %v7629_v44  ;;  %v6193_v32 = vor.u32 %v8219_v16, %v6190_v53  ;;  %v6449_v30 = vor.u32 %v8283_v23, %v6446_v46  ;;  %v8211_v34 = vld [vmem:[#allocation12 + $0xdc] sm:$0xf] }
 0x3c2   : > { %v8575_v33 = vld [vmem:[#allocation12 + $0xc34] sm:$0xf0]  ;;  %5204 = vmatmul.bf16.vlgmr.msra.gmra.mxu1 %v9722_v55  ;;  %v6158_v24 = vld [vmem:[#allocation12 + $0xf8] sm:$0xf0]  ;;  %v4998_v36 = vadd.f32 %v4997_v6, %v4985_v20  ;;  %v6993_v3 = vor.u32 %v8419_v60, %v6990_v49 }
 0x3c3   : > { %v7852_v37 = vld [vmem:[#allocation12 + $0xe18] sm:$0xf]  ;;  %5248 = vmatpush.bf16.msrb.mxu1 %v6545_v50  ;;  %5228 = vmatpush.bf16.msra.mxu3 %v7885_v47  ;;  %v7597_v59 = vor.u32 %v8575_v33, %v7596_v51  ;;  %v6737_v50 = vor.u32 %v8355_v25, %v6734_v17  ;;  %v8347_v44 = vld [vmem:[#allocation12 + $0x51c] sm:$0xf]  ;;  %v6161_v42 = vor.u32 %v8211_v34, %v6158_v24 }
 0x3c4   : > { %v8639_v56 = vld [vmem:[#allocation12 + $0xe34] sm:$0xf0]  ;;  %v6702_v47 = vld [vmem:[#allocation12 + $0x538] sm:$0xf0] }
 0x3c5   : > { %v7853_v61 = vor.u32 %v8639_v56, %v7852_v37  ;;  %5236 = vmatpush.bf16.msrb.mxu0 %v6257_v10  ;;  %5216 = vmatpush.bf16.msra.mxu2 %v7597_v59  ;;  %v8203_v51 = vld [vmem:[#allocation12 + $0x9c] sm:$0xf]  ;;  %v6705_v37 = vor.u32 %v8347_v44, %v6702_v47  ;;  %v6961_v56 = vor.u32 %v8411_v48, %v6958_v40  ;;  %v4999_v10 = vpop.f32.mrf.mxu1 }
 0x3c6   : > { %v6126_v33 = vld [vmem:[#allocation12 + $0xb8] sm:$0xf0] }
 0x3c7   : > { %5249 = vmatpush.bf16.msrb.mxu1 %v6513_v57  ;;  %5229 = vmatpush.bf16.msra.mxu3 %v7853_v61  ;;  %v8339_v31 = vld [vmem:[#allocation12 + $0x4dc] sm:$0xf]  ;;  %v6129_v63 = vor.u32 %v8203_v51, %v6126_v33  ;;  %v5012_v33 = vpop.f32.mrf.mxu2 }
 0x3c8   : > { %5217 = vmatmul.bf16.vlgmr.msra.gmra.mxu2 %v9726_v35  ;;  %v6670_v57 = vld [vmem:[#allocation12 + $0x4f8] sm:$0xf0] }
 0x3c9   : > { %5261 = vmatpush.bf16.msrb.mxu2 %v6801_v5  ;;  %5237 = vmatpush.bf16.msrb.mxu0 %v6225_v15  ;;  %v8403_v59 = vld [vmem:[#allocation12 + $0x6dc] sm:$0xf]  ;;  %v6673_v12 = vor.u32 %v8339_v31, %v6670_v57  ;;  %v5023_v15 = vpop.f32.mrf.mxu3 }
 0x3ca   : > { %5230 = vmatmul.bf16.vlgmr.msra.gmra.mxu3 %v9728_v18  ;;  %v6926_v61 = vld [vmem:[#allocation12 + $0x6f8] sm:$0xf0] }
 0x3cb   : > { %5274 = vmatpush.bf16.msrb.mxu3 %v7057_v8  ;;  %5250 = vmatpush.bf16.msrb.mxu1 %v6481_v45  ;;  %v8195_v5 = vld [vmem:[#allocation12 + $0x5c] sm:$0xf]  ;;  %v6929_v13 = vor.u32 %v8403_v59, %v6926_v61 }
 0x3cc   : > { %v6094_v8 = vld [vmem:[#allocation12 + $0x78] sm:$0xf0] }
 0x3cd   : > { %5262 = vmatpush.bf16.msrb.mxu2 %v6769_v19  ;;  %5238 = vmatpush.bf16.msrb.mxu0 %v6193_v32  ;;  %v8259_v22 = vld [vmem:[#allocation12 + $0x25c] sm:$0xf]  ;;  %v5011_v19 = vadd.f32 %v5010_v14, %v4998_v36 }
 0x3ce   : > { %v6350_v62 = vld [vmem:[#allocation12 + $0x278] sm:$0xf0] }
 0x3cf   : > { %5275 = vmatpush.bf16.msrb.mxu3 %v7025_v21  ;;  %5251 = vmatpush.bf16.msrb.mxu1 %v6449_v30  ;;  %v8331_v39 = vld [vmem:[#allocation12 + $0x49c] sm:$0xf]  ;;  %v6097_v21 = vor.u32 %v8195_v5, %v6094_v8  ;;  %v6353_v23 = vor.u32 %v8259_v22, %v6350_v62  ;;  %v9809_v6 = vadd.f32 %v5023_v15, %v5011_v19  ;;  %v9813_v19 = vld [vmem:[#allocation14] sm:$0xff] }
 0x3d0   : > { %v6638_v45 = vld [vmem:[#allocation12 + $0x4b8] sm:$0xf0] }
 0x3d1   : > { %5263 = vmatpush.bf16.msrb.mxu2 %v6737_v50  ;;  %5239 = vmatpush.bf16.msrb.mxu0 %v6161_v42  ;;  %v8395_v16 = vld [vmem:[#allocation12 + $0x69c] sm:$0xf]  ;;  %v6641_v17 = vor.u32 %v8331_v39, %v6638_v45 }
 0x3d2   : > { %v6894_v53 = vld [vmem:[#allocation12 + $0x6b8] sm:$0xf0] }
 0x3d3   : > { %5276 = vmatpush.bf16.msrb.mxu3 %v6993_v3  ;;  %5252 = vmatpush.bf16.msrb.mxu1 %v6417_v28  ;;  %v8187_v46 = vld [vmem:[#allocation12 + $0x1c] sm:$0xf]  ;;  %v6897_v60 = vor.u32 %v8395_v16, %v6894_v53 }
 0x3d4   : > { %v6062_v25 = vld [vmem:[#allocation12 + $0x38] sm:$0xf0] }
 0x3d5   : > { %5264 = vmatpush.bf16.msrb.mxu2 %v6705_v37  ;;  %5240 = vmatpush.bf16.msrb.mxu0 %v6129_v63  ;;  %v8251_v54 = vld [vmem:[#allocation12 + $0x21c] sm:$0xf]  ;;  %v6065_v38 = vor.u32 %v8187_v46, %v6062_v25  ;;  %v5025_v37 = vpop.f32.mrf.mxu3 }
 0x3d6   : > { %v6318_v49 = vld [vmem:[#allocation12 + $0x238] sm:$0xf0] }
 0x3d7   : > { %5277 = vmatpush.bf16.msrb.mxu3 %v6961_v56  ;;  %5253 = vmatpush.bf16.msrb.mxu1 %v6385_v1  ;;  %v8499_v20 = vld [vmem:[#allocation12 + $0x9dc] sm:$0xf]  ;;  %v6321_v43 = vor.u32 %v8251_v54, %v6318_v49 }
 0x3d8   : > { %v7310_v32 = vld [vmem:[#allocation12 + $0x9f8] sm:$0xf0] }
 0x3d9   : > { %5265 = vmatpush.bf16.msrb.mxu2 %v6673_v12  ;;  %v8563_v30 = vld [vmem:[#allocation12 + $0xbdc] sm:$0xf]  ;;  %5241 = vmatpush.bf16.msrb.mxu0 %v6097_v21  ;;  %v7313_v44 = vor.u32 %v8499_v20, %v7310_v32  ;;  %v4496_v21 = vperm.slane %v9813_v19, 5  ;;  %v5036_v20 = vpop.f32.mrf.mxu0  ;;  %v5049_v32 = vpop.f32.mrf.mxu1 }
 0x3da   : > { %v7566_v34 = vld [vmem:[#allocation12 + $0xbf8] sm:$0xf0] }
 0x3db   : > { %5278 = vmatpush.bf16.msrb.mxu3 %v6929_v13  ;;  %v8323_v24 = vld [vmem:[#allocation12 + $0x45c] sm:$0xf]  ;;  %5254 = vmatpush.bf16.msrb.mxu1 %v6353_v23  ;;  %v7569_v47 = vor.u32 %v8563_v30, %v7566_v34 }
 0x3dc   : > { %v6606_v36 = vld [vmem:[#allocation12 + $0x478] sm:$0xf0] }
 0x3dd   : > { %v8387_v50 = vld [vmem:[#allocation12 + $0x65c] sm:$0xf]  ;;  %5266 = vmatpush.bf16.msrb.mxu2 %v6641_v17  ;;  %v6609_v28 = vor.u32 %v8323_v24, %v6606_v36  ;;  %5242 = vmatpush.bf16.msrb.mxu0 %v6065_v38  ;;  %v5037_v36 = vadd.f32 %v5036_v20, %v4496_v21 }
 0x3de   : > { %v6862_v3 = vld [vmem:[#allocation12 + $0x678] sm:$0xf0] }
 0x3df   : > { %5279 = vmatpush.bf16.msrb.mxu3 %v6897_v60  ;;  %v8491_v48 = vld [vmem:[#allocation12 + $0x99c] sm:$0xf]  ;;  %v6865_v51 = vor.u32 %v8387_v50, %v6862_v3  ;;  %5255 = vmatpush.bf16.msrb.mxu1 %v6321_v43 }
 0x3e0   : > { %v7278_v40 = vld [vmem:[#allocation12 + $0x9b8] sm:$0xf0]  ;;  %5243 = vmatmul.bf16.vlgmr.msrb.gmra.mxu0 %v9704_v29 }
 0x3e1   : > { %v8555_v42 = vld [vmem:[#allocation12 + $0xb9c] sm:$0xf]  ;;  %5287 = vmatpush.bf16.msra.mxu0 %v7313_v44  ;;  %v7281_v63 = vor.u32 %v8491_v48, %v7278_v40  ;;  %5267 = vmatpush.bf16.msrb.mxu2 %v6609_v28  ;;  %v5050_v44 = vadd.f32 %v5049_v32, %v5037_v36 }
 0x3e2   : > { %v7534_v56 = vld [vmem:[#allocation12 + $0xbb8] sm:$0xf0]  ;;  %5256 = vmatmul.bf16.vlgmr.msrb.gmra.mxu1 %v9706_v0 }
 0x3e3   : > { %v8315_v41 = vld [vmem:[#allocation12 + $0x41c] sm:$0xf]  ;;  %5300 = vmatpush.bf16.msra.mxu1 %v7569_v47  ;;  %v7537_v1 = vor.u32 %v8555_v42, %v7534_v56  ;;  %5280 = vmatpush.bf16.msrb.mxu3 %v6865_v51 }
 0x3e4   : > { %v6574_v9 = vld [vmem:[#allocation12 + $0x438] sm:$0xf0] }
 0x3e5   : > { %v8379_v31 = vld [vmem:[#allocation12 + $0x61c] sm:$0xf]  ;;  %v6577_v5 = vor.u32 %v8315_v41, %v6574_v9  ;;  %5288 = vmatpush.bf16.msra.mxu0 %v7281_v63 }
 0x3e6   : > { %v6830_v52 = vld [vmem:[#allocation12 + $0x638] sm:$0xf0] }
 0x3e7   : > { %v8627_v10 = vld [vmem:[#allocation12 + $0xddc] sm:$0xf]  ;;  %v6833_v8 = vor.u32 %v8379_v31, %v6830_v52  ;;  %5301 = vmatpush.bf16.msra.mxu1 %v7537_v1  ;;  %5268 = vmatpush.bf16.msrb.mxu2 %v6577_v5 }
 0x3e8   : > { %v7822_v57 = vld [vmem:[#allocation12 + $0xdf8] sm:$0xf0] }
 0x3e9   : > { %v8691_v59 = vld [vmem:[#allocation12 + $0xfdc] sm:$0xf]  ;;  %v7825_v22 = vor.u32 %v8627_v10, %v7822_v57  ;;  %5281 = vmatpush.bf16.msrb.mxu3 %v6833_v8 }
 0x3ea   : > { %v8078_v61 = vld [vmem:[#allocation12 + $0xff8] sm:$0xf0]  ;;  %5269 = vmatmul.bf16.vlgmr.msrb.gmra.mxu2 %v9711_v26 }
 0x3eb   : > { %v8483_v12 = vld [vmem:[#allocation12 + $0x95c] sm:$0xf]  ;;  %v8081_v62 = vor.u32 %v8691_v59, %v8078_v61  ;;  %5313 = vmatpush.bf16.msra.mxu2 %v7825_v22  ;;  %v5038_v59 = vpop.f32.mrf.mxu0  ;;  %v5051_v61 = vpop.f32.mrf.mxu1 }
 0x3ec   : > { %v7246_v13 = vld [vmem:[#allocation12 + $0x978] sm:$0xf0]  ;;  %5282 = vmatmul.bf16.vlgmr.msrb.gmra.mxu3 %v9713_v27 }
 0x3ed   : > { %v8547_v39 = vld [vmem:[#allocation12 + $0xb5c] sm:$0xf]  ;;  %v7249_v23 = vor.u32 %v8483_v12, %v7246_v13  ;;  %5326 = vmatpush.bf16.msra.mxu3 %v8081_v62 }
 0x3ee   : > { %v7502_v14 = vld [vmem:[#allocation12 + $0xb78] sm:$0xf0] }
 0x3ef   : > { %v8619_v15 = vld [vmem:[#allocation12 + $0xd9c] sm:$0xf]  ;;  %v7505_v29 = vor.u32 %v8547_v39, %v7502_v14  ;;  %5289 = vmatpush.bf16.msra.mxu0 %v7249_v23 }
 0x3f0   : > { %v7790_v45 = vld [vmem:[#allocation12 + $0xdb8] sm:$0xf0] }
 0x3f1   : > { %v8683_v16 = vld [vmem:[#allocation12 + $0xf9c] sm:$0xf]  ;;  %v7793_v25 = vor.u32 %v8619_v15, %v7790_v45  ;;  %5302 = vmatpush.bf16.msra.mxu1 %v7505_v29 }
 0x3f2   : > { %v8046_v53 = vld [vmem:[#allocation12 + $0xfb8] sm:$0xf0] }
 0x3f3   : > { %v8475_v46 = vld [vmem:[#allocation12 + $0x91c] sm:$0xf]  ;;  %v8049_v54 = vor.u32 %v8683_v16, %v8046_v53  ;;  %5314 = vmatpush.bf16.msra.mxu2 %v7793_v25  ;;  %v5062_v16 = vpop.f32.mrf.mxu2  ;;  %v5075_v53 = vpop.f32.mrf.mxu3 }
 0x3f4   : > { %v7214_v0 = vld [vmem:[#allocation12 + $0x938] sm:$0xf0] }
 0x3f5   : > { %v8539_v17 = vld [vmem:[#allocation12 + $0xb1c] sm:$0xf]  ;;  %v7217_v50 = vor.u32 %v8475_v46, %v7214_v0  ;;  %5327 = vmatpush.bf16.msra.mxu3 %v8049_v54  ;;  %v5063_v46 = vadd.f32 %v5062_v16, %v5050_v44 }
 0x3f6   : > { %v7470_v60 = vld [vmem:[#allocation12 + $0xb38] sm:$0xf0] }
 0x3f7   : > { %v8611_v49 = vld [vmem:[#allocation12 + $0xd5c] sm:$0xf]  ;;  %v7473_v3 = vor.u32 %v8539_v17, %v7470_v60  ;;  %5290 = vmatpush.bf16.msra.mxu0 %v7217_v50  ;;  %v5076_v60 = vadd.f32 %v5075_v53, %v5063_v46 }
 0x3f8   : > { %v7758_v30 = vld [vmem:[#allocation12 + $0xd78] sm:$0xf0] }
 0x3f9   : > { %v8675_v34 = vld [vmem:[#allocation12 + $0xf5c] sm:$0xf]  ;;  %v7761_v47 = vor.u32 %v8611_v49, %v7758_v30  ;;  %5303 = vmatpush.bf16.msra.mxu1 %v7473_v3 }
 0x3fa   : > { %v8014_v24 = vld [vmem:[#allocation12 + $0xf78] sm:$0xf0] }
 0x3fb   : > { %v8467_v38 = vld [vmem:[#allocation12 + $0x8dc] sm:$0xf]  ;;  %v8017_v48 = vor.u32 %v8675_v34, %v8014_v24  ;;  %5315 = vmatpush.bf16.msra.mxu2 %v7761_v47 }
 0x3fc   : > { %v7182_v43 = vld [vmem:[#allocation12 + $0x8f8] sm:$0xf0] }
 0x3fd   : > { %v8531_v40 = vld [vmem:[#allocation12 + $0xadc] sm:$0xf]  ;;  %v7185_v27 = vor.u32 %v8467_v38, %v7182_v43  ;;  %5328 = vmatpush.bf16.msra.mxu3 %v8017_v48  ;;  %v5064_v48 = vpop.f32.mrf.mxu2 }
 0x3fe   : > { %v7438_v42 = vld [vmem:[#allocation12 + $0xaf8] sm:$0xf0] }
 0x3ff   : > { %v8603_v28 = vld [vmem:[#allocation12 + $0xd1c] sm:$0xf]  ;;  %v7441_v37 = vor.u32 %v8531_v40, %v7438_v42  ;;  %5291 = vmatpush.bf16.msra.mxu0 %v7185_v27  ;;  %v5077_v40 = vpop.f32.mrf.mxu3  ;;  %v5088_v27 = vpop.f32.mrf.mxu0 }
 0x400   : > { %v7726_v51 = vld [vmem:[#allocation12 + $0xd38] sm:$0xf0] }
 0x401   : > { %v8667_v33 = vld [vmem:[#allocation12 + $0xf1c] sm:$0xf]  ;;  %v7729_v9 = vor.u32 %v8603_v28, %v7726_v51  ;;  %5304 = vmatpush.bf16.msra.mxu1 %v7441_v37  ;;  %v5101_v37 = vpop.f32.mrf.mxu1 }
 0x402   : > { %v7982_v26 = vld [vmem:[#allocation12 + $0xf38] sm:$0xf0] }
 0x403   : > { %v8459_v56 = vld [vmem:[#allocation12 + $0x89c] sm:$0xf]  ;;  %v7985_v31 = vor.u32 %v8667_v33, %v7982_v26  ;;  %5316 = vmatpush.bf16.msra.mxu2 %v7729_v9 }
 0x404   : > { %v7150_v41 = vld [vmem:[#allocation12 + $0x8b8] sm:$0xf0] }
 0x405   : > { %v8523_v52 = vld [vmem:[#allocation12 + $0xa9c] sm:$0xf]  ;;  %v7153_v8 = vor.u32 %v8459_v56, %v7150_v41  ;;  %5329 = vmatpush.bf16.msra.mxu3 %v7985_v31  ;;  %v5089_v56 = vadd.f32 %v5088_v27, %v5076_v60 }
 0x406   : > { %v7406_v10 = vld [vmem:[#allocation12 + $0xab8] sm:$0xf0] }
 0x407   : > { %v8595_v57 = vld [vmem:[#allocation12 + $0xcdc] sm:$0xf]  ;;  %v7409_v12 = vor.u32 %v8523_v52, %v7406_v10  ;;  %5292 = vmatpush.bf16.msra.mxu0 %v7153_v8  ;;  %v5102_v41 = vadd.f32 %v5101_v37, %v5089_v56  ;;  %v5090_v9 = vpop.f32.mrf.mxu0  ;;  %v5114_v52 = vpop.f32.mrf.mxu2 }
 0x408   : > { %v7694_v63 = vld [vmem:[#allocation12 + $0xcf8] sm:$0xf0]  ;;  %v5127_v10 = vpop.f32.mrf.mxu3 }
 0x409   : > { %v8659_v1 = vld [vmem:[#allocation12 + $0xedc] sm:$0xf]  ;;  %v7697_v62 = vor.u32 %v8595_v57, %v7694_v63  ;;  %5305 = vmatpush.bf16.msra.mxu1 %v7409_v12  ;;  %v5103_v31 = vpop.f32.mrf.mxu1  ;;  %v5115_v57 = vadd.f32 %v5114_v52, %v5102_v41  ;;  %v5369_v52 = vsel %vm5364_vm0, %v9809_v6, -inf }
 0x40a   : > { %v7950_v5 = vld [vmem:[#allocation12 + $0xef8] sm:$0xf0]  ;;  %v5366_v31 = vsel %vm5364_vm0, %v9765_v58, -inf }
 0x40b   : > { %v8451_v13 = vld [vmem:[#allocation12 + $0x85c] sm:$0xf]  ;;  %v7953_v39 = vor.u32 %v8659_v1, %v7950_v5  ;;  %5317 = vmatpush.bf16.msra.mxu2 %v7697_v62  ;;  %v9822_v59 = vadd.f32 %v5127_v10, %v5115_v57 }
 0x40c   : > { %v7118_v22 = vld [vmem:[#allocation12 + $0x878] sm:$0xf0] }
 0x40d   : > { %v8515_v14 = vld [vmem:[#allocation12 + $0xa5c] sm:$0xf]  ;;  %v7121_v0 = vor.u32 %v8451_v13, %v7118_v22  ;;  %5330 = vmatpush.bf16.msra.mxu3 %v7953_v39  ;;  %v5371_v41 = vsel %vm5364_vm0, %v9822_v59, -inf }
 0x40e   : > { %v7374_v15 = vld [vmem:[#allocation12 + $0xa78] sm:$0xf0]  ;;  %v5372_v57 = vmax.f32 %v5366_v31, %v5371_v41 }
 0x40f   : > { %v8587_v45 = vld [vmem:[#allocation12 + $0xc9c] sm:$0xf]  ;;  %v7377_v25 = vor.u32 %v8515_v14, %v7374_v15  ;;  %5293 = vmatpush.bf16.msra.mxu0 %v7121_v0  ;;  %v5140_v63 = vpop.f32.mrf.mxu0 }
 0x410   : > { %v7662_v21 = vld [vmem:[#allocation12 + $0xcb8] sm:$0xf0]  ;;  %v5129_v61 = vpop.f32.mrf.mxu3 }
 0x411   : > { %v8651_v23 = vld [vmem:[#allocation12 + $0xe9c] sm:$0xf]  ;;  %v7665_v49 = vor.u32 %v8587_v45, %v7662_v21  ;;  %5306 = vmatpush.bf16.msra.mxu1 %v7377_v25  ;;  %v5153_v1 = vpop.f32.mrf.mxu1  ;;  %v5365_v61 = vsel %vm5364_vm0, %v9754_v4, -inf }
 0x412   : > { %v7918_v29 = vld [vmem:[#allocation12 + $0xeb8] sm:$0xf0] }
 0x413   : > { %v8443_v54 = vld [vmem:[#allocation12 + $0x81c] sm:$0xf]  ;;  %v7921_v20 = vor.u32 %v8651_v23, %v7918_v29  ;;  %5318 = vmatpush.bf16.msra.mxu2 %v7665_v49 }
 0x414   : > { %v7086_v17 = vld [vmem:[#allocation12 + $0x838] sm:$0xf0] }
 0x415   : > { %v8507_v32 = vld [vmem:[#allocation12 + $0xa1c] sm:$0xf]  ;;  %v7089_v3 = vor.u32 %v8443_v54, %v7086_v17  ;;  %5331 = vmatpush.bf16.msra.mxu3 %v7921_v20 }
 0x416   : > { %v7342_v30 = vld [vmem:[#allocation12 + $0xa38] sm:$0xf0] }
 0x417   : > { %v8579_v34 = vld [vmem:[#allocation12 + $0xc5c] sm:$0xf]  ;;  %v7345_v38 = vor.u32 %v8507_v32, %v7342_v30  ;;  %5294 = vmatpush.bf16.msra.mxu0 %v7089_v3  ;;  %v4498_v30 = vperm.slane %v9813_v19, 7 }
 0x418   : > { %v7630_v24 = vld [vmem:[#allocation12 + $0xc78] sm:$0xf0]  ;;  %v5179_v13 = vpop.f32.mrf.mxu3 }
 0x419   : > { %v8643_v36 = vld [vmem:[#allocation12 + $0xe5c] sm:$0xf]  ;;  %v7633_v43 = vor.u32 %v8579_v34, %v7630_v24  ;;  %5307 = vmatpush.bf16.msra.mxu1 %v7345_v38  ;;  %v5155_v8 = vpop.f32.mrf.mxu1 }
 0x41a   : > { %v7886_v50 = vld [vmem:[#allocation12 + $0xe78] sm:$0xf0]  ;;  %5295 = vmatmul.bf16.vlgmr.msra.gmra.mxu0 %v9720_v2  ;;  %v5116_v2 = vpop.f32.mrf.mxu2 }
 0x41b   : > { %v7889_v44 = vor.u32 %v8643_v36, %v7886_v50  ;;  %v8571_v47 = vld [vmem:[#allocation12 + $0xc1c] sm:$0xf]  ;;  %5319 = vmatpush.bf16.msra.mxu2 %v7633_v43 }
 0x41c   : > { %v7598_v42 = vld [vmem:[#allocation12 + $0xc38] sm:$0xf0]  ;;  %5308 = vmatmul.bf16.vlgmr.msra.gmra.mxu1 %v9722_v55  ;;  %v4497_v55 = vperm.slane %v9813_v19, 6 }
 0x41d   : > { %v8635_v28 = vld [vmem:[#allocation12 + $0xe1c] sm:$0xf]  ;;  %5332 = vmatpush.bf16.msra.mxu3 %v7889_v44  ;;  %v7601_v33 = vor.u32 %v8571_v47, %v7598_v42  ;;  %v5339_v44 = vlaneseq }
 0x41e   : > { %v7854_v51 = vld [vmem:[#allocation12 + $0xe38] sm:$0xf0] }
 0x41f   : > { %v7857_v26 = vor.u32 %v8635_v28, %v7854_v51  ;;  %5320 = vmatpush.bf16.msra.mxu2 %v7601_v33  ;;  %v5340_v48 = vand.u32 127, %v5339_v44 }
 0x420   : > { %v5181_v14 = vpop.f32.mrf.mxu3 }
 0x421   : > { %5333 = vmatpush.bf16.msra.mxu3 %v7857_v26  ;;  %v5347_v33 = vadd.s32 896, %v5340_v48 }
 0x422   : > { %5321 = vmatmul.bf16.vlgmr.msra.gmra.mxu2 %v9726_v35  ;;  %v5141_v35 = vadd.f32 %v5140_v63, %v4497_v55  ;;  %v5166_v12 = vpop.f32.mrf.mxu2  ;;  %v5367_v55 = vsel %vm5364_vm0, %v9779_v7, -inf  ;;  %v5368_v63 = vsel %vm5364_vm0, %v9795_v11, -inf }
 0x423   : > { %vm5355_vm1 = vcmp.lt.s32.totalorder %v5347_v33, 1000 }
 0x424   : > { %5334 = vmatmul.bf16.vlgmr.msra.gmra.mxu3 %v9728_v18  ;;  %v5154_v5 = vadd.f32 %v5153_v1, %v5141_v35  ;;  %v5142_v18 = vpop.f32.mrf.mxu0  ;;  %v5370_v35 = vmax.f32 %v5365_v61, %v5369_v52 }
 0x426   : > { %v5167_v22 = vadd.f32 %v5166_v12, %v5154_v5 }
 0x428   : > { %v5180_v62 = vadd.f32 %v5179_v13, %v5167_v22  ;;  %v5377_v13 = vmax.f32 %v5370_v35, %v5372_v57 }
 0x42a   : > { %v5168_v39 = vpop.f32.mrf.mxu2 }
 0x43d   : > { %v5192_v15 = vpop.f32.mrf.mxu0 }
 0x43e   : > { %v5193_v16 = vadd.f32 %v5192_v15, %v5180_v62 }
 0x43f   : > { %v5205_v45 = vpop.f32.mrf.mxu1 }
 0x440   : > { %v5206_v53 = vadd.f32 %v5205_v45, %v5193_v16 }
 0x445   : > { %v5194_v21 = vpop.f32.mrf.mxu0 }
 0x447   : > { %v5207_v23 = vpop.f32.mrf.mxu1 }
 0x44b   : > { %v5218_v29 = vpop.f32.mrf.mxu2 }
 0x44c   : > { %v5219_v42 = vadd.f32 %v5218_v29, %v5206_v53 }
 0x44d   : > { %v5231_v46 = vpop.f32.mrf.mxu3 }
 0x44e   : > { %v5232_v27 = vadd.f32 %v5231_v46, %v5219_v42 }
 0x450   : > { %v5373_v10 = vsel %vm5364_vm0, %v5232_v27, -inf }
 0x451   : > { %v5374_v5 = vmax.f32 %v5367_v55, %v5373_v10 }
 0x453   : > { %v5220_v0 = vpop.f32.mrf.mxu2 }
 0x455   : > { %v5233_v25 = vpop.f32.mrf.mxu3 }
 0x45d   : > { %v5244_v54 = vpop.f32.mrf.mxu0 }
 0x45e   : > { %v5245_v36 = vadd.f32 %v5244_v54, %v4498_v30 }
 0x45f   : > { %v5257_v17 = vpop.f32.mrf.mxu1 }
 0x460   : > { %v5258_v50 = vadd.f32 %v5257_v17, %v5245_v36 }
 0x465   : > { %v5246_v60 = vpop.f32.mrf.mxu0 }
 0x467   : > { %v5259_v49 = vpop.f32.mrf.mxu1 }
 0x46d   : > { %v5270_v20 = vpop.f32.mrf.mxu2 }
 0x46e   : > { %v5271_v3 = vadd.f32 %v5270_v20, %v5258_v50 }
 0x46f   : > { %v5283_v32 = vpop.f32.mrf.mxu3 }
 0x470   : > { %v5284_v47 = vadd.f32 %v5283_v32, %v5271_v3 }
 0x475   : > { %v5272_v34 = vpop.f32.mrf.mxu2 }
 0x477   : > { %v5285_v24 = vpop.f32.mrf.mxu3 }
 0x497   : > { %v5296_v38 = vpop.f32.mrf.mxu0 }
 0x498   : > { %v5297_v40 = vadd.f32 %v5296_v38, %v5284_v47 }
 0x499   : > { %v5309_v43 = vpop.f32.mrf.mxu1 }
 0x49a   : > { %v5310_v26 = vadd.f32 %v5309_v43, %v5297_v40 }
 0x49f   : > { %v5298_v28 = vpop.f32.mrf.mxu0 }
 0x4a1   : > { %v5311_v51 = vpop.f32.mrf.mxu1 }
 0x4a5   : > { %v5322_v37 = vpop.f32.mrf.mxu2 }
 0x4a6   : > { %v5323_v19 = vadd.f32 %v5322_v37, %v5310_v26 }
 0x4a7   : > { %v5335_v56 = vpop.f32.mrf.mxu3 }
 0x4a8   : > { %v5336_v9 = vadd.f32 %v5335_v56, %v5323_v19 }
 0x4aa   : > { %v5363_v2 = vsel %vm5355_vm1, %v5336_v9, -1e+30 }
 0x4ab   : > { %v5375_v1 = vsel %vm5364_vm0, %v5363_v2, -inf }
 0x4ac   : > { %v5376_v18 = vmax.f32 %v5368_v63, %v5375_v1 }
 0x4ad   : > { %v5324_v8 = vpop.f32.mrf.mxu2 }
 0x4ae   : > { %v5378_v22 = vmax.f32 %v5374_v5, %v5376_v18 }
 0x4af   : > { %v5337_v12 = vpop.f32.mrf.mxu3 }
 0x4b0   : > { %v5379_v62 = vmax.f32 %v5377_v13, %v5378_v22 }
 0x4b2   : > { %5380 = vmax.xlane.f32.xlu0 %v5379_v62 }
 0x525   : > { %v5381_v39 = vpop.xlane.xlu0 %5380 }
 0x526   : > { %v5382_v14 = vsub.f32 %v9754_v4, %v5381_v39  ;;  %v5383_v15 = vsub.f32 %v9765_v58, %v5381_v39  ;;  %v5384_v45 = vsub.f32 %v9779_v7, %v5381_v39  ;;  %v5385_v16 = vsub.f32 %v9795_v11, %v5381_v39 }
 0x527   : > { %v5386_v53 = vsub.f32 %v9809_v6, %v5381_v39  ;;  %v5387_v46 = vsub.f32 %v9822_v59, %v5381_v39  ;;  %v5388_v25 = vsub.f32 %v5232_v27, %v5381_v39  ;;  %v5389_v4 = vsub.f32 %v5363_v2, %v5381_v39 }
 0x528   : > { %v5390_v21 = vmul.f32 1.442695, %v5382_v14  ;;  %v5392_v23 = vmul.f32 1.442695, %v5383_v15  ;;  %v5394_v29 = vmul.f32 1.442695, %v5384_v45 }
 0x529   : > { %v5396_v0 = vmul.f32 1.442695, %v5385_v16  ;;  %v5398_v54 = vmul.f32 1.442695, %v5386_v53  ;;  %v5400_v58 = vmul.f32 1.442695, %v5387_v46 }
 0x52a   : > { %8857 = vpow2.f32 %v5390_v21  ;;  %v5402_v7 = vmul.f32 1.442695, %v5388_v25  ;;  %v5404_v6 = vmul.f32 1.442695, %v5389_v4 }
 0x52b   : > { %8859 = vpow2.f32 %v5392_v23 }
 0x52c   : > { %8861 = vpow2.f32 %v5394_v29 }
 0x52d   : > { %8863 = vpow2.f32 %v5396_v0 }
 0x52e   : > { %8865 = vpow2.f32 %v5398_v54 }
 0x52f   : > { %8867 = vpow2.f32 %v5400_v58 }
 0x530   : > { %v8858_v17 = vpop.eup %8857  ;;  %8869 = vpow2.f32 %v5402_v7 }
 0x531   : > { %v8860_v11 = vpop.eup %8859  ;;  %v5406_v60 = vsel %vm5364_vm0, %v8858_v17, 0.0  ;;  %8871 = vpow2.f32 %v5404_v6 }
 0x532   : > { %v8862_v49 = vpop.eup %8861  ;;  %v5407_v59 = vsel %vm5364_vm0, %v8860_v11, 0.0 }
 0x533   : > { %v8864_v20 = vpop.eup %8863  ;;  %v5408_v32 = vadd.f32 %v5407_v59, %v5406_v60  ;;  %v5409_v30 = vsel %vm5364_vm0, %v8862_v49, 0.0 }
 0x534   : > { %v8866_v34 = vpop.eup %8865  ;;  %v5411_v36 = vsel %vm5364_vm0, %v8864_v20, 0.0 }
 0x535   : > { %v5410_v24 = vadd.f32 %v5409_v30, %v5408_v32  ;;  %v8868_v50 = vpop.eup %8867  ;;  %v5413_v38 = vsel %vm5364_vm0, %v8866_v34, 0.0 }
 0x536   : > { %v8870_v43 = vpop.eup %8869  ;;  %v5415_v47 = vsel %vm5364_vm0, %v8868_v50, 0.0 }
 0x537   : > { %v5412_v3 = vadd.f32 %v5411_v36, %v5410_v24  ;;  %v8872_v48 = vpop.eup %8871  ;;  %v5417_v42 = vsel %vm5364_vm0, %v8870_v43, 0.0 }
 0x538   : > { %v5419_v51 = vsel %vm5364_vm0, %v8872_v48, 0.0 }
 0x539   : > { %v5414_v44 = vadd.f32 %v5413_v38, %v5412_v3 }
 0x53b   : > { %v5416_v40 = vadd.f32 %v5415_v47, %v5414_v44 }
 0x53d   : > { %v5418_v28 = vadd.f32 %v5417_v42, %v5416_v40 }
 0x53f   : > { %v5420_v33 = vadd.f32 %v5419_v51, %v5418_v28 }
 0x541   : > { %5421 = vadd.xlane.f32.xlu0 %v5420_v33 }
 0x5b4   : > { %v5422_v26 = vpop.xlane.xlu0 %5421 }
 0x5b5   : > { %8873 = vrcp.f32 %v5422_v26 }
 0x5bb   : > { %v8874_v27 = vpop.eup %8873 }
 0x5bc   : > { %v5425_v37 = vmul.f32 %v8874_v27, %v8860_v11  ;;  %v5426_v56 = vmul.f32 %v8874_v27, %v8862_v49  ;;  %v5427_v19 = vmul.f32 %v8874_v27, %v8864_v20  ;;  %v5428_v41 = vmul.f32 %v8874_v27, %v8866_v34 }
 0x5bd   : > { %v5429_v9 = vmul.f32 %v8874_v27, %v8868_v50  ;;  %v5430_v31 = vmul.f32 %v8874_v27, %v8870_v43  ;;  %v5431_v52 = vmul.f32 %v8874_v27, %v8872_v48  ;;  %v5424_v10 = vmul.f32 %v8874_v27, %v8858_v17 }
 0x5be   : > { %v5440_v57 = vrot.slane %v5425_v37, 7  ;;  %v5441_v2 = vrot.slane %v5426_v56, 6  ;;  %v5442_v61 = vrot.slane %v5427_v19, 5  ;;  %v5443_v55 = vrot.slane %v5428_v41, 4 }
 0x5bf   : > { %v5444_v63 = vrot.slane %v5429_v9, 3  ;;  %v5445_v1 = vrot.slane %v5430_v31, 2  ;;  %v5446_v35 = vrot.slane %v5431_v52, 1 }
 0x5c0   : > { %v5447_v5 = vsel %vm5364_vm0, %v5424_v10, %v5440_v57  ;;  %v5449_v18 = vsel %vm5448_vm2, %v5441_v2, %v5442_v61 }
 0x5c1   : > { %v5451_v8 = vsel %vm5450_vm3, %v5447_v5, %v5449_v18  ;;  %v5453_v12 = vsel %vm5452_vm4, %v5443_v55, %v5444_v63  ;;  %v5455_v13 = vsel %vm5454_vm5, %v5445_v1, %v5446_v35 }
 0x5c2   : > { %v5457_v22 = vsel %vm5456_vm6, %v5453_v12, %v5455_v13 }
 0x5c3   : > { %v5459_v62 = vsel %vm5458_vm7, %v5451_v8, %v5457_v22 }
 0x5c4   : > { %5461 = vst [vmem:[%s407_s27] sm:$0xff] %v5459_v62 }
 0x5c5   : > { %9114 = shalt.err (!%p9111_p13)
}
 0x5c6   : > { %8722 = dma.vmem_to_hbm [thread:$0]  (%p9341_p2), %s5476_s18, 128, %s5478_s1, %s5463_s23  }
 0x5c7 PF: > { %s5489_s4 = sand.u32 1, %s9161_s24   ;;  %p8748_p0 = pnand %p5625_p6, %p9348_p5 }
 0x5c8   : > { %s5490_s30 = scalar_lea.sflag [#allocation5], %s5489_s4 }
 0x5c9   : > { %p8749_p4 = pneg %p8748_p0 }
 0x5cb   : > { %9156 = dma.done.wait (%p8749_p4), %s5490_s30, 128  }
 0x5cc   : > { %9158 = vsyncadd (%p8749_p4), %s5490_s30, 4294967168  ;;  %s26_s29 = sadd.s32 1, %s9181_s29   ;;  %s9949_s24 = smov %s9165_s25 }
 0x5cd   : > { %p23_p7 = scmp.ge.s32.totalorder %s26_s29, 4   ;;  %s9950_s25 = smov %s9169_s26 }
 0x5ce   : > { %s9951_s26 = smov %s9346_s20  ;;  %s9952_s27 = smov %s9177_s28 }
 0x5cf   : > { %s9953_s28 = smov %s9955_s16  ;;  %25 = sbr.rel (!%p23_p7) target bundleno = 14 (0xe), region = 125 }
 0x5d4   :  { %5496 = vsyncpa [#allocation4], 1 }
 0x5d5   :  { %5498 = vsyncpa [#allocation4 + $0x1], 1 }
 0x5d6   :  { %5499 = vsyncpa [#allocation7], 1 }
 0x5d7   :  { %5500 = vsyncpa [#allocation10], 1 }
 0x5d8   :  { %5501 = vsyncpa [#allocation13], 1 }
 0x5d9   :  { %5502 = vsyncpa [#allocation5], 1 }
 0x5da   :  { %5504 = vsyncpa [#allocation5 + $0x1], 1 }

</bundles_post_ra>
